<compile_context>
chip_gen: v7x
topology: tpu7x:2x2x1
jax: 0.10.0
libtpu: 0.0.40
codegen_flags: <defaults>
</compile_context>

<pallas_src>
import functools

import jax
import jax.numpy as jnp
from jax.experimental import pallas as pl
from jax.experimental.pallas import tpu as pltpu

_F32 = jnp.float32
_NEG_BIG = -1e9


# ----------------------------------------------------------------------------
# Pallas kernel: one (batch, query-row-tile, key-col-tile) per grid step.
# ----------------------------------------------------------------------------
def _eq_attn_kernel(q_ref, vdot_ref, vec3_ref, kv_ref, u_ref, rbf_ref, dij_ref,
                    cut_ref, *rest, num_heads, has_bias, has_pad):
  rest = list(rest)
  bias_ref = rest.pop(0) if has_bias else None
  pad_ref = rest.pop(0) if has_pad else None
  (wd_ref, bd_ref, wo_ref, bo_ref, seg_ref, expf_ref,
   dx_ref, dvec_ref, m_ref, l_ref, accx_ref, accv_ref) = rest

  TI, C = q_ref.shape[1], q_ref.shape[2]
  TJ = kv_ref.shape[1]
  R = rbf_ref.shape[3]
  H = num_heads

  j = pl.program_id(2)
  nj = pl.num_programs(2)

  @pl.when(j == 0)
  def _init():
    m_ref[...] = jnp.full((TI, H), -jnp.inf, _F32)
    l_ref[...] = jnp.zeros((TI, H), _F32)
    accx_ref[...] = jnp.zeros((TI, C), _F32)
    accv_ref[...] = jnp.zeros((3, TI, C), _F32)

  q = q_ref[0]                       # (TI, C)  compute dtype
  cdt = q.dtype
  kv = kv_ref[0]                     # (TJ, 3C)  chunk-major [k | vx | v2]
  k_j = kv[:, :C]
  vx_j = kv[:, C:2 * C]
  v2_j = kv[:, 2 * C:]
  rbf2 = rbf_ref[0].reshape(TI * TJ, R)

  def dist_proj(c0):
    """silu(rbf @ Wd[:, c0:c0+C] + bd[:, c0:c0+C]) -> (TI, TJ, C)."""
    h = jnp.dot(rbf2, wd_ref[:, c0:c0 + C], preferred_element_type=_F32)
    h = h + bd_ref[:, c0:c0 + C].astype(_F32)
    return jax.nn.silu(h.astype(cdt)).reshape(TI, TJ, C)

  # ---- attention logits (per-head sum via a small MXU segment matmul) ------
  dk = dist_proj(0)
  p_full = q[:, None, :] * k_j[None, :, :] * dk                       # (TI,TJ,C)
  logits = jnp.dot(p_full.reshape(TI * TJ, C), seg_ref[...],
                   preferred_element_type=_F32).reshape(TI, TJ, H)
  if has_bias:
    logits = logits + bias_ref[0].astype(_F32)
  if has_pad:
    logits = logits + pad_ref[0][:, :, None]                          # (1,TJ,1)

  # ---- online softmax over the key axis (f32 statistics) -------------------
  # TODO(synk): H is lane-sparse here; a (H, TI, TJ) lane-dense layout needs a
  # post-matmul relayout and is left for a follow-up.
  m_prev = m_ref[...]
  m_new = jnp.maximum(m_prev, jnp.max(logits, axis=1))                # (TI,H)
  alpha = jnp.exp(m_prev - m_new)
  p = jnp.exp(logits - m_new[:, None, :])                             # (TI,TJ,H) f32
  l_ref[...] = alpha * l_ref[...] + jnp.sum(p, axis=1)
  m_ref[...] = m_new

  # cutoff multiplies the weights only (denominator stays the pure softmax),
  # matching `softmax(logits) * cutoff` in the reference module.
  attn = p.astype(cdt) * cut_ref[0][:, :, None]                       # (TI,TJ,H)
  attn_c = jnp.dot(attn.reshape(TI * TJ, H), expf_ref[...],
                   preferred_element_type=_F32).astype(cdt).reshape(TI, TJ, C)

  # ---- attention-weighted scalar channel ------------------------------------
  dvx = dist_proj(C)
  alpha_c = jnp.dot(alpha, expf_ref[...], preferred_element_type=_F32)  # exact 0/1
  xpart = jnp.sum((attn_c * dvx * vx_j[None, :, :]).astype(_F32), axis=1)
  accx_ref[...] = accx_ref[...] * alpha_c + xpart

  # ---- equivariant vector messages (plain j-sum, no attention weights) ------
  dv1 = dist_proj(2 * C)
  dv2 = dist_proj(3 * C)
  v2w = v2_j[None, :, :] * dv2                                        # (TI,TJ,C)
  u = u_ref[0]                                                        # (3,TJ,C) = vec_j*v1_j
  dij = dij_ref[0]                                                    # (3,TI,TJ)
  for s in range(3):
    t1 = jnp.sum((dv1 * u[s][None, :, :]).astype(_F32), axis=1)       # (TI,C)
    t2 = jnp.sum((v2w * dij[s][:, :, None]).astype(_F32), axis=1)     # (TI,C)
    accv_ref[s] = accv_ref[s] + t1 + t2

  # ---- finalize on the last key tile ----------------------------------------
  @pl.when(j == nj - 1)
  def _finalize():
    inv_l_c = jnp.dot(1.0 / l_ref[...], expf_ref[...],
                      preferred_element_type=_F32)                    # (TI,C)
    xout = accx_ref[...] * inv_l_c
    o = jnp.dot(xout.astype(cdt), wo_ref[...],
                preferred_element_type=_F32) + bo_ref[...].astype(_F32)  # (TI,3C)
    o1, o2, o3 = o[:, :C], o[:, C:2 * C], o[:, 2 * C:]
    dx_ref[0] = (vdot_ref[0].astype(_F32) * o2 + o3).astype(dx_ref.dtype)
    vec3 = vec3_ref[0]                                                # (3,TI,C)
    for s in range(3):
      dvec_ref[0, s] = (vec3[s].astype(_F32) * o1 + accv_ref[s]
                        ).astype(dvec_ref.dtype)


# ----------------------------------------------------------------------------
# Generation-aware VMEM budget & tile selection
# ----------------------------------------------------------------------------
def _vmem_limit_bytes():
  cap = 64 * 1024 * 1024            # conservative default (v7x per-core VMEM)
  try:
    cap = int(getattr(pltpu.get_tpu_info(), "vmem_capacity_bytes", cap))
  except Exception:
    pass
  return int(max(32 * 1024 * 1024,
                 min(cap - 24 * 1024 * 1024, 100 * 1024 * 1024)))


def _row_tile_candidates(n):
  c = [t for t in (256, 128, 64, 32, 16, 8) if t <= n and n % t == 0]
  return c if c else [n]


def _key_tile_candidates(n):
  # TJ ends up as the last (lane) dim of several blocks -> multiple of 128 or N.
  c = [t for t in (512, 256, 128) if t <= n and n % t == 0]
  if n not in c:
    c.append(n)
  return c


def _step_bytes(ti, tj, C, R, H, itemsize, has_bias):
  per_i = 5 * ti * C                                   # q, vec_dot, vec3(3x)
  per_j = 6 * tj * C                                   # kv (3C) + u (3C)
  per_ij = ti * tj * (R + 5 + (H if has_bias else 0))  # rbf, dij(3), cut, pad, bias
  weights = 4 * R * C + 3 * C * C + 2 * C * H
  streamed = 2 * (per_i + per_j + per_ij + weights) * itemsize   # double-buffered
  temps = (6 * itemsize + 4) * ti * tj * C + 16 * ti * tj * H    # live body temps
  scratch = (4 * ti * C + 2 * ti * H) * 4
  return streamed + temps + scratch


def _pick_tiles(N, C, R, H, itemsize, budget, has_bias):
  best, best_score = None, None
  for ti in _row_tile_candidates(N):
    for tj in _key_tile_candidates(N):
      if _step_bytes(ti, tj, C, R, H, itemsize, has_bias) > budget:
        continue
      score = (ti * tj, tj, ti)
      if best_score is None or score > best_score:
        best, best_score = (ti, tj), score
  if best is None:
    # TODO(synk): very large N that is not 128-divisible still falls back to a
    # full-N key tile here; a BoundedSlice/padded path would be needed.
    best = (min(_row_tile_candidates(N)), min(_key_tile_candidates(N)))
  return best


# ----------------------------------------------------------------------------
# Wrapper = EquivariantTransformerEncoderLayer.forward (default flags)
# ----------------------------------------------------------------------------
def equivariant_transformer_encoder_layer(
    x, velocity, edge_feature, edge_direction, cutoff, params,
    self_attn_bias=None, self_attn_padding_mask=None, num_heads=4,
    row_tile=None, key_tile=None, compute_dtype=jnp.bfloat16):
  """Returns (dx, dvec, attn=None)."""
  B, N, C = x.shape
  R = edge_feature.shape[-1]
  H = num_heads
  assert C % H == 0
  D = C // H
  cdt = compute_dtype

  # TODO(synk): self_attn_layer_norm / dx_ln / DropPath / quant_noise /
  # attention dropout are disabled by the module defaults and omitted here.

  wq, bq, wk, bk, wv, bv, wvec, wdk, bdk, wdv, bdv, wo, bo = params

  # De-interleave "3C" value-side weights from [h][x|v1|v2][d] into chunk-major
  # per-C matrices so the kernel only uses lane-dense full-C slices.
  def split3(w):
    w3 = w.reshape(w.shape[0], H, 3, D)
    return (w3[:, :, 0].reshape(w.shape[0], C),
            w3[:, :, 1].reshape(w.shape[0], C),
            w3[:, :, 2].reshape(w.shape[0], C))

  wvx, wv1, wv2 = split3(wv)
  bvx, bv1, bv2 = split3(bv)
  wdvx, wdv1, wdv2 = split3(wdv)
  bdvx, bdv1, bdv2 = split3(bdv)

  # ---- per-node projections hoisted out of the O(N^2) grid (plain XLA) ------
  xf = x.astype(_F32)
  q = xf @ wq + bq
  k = xf @ wk + bk
  vx = xf @ wvx + bvx
  v1 = xf @ wv1 + bv1
  v2 = xf @ wv2 + bv2
  kv = jnp.concatenate([k, vx, v2], axis=-1)                   # (B, N, 3C)

  vel = velocity.astype(_F32)                                  # (B, N, 3, C)
  u = jnp.transpose(vel * v1[:, :, None, :], (0, 2, 1, 3))     # (B, 3, N, C)
  vp = jnp.einsum('bnsc,cf->bnsf', vel, wvec.astype(_F32))     # (B, N, 3, 3C)
  vec_dot = jnp.sum(vp[..., :C] * vp[..., C:2 * C], axis=2)    # (B, N, C)
  vec3 = jnp.transpose(vp[..., 2 * C:], (0, 2, 1, 3))          # (B, 3, N, C)

  # fused distance-projection weights [dk | dvx | dv1 | dv2]
  w_d = jnp.concatenate([wdk, wdvx, wdv1, wdv2], axis=1)       # (R, 4C)
  b_d = jnp.concatenate([bdk, bdvx, bdv1, bdv2], axis=1)       # (1, 4C)

  # head segment-sum / head->C expansion matrices (tiny constants)
  seg = (jnp.arange(C)[:, None] // D == jnp.arange(H)[None, :]).astype(_F32)
  expand = seg.T                                               # (H, C), exact 0/1

  has_bias = self_attn_bias is not None
  has_pad = self_attn_padding_mask is not None

  # ---- streamed tensors in the compute dtype (bf16 halves HBM traffic) ------
  inputs = [q.astype(cdt), vec_dot.astype(cdt), vec3.astype(cdt),
            kv.astype(cdt), u.astype(cdt),
            edge_feature.astype(cdt),                                     # (B,N,N,R)
            jnp.transpose(edge_direction, (0, 3, 1, 2)).astype(cdt),      # (B,3,N,N)
            cutoff.astype(cdt)]                                           # (B,N,N)

  itemsize = jnp.dtype(cdt).itemsize
  vmem_limit = _vmem_limit_bytes()
  ti_auto, tj_auto = _pick_tiles(N, C, R, H, itemsize,
                                 int(vmem_limit * 0.7), has_bias)
  TI = row_tile if row_tile is not None else ti_auto
  TJ = key_tile if key_tile is not None else tj_auto
  assert N % TI == 0 and N % TJ == 0, "row_tile/key_tile must divide N"
  # keep both TensorCores busy on v7x when B == 1
  if B == 1 and row_tile is None and (N // TI) < 2:
    smaller = [t for t in _row_tile_candidates(N) if t < TI]
    if smaller:
      TI = smaller[0]
  NI, NJ = N // TI, N // TJ

  in_specs = [
      pl.BlockSpec((1, TI, C), lambda b, i, j: (b, i, 0)),         # q rows
      pl.BlockSpec((1, TI, C), lambda b, i, j: (b, i, 0)),         # vec_dot rows
      pl.BlockSpec((1, 3, TI, C), lambda b, i, j: (b, 0, i, 0)),   # vec3 rows
      pl.BlockSpec((1, TJ, 3 * C), lambda b, i, j: (b, j, 0)),     # k|vx|v2 cols
      pl.BlockSpec((1, 3, TJ, C), lambda b, i, j: (b, 0, j, 0)),   # u cols
      pl.BlockSpec((1, TI, TJ, R), lambda b, i, j: (b, i, j, 0)),  # rbf tile
      pl.BlockSpec((1, 3, TI, TJ), lambda b, i, j: (b, 0, i, j)),  # d_ij tile
      pl.BlockSpec((1, TI, TJ), lambda b, i, j: (b, i, j)),        # cutoff tile
  ]
  if has_bias:
    inputs.append(jnp.transpose(self_attn_bias, (0, 2, 3, 1)).astype(cdt))
    in_specs.append(pl.BlockSpec((1, TI, TJ, H), lambda b, i, j: (b, i, j, 0)))
  if has_pad:
    inputs.append(jnp.where(self_attn_padding_mask, _NEG_BIG, 0.0
                            ).astype(_F32).reshape(B, 1, N))
    in_specs.append(pl.BlockSpec((1, 1, TJ), lambda b, i, j: (b, 0, j)))

  weights = (w_d.astype(cdt), b_d.astype(cdt), wo.astype(cdt), bo.astype(cdt),
             seg.astype(cdt), expand)                          # expand stays f32
  in_specs += [pl.BlockSpec(w.shape, lambda b, i, j, nd=w.ndim: (0,) * nd)
               for w in weights]
  inputs += list(weights)

  kernel = functools.partial(_eq_attn_kernel, num_heads=H,
                             has_bias=has_bias, has_pad=has_pad)

  dx, dvec_k = pl.pallas_call(
      kernel,
      out_shape=(jax.ShapeDtypeStruct((B, N, C), _F32),
                 jax.ShapeDtypeStruct((B, 3, N, C), _F32)),
      grid_spec=pltpu.PrefetchScalarGridSpec(
          num_scalar_prefetch=0,
          grid=(B, NI, NJ),
          in_specs=in_specs,
          out_specs=[pl.BlockSpec((1, TI, C), lambda b, i, j: (b, i, 0)),
                     pl.BlockSpec((1, 3, TI, C), lambda b, i, j: (b, 0, i, 0))],
          scratch_shapes=[pltpu.VMEM((TI, H), _F32),       # running max
                          pltpu.VMEM((TI, H), _F32),       # running denom
                          pltpu.VMEM((TI, C), _F32),       # x accumulator
                          pltpu.VMEM((3, TI, C), _F32)]),  # vector accumulator
      compiler_params=pltpu.CompilerParams(
          dimension_semantics=("parallel", "parallel", "arbitrary"),
          vmem_limit_bytes=vmem_limit),
  )(*inputs)

  dvec = jnp.transpose(dvec_k, (0, 2, 1, 3))            # back to (B, N, 3, C)
  return dx, dvec, None                                 # need_weights=False


# ----------------------------------------------------------------------------
# Deterministic parameter initialization (shapes from the module __init__)
# ----------------------------------------------------------------------------
def init_params(key, C, R):
  ks = jax.random.split(key, 13)

  def w(k, din, dout):
    return jax.random.normal(k, (din, dout), jnp.float32) / jnp.sqrt(din)

  def b(k, dout):
    return 0.05 * jax.random.normal(k, (1, dout), jnp.float32)

  wq = w(ks[0], C, C);       bq = b(ks[1], C)
  wk = w(ks[2], C, C);       bk = b(ks[3], C)
  wv = w(ks[4], C, 3 * C);   bv = b(ks[5], 3 * C)
  wvec = w(ks[6], C, 3 * C)                       # no bias
  wdk = w(ks[7], R, C);      bdk = b(ks[8], C)
  wdv = w(ks[9], R, 3 * C);  bdv = b(ks[10], 3 * C)
  wo = w(ks[11], C, 3 * C);  bo = b(ks[12], 3 * C)
  return (wq, bq, wk, bk, wv, bv, wvec, wdk, bdk, wdv, bdv, wo, bo)


# ----------------------------------------------------------------------------
# Pure-JAX reference (same math, original PyTorch weight layout) for checking
# ----------------------------------------------------------------------------
def reference_forward(x, velocity, rbf, d_ij, cutoff, bias, params, H):
  wq, bq, wk, bk, wv, bv, wvec, wdk, bdk, wdv, bdv, wo, bo = params
  B, N, C = x.shape
  D = C // H
  q = (x @ wq + bq).reshape(B, N, H, D)
  k = (x @ wk + bk).reshape(B, N, H, D)
  v = (x @ wv + bv).reshape(B, N, H, 3 * D)
  vp = jnp.einsum('bnsc,cf->bnsf', velocity, wvec)
  vec1, vec2, vec3 = vp[..., :C], vp[..., C:2 * C], vp[..., 2 * C:]
  vec_dot = (vec1 * vec2).sum(axis=2)                                   # (B,N,C)
  dk = jax.nn.silu(rbf @ wdk + bdk).reshape(B, N, N, H, D)
  dv = jax.nn.silu(rbf @ wdv + bdv).reshape(B, N, N, H, 3 * D)
  logits = jnp.einsum('bihd,bjhd,bijhd->bijh', q, k, dk) + bias
  attn = jax.nn.softmax(logits, axis=2) * cutoff[..., None]
  vm = v[:, None, :, :, :] * dv                                         # (B,i,j,H,3D)
  vx, v1, v2 = vm[..., :D], vm[..., D:2 * D], vm[..., 2 * D:]
  xo = jnp.einsum('bijh,bijhd->bihd', attn, vx).reshape(B, N, C)
  vecr = velocity.reshape(B, N, 3, H, D)
  msg = (vecr[:, None] * v1[:, :, :, None] +
         v2[:, :, :, None] * d_ij[:, :, :, :, None, None])
  vec_out = msg.sum(axis=2).reshape(B, N, 3, C)
  o = xo @ wo + bo
  o1, o2, o3 = o[..., :C], o[..., C:2 * C], o[..., 2 * C:]
  dx = vec_dot * o2 + o3
  dvec = vec3 * o1[:, :, None, :] + vec_out
  return dx, dvec


if __name__ == "__main__":
  B, N, C, H, R = 2, 8, 32, 4, 16

  key = jax.random.PRNGKey(0)
  kx, kvel, kp, kb, kw = jax.random.split(key, 5)

  x = jax.random.normal(kx, (B, N, C), jnp.float32)
  velocity = 0.1 * jax.random.normal(kvel, (B, N, 3, C), jnp.float32)

  # synthetic geometry -> dense pairwise RBF / directions / cutoff
  pos = 2.0 * jax.random.normal(kp, (B, N, 3), jnp.float32)
  rel = pos[:, :, None, :] - pos[:, None, :, :]                 # (B,N,N,3)
  dist = jnp.linalg.norm(rel, axis=-1)                          # (B,N,N)
  d_ij = rel / (dist[..., None] + 1e-6)
  rc = 6.0
  cutoff_vals = 0.5 * (jnp.cos(jnp.pi * dist / rc) + 1.0) * (dist < rc).astype(jnp.float32)
  centers = jnp.linspace(0.0, rc, R)
  rbf = jnp.exp(-((dist[..., None] - centers) ** 2))            # (B,N,N,R)

  attn_bias = 0.1 * jax.random.normal(kb, (B, H, N, N), jnp.float32)
  pad_mask = jnp.zeros((B, N), bool).at[1, N - 1].set(True)
  params = init_params(kw, C, R)

  # pure-JAX reference (pad mask folded into the additive bias, as the module does)
  bias_comb = (jnp.transpose(attn_bias, (0, 2, 3, 1)) +
               jnp.where(pad_mask[:, None, :, None], _NEG_BIG, 0.0))
  dx_exp, dvec_exp = reference_forward(x, velocity, rbf, d_ij, cutoff_vals,
                                       bias_comb, params, H)

  # f32 compute path: tight numerical verification of the kernel math
  dx32, dvec32, _ = equivariant_transformer_encoder_layer(
      x, velocity, rbf, d_ij, cutoff_vals, params,
      self_attn_bias=attn_bias, self_attn_padding_mask=pad_mask,
      num_heads=H, compute_dtype=jnp.float32)
  jax.block_until_ready((dx32, dvec32))
  assert dx32.shape == (B, N, C) and dvec32.shape == (B, N, 3, C)
  assert jnp.allclose(dx32, dx_exp, atol=2e-3, rtol=2e-3), "dx (f32) mismatch"
  assert jnp.allclose(dvec32, dvec_exp, atol=2e-3, rtol=2e-3), "dvec (f32) mismatch"

  # default bf16 compute path: fast path, looser tolerance (f32 accumulation)
  dx16, dvec16, _ = equivariant_transformer_encoder_layer(
      x, velocity, rbf, d_ij, cutoff_vals, params,
      self_attn_bias=attn_bias, self_attn_padding_mask=pad_mask, num_heads=H)
  jax.block_until_ready((dx16, dvec16))
  assert jnp.allclose(dx16, dx_exp, atol=1e-1, rtol=1e-1), "dx (bf16) mismatch"
  assert jnp.allclose(dvec16, dvec_exp, atol=1e-1, rtol=1e-1), "dvec (bf16) mismatch"

  print("KERNEL_OK")
</pallas_src>

<mosaic_0001>
module attributes {stable_mosaic.version = 11 : i64} {
  func.func @_eq_attn_kernel(%arg0: i32, %arg1: i32, %arg2: i32, %arg3: memref<1x8x32xf32, #tpu.memory_space<vmem>>, %arg4: memref<1x8x32xf32, #tpu.memory_space<vmem>>, %arg5: memref<1x3x8x32xf32, #tpu.memory_space<vmem>>, %arg6: memref<1x8x96xf32, #tpu.memory_space<vmem>>, %arg7: memref<1x3x8x32xf32, #tpu.memory_space<vmem>>, %arg8: memref<1x8x8x16xf32, #tpu.memory_space<vmem>>, %arg9: memref<1x3x8x8xf32, #tpu.memory_space<vmem>>, %arg10: memref<1x8x8xf32, #tpu.memory_space<vmem>>, %arg11: memref<1x8x8x4xf32, #tpu.memory_space<vmem>>, %arg12: memref<1x1x8xf32, #tpu.memory_space<vmem>>, %arg13: memref<16x128xf32, #tpu.memory_space<vmem>>, %arg14: memref<1x128xf32, #tpu.memory_space<vmem>>, %arg15: memref<32x96xf32, #tpu.memory_space<vmem>>, %arg16: memref<1x96xf32, #tpu.memory_space<vmem>>, %arg17: memref<32x4xf32, #tpu.memory_space<vmem>>, %arg18: memref<4x32xf32, #tpu.memory_space<vmem>>, %arg19: memref<1x8x32xf32, #tpu.memory_space<vmem>>, %arg20: memref<1x3x8x32xf32, #tpu.memory_space<vmem>>, %arg21: memref<8x4xf32, #tpu.memory_space<vmem>>, %arg22: memref<8x4xf32, #tpu.memory_space<vmem>>, %arg23: memref<8x32xf32, #tpu.memory_space<vmem>>, %arg24: memref<3x8x32xf32, #tpu.memory_space<vmem>>) attributes {dimension_semantics = [#tpu.dimension_semantics<parallel>, #tpu.dimension_semantics<parallel>, #tpu.dimension_semantics<arbitrary>], iteration_bounds = array<i64: 2, 1, 1>, scalar_prefetch = 0 : i64, scratch_operands = 4 : i64, tpu.core_type = #tpu.core_type<tc>, window_params = [{transform_indices = @transform_0, window_bounds = array<i64: 1, 8, 32>}, {transform_indices = @transform_1, window_bounds = array<i64: 1, 8, 32>}, {transform_indices = @transform_2, window_bounds = array<i64: 1, 3, 8, 32>}, {transform_indices = @transform_3, window_bounds = array<i64: 1, 8, 96>}, {transform_indices = @transform_4, window_bounds = array<i64: 1, 3, 8, 32>}, {transform_indices = @transform_5, window_bounds = array<i64: 1, 8, 8, 16>}, {transform_indices = @transform_6, window_bounds = array<i64: 1, 3, 8, 8>}, {transform_indices = @transform_7, window_bounds = array<i64: 1, 8, 8>}, {transform_indices = @transform_8, window_bounds = array<i64: 1, 8, 8, 4>}, {transform_indices = @transform_9, window_bounds = array<i64: 1, 1, 8>}, {pipeline_mode = #tpu.pipeline_mode<synchronous>, transform_indices = @transform_10, window_bounds = array<i64: 16, 128>}, {pipeline_mode = #tpu.pipeline_mode<synchronous>, transform_indices = @transform_11, window_bounds = array<i64: 1, 128>}, {pipeline_mode = #tpu.pipeline_mode<synchronous>, transform_indices = @transform_12, window_bounds = array<i64: 32, 96>}, {pipeline_mode = #tpu.pipeline_mode<synchronous>, transform_indices = @transform_13, window_bounds = array<i64: 1, 96>}, {pipeline_mode = #tpu.pipeline_mode<synchronous>, transform_indices = @transform_14, window_bounds = array<i64: 32, 4>}, {pipeline_mode = #tpu.pipeline_mode<synchronous>, transform_indices = @transform_15, window_bounds = array<i64: 4, 32>}, {transform_indices = @transform_16, window_bounds = array<i64: 1, 8, 32>}, {transform_indices = @transform_17, window_bounds = array<i64: 1, 3, 8, 32>}]} {
    %c0_i32 = arith.constant 0 : i32
    %0 = arith.cmpi eq, %arg2, %c0_i32 : i32
    %1 = arith.extui %0 : i1 to i32
    %c0_i32_0 = arith.constant 0 : i32
    %2 = arith.cmpi ne, %1, %c0_i32_0 : i32
    scf.if %2 {
      %cst_96 = arith.constant 0xFF800000 : f32
      %181 = vector.broadcast %cst_96 : f32 to vector<8x4xf32>
      %c0_97 = arith.constant 0 : index
      %c0_98 = arith.constant 0 : index
      %182 = vector.load %arg21[%c0_97, %c0_98] : memref<8x4xf32, #tpu.memory_space<vmem>>, vector<8x4xf32>
      tpu.vector_store %arg21[%c0_97, %c0_98], %181 {strides = array<i32>} : memref<8x4xf32, #tpu.memory_space<vmem>>, vector<8x4xf32>,
      %cst_99 = arith.constant 0.000000e+00 : f32
      %183 = vector.broadcast %cst_99 : f32 to vector<8x4xf32>
      %c0_100 = arith.constant 0 : index
      %c0_101 = arith.constant 0 : index
      %184 = vector.load %arg22[%c0_100, %c0_101] : memref<8x4xf32, #tpu.memory_space<vmem>>, vector<8x4xf32>
      tpu.vector_store %arg22[%c0_100, %c0_101], %183 {strides = array<i32>} : memref<8x4xf32, #tpu.memory_space<vmem>>, vector<8x4xf32>,
      %cst_102 = arith.constant 0.000000e+00 : f32
      %185 = vector.broadcast %cst_102 : f32 to vector<8x32xf32>
      %c0_103 = arith.constant 0 : index
      %c0_104 = arith.constant 0 : index
      %186 = vector.load %arg23[%c0_103, %c0_104] : memref<8x32xf32, #tpu.memory_space<vmem>>, vector<8x32xf32>
      tpu.vector_store %arg23[%c0_103, %c0_104], %185 {strides = array<i32>} : memref<8x32xf32, #tpu.memory_space<vmem>>, vector<8x32xf32>,
      %cst_105 = arith.constant 0.000000e+00 : f32
      %187 = vector.broadcast %cst_105 : f32 to vector<3x8x32xf32>
      %c0_106 = arith.constant 0 : index
      %c0_107 = arith.constant 0 : index
      %c0_108 = arith.constant 0 : index
      %188 = vector.load %arg24[%c0_106, %c0_107, %c0_108] : memref<3x8x32xf32, #tpu.memory_space<vmem>>, vector<3x8x32xf32>
      tpu.vector_store %arg24[%c0_106, %c0_107, %c0_108], %187 {strides = array<i32>} : memref<3x8x32xf32, #tpu.memory_space<vmem>>, vector<3x8x32xf32>,
    } else {
    }
    %c0 = arith.constant 0 : index
    %c0_1 = arith.constant 0 : index
    %c0_2 = arith.constant 0 : index
    %3 = vector.load %arg3[%c0, %c0_1, %c0_2] : memref<1x8x32xf32, #tpu.memory_space<vmem>>, vector<1x8x32xf32>
    %4 = vector.shape_cast %3 : vector<1x8x32xf32> to vector<8x32xf32>
    %c0_3 = arith.constant 0 : index
    %c0_4 = arith.constant 0 : index
    %c0_5 = arith.constant 0 : index
    %5 = vector.load %arg6[%c0_3, %c0_4, %c0_5] : memref<1x8x96xf32, #tpu.memory_space<vmem>>, vector<1x8x96xf32>
    %6 = vector.shape_cast %5 : vector<1x8x96xf32> to vector<8x96xf32>
    %7 = vector.extract_strided_slice %6 {offsets = [0, 0], sizes = [8, 32], strides = [1, 1]} : vector<8x96xf32> to vector<8x32xf32>
    %8 = vector.extract_strided_slice %6 {offsets = [0, 32], sizes = [8, 32], strides = [1, 1]} : vector<8x96xf32> to vector<8x32xf32>
    %9 = vector.extract_strided_slice %6 {offsets = [0, 64], sizes = [8, 32], strides = [1, 1]} : vector<8x96xf32> to vector<8x32xf32>
    %c0_6 = arith.constant 0 : index
    %c0_7 = arith.constant 0 : index
    %c0_8 = arith.constant 0 : index
    %c0_9 = arith.constant 0 : index
    %10 = vector.load %arg8[%c0_6, %c0_7, %c0_8, %c0_9] : memref<1x8x8x16xf32, #tpu.memory_space<vmem>>, vector<1x8x8x16xf32>
    %11 = vector.shape_cast %10 : vector<1x8x8x16xf32> to vector<8x8x16xf32>
    %12 = vector.shape_cast %11 : vector<8x8x16xf32> to vector<64x16xf32>
    %c0_10 = arith.constant 0 : index
    %c0_11 = arith.constant 0 : index
    %13 = vector.load %arg13[%c0_10, %c0_11] : memref<16x128xf32, #tpu.memory_space<vmem>>, vector<16x32xf32>
    %cst = arith.constant dense<0.000000e+00> : vector<64x32xf32>
    %14 = tpu.matmul %12, %13, %cst {dimension_numbers = #tpu.dot_dimension_numbers<[1], [0], [0], [1], [0, 0, 1, 1], [], []>} : vector<64x16xf32>, vector<16x32xf32>, vector<64x32xf32> -> vector<64x32xf32>
    %c0_12 = arith.constant 0 : index
    %c0_13 = arith.constant 0 : index
    %15 = vector.load %arg14[%c0_12, %c0_13] : memref<1x128xf32, #tpu.memory_space<vmem>>, vector<1x32xf32>
    %16 = vector.broadcast %15 : vector<1x32xf32> to vector<64x32xf32>
    %17 = arith.addf %14, %16 : vector<64x32xf32>
    %18 = arith.negf %17 : vector<64x32xf32>
    %19 = math.exp %18 : vector<64x32xf32>
    %cst_14 = arith.constant 1.000000e+00 : f32
    %20 = vector.broadcast %cst_14 : f32 to vector<64x32xf32>
    %21 = arith.addf %20, %19 : vector<64x32xf32>
    %22 = arith.divf %20, %21 : vector<64x32xf32>
    %23 = arith.mulf %17, %22 : vector<64x32xf32>
    %24 = vector.shape_cast %23 : vector<64x32xf32> to vector<8x8x32xf32>
    %25 = vector.shape_cast %4 : vector<8x32xf32> to vector<8x1x32xf32>
    %26 = vector.shape_cast %7 : vector<8x32xf32> to vector<1x8x32xf32>
    %27 = vector.broadcast %25 : vector<8x1x32xf32> to vector<8x8x32xf32>
    %28 = vector.broadcast %26 : vector<1x8x32xf32> to vector<8x8x32xf32>
    %29 = arith.mulf %27, %28 : vector<8x8x32xf32>
    %30 = arith.mulf %29, %24 : vector<8x8x32xf32>
    %31 = vector.shape_cast %30 : vector<8x8x32xf32> to vector<64x32xf32>
    %c0_15 = arith.constant 0 : index
    %c0_16 = arith.constant 0 : index
    %32 = vector.load %arg17[%c0_15, %c0_16] : memref<32x4xf32, #tpu.memory_space<vmem>>, vector<32x4xf32>
    %cst_17 = arith.constant dense<0.000000e+00> : vector<64x4xf32>
    %33 = tpu.matmul %31, %32, %cst_17 {dimension_numbers = #tpu.dot_dimension_numbers<[1], [0], [0], [1], [0, 0, 1, 1], [], []>} : vector<64x32xf32>, vector<32x4xf32>, vector<64x4xf32> -> vector<64x4xf32>
    %34 = vector.shape_cast %33 : vector<64x4xf32> to vector<8x8x4xf32>
    %c0_18 = arith.constant 0 : index
    %c0_19 = arith.constant 0 : index
    %c0_20 = arith.constant 0 : index
    %c0_21 = arith.constant 0 : index
    %35 = vector.load %arg11[%c0_18, %c0_19, %c0_20, %c0_21] : memref<1x8x8x4xf32, #tpu.memory_space<vmem>>, vector<1x8x8x4xf32>
    %36 = vector.shape_cast %35 : vector<1x8x8x4xf32> to vector<8x8x4xf32>
    %37 = arith.addf %34, %36 : vector<8x8x4xf32>
    %c0_22 = arith.constant 0 : index
    %c0_23 = arith.constant 0 : index
    %c0_24 = arith.constant 0 : index
    %38 = vector.load %arg12[%c0_22, %c0_23, %c0_24] : memref<1x1x8xf32, #tpu.memory_space<vmem>>, vector<1x1x8xf32>
    %39 = vector.shape_cast %38 : vector<1x1x8xf32> to vector<1x8xf32>
    %40 = vector.shape_cast %39 : vector<1x8xf32> to vector<1x8x1xf32>
    %41 = vector.broadcast %40 : vector<1x8x1xf32> to vector<8x8x4xf32>
    %42 = arith.addf %37, %41 : vector<8x8x4xf32>
    %c0_25 = arith.constant 0 : index
    %c0_26 = arith.constant 0 : index
    %43 = vector.load %arg21[%c0_25, %c0_26] : memref<8x4xf32, #tpu.memory_space<vmem>>, vector<8x4xf32>
    %cst_27 = arith.constant dense<0xFF800000> : vector<8x4xf32>
    %44 = vector.multi_reduction <maximumf>, %42, %cst_27 [1] : vector<8x8x4xf32> to vector<8x4xf32>
    %45 = arith.maximumf %43, %44 : vector<8x4xf32>
    %46 = arith.subf %43, %45 : vector<8x4xf32>
    %47 = math.exp %46 : vector<8x4xf32>
    %48 = vector.shape_cast %45 : vector<8x4xf32> to vector<8x1x4xf32>
    %49 = vector.broadcast %48 : vector<8x1x4xf32> to vector<8x8x4xf32>
    %50 = arith.subf %42, %49 : vector<8x8x4xf32>
    %51 = math.exp %50 : vector<8x8x4xf32>
    %c0_28 = arith.constant 0 : index
    %c0_29 = arith.constant 0 : index
    %52 = vector.load %arg22[%c0_28, %c0_29] : memref<8x4xf32, #tpu.memory_space<vmem>>, vector<8x4xf32>
    %53 = arith.mulf %47, %52 : vector<8x4xf32>
    %cst_30 = arith.constant dense<0.000000e+00> : vector<8x4xf32>
    %54 = vector.multi_reduction <add>, %51, %cst_30 [1] : vector<8x8x4xf32> to vector<8x4xf32>
    %55 = arith.addf %53, %54 : vector<8x4xf32>
    %c0_31 = arith.constant 0 : index
    %c0_32 = arith.constant 0 : index
    %56 = vector.load %arg22[%c0_31, %c0_32] : memref<8x4xf32, #tpu.memory_space<vmem>>, vector<8x4xf32>
    tpu.vector_store %arg22[%c0_31, %c0_32], %55 {strides = array<i32>} : memref<8x4xf32, #tpu.memory_space<vmem>>, vector<8x4xf32>,
    %c0_33 = arith.constant 0 : index
    %c0_34 = arith.constant 0 : index
    %57 = vector.load %arg21[%c0_33, %c0_34] : memref<8x4xf32, #tpu.memory_space<vmem>>, vector<8x4xf32>
    tpu.vector_store %arg21[%c0_33, %c0_34], %45 {strides = array<i32>} : memref<8x4xf32, #tpu.memory_space<vmem>>, vector<8x4xf32>,
    %c0_35 = arith.constant 0 : index
    %c0_36 = arith.constant 0 : index
    %c0_37 = arith.constant 0 : index
    %58 = vector.load %arg10[%c0_35, %c0_36, %c0_37] : memref<1x8x8xf32, #tpu.memory_space<vmem>>, vector<1x8x8xf32>
    %59 = vector.shape_cast %58 : vector<1x8x8xf32> to vector<8x8xf32>
    %60 = vector.shape_cast %59 : vector<8x8xf32> to vector<8x8x1xf32>
    %61 = vector.broadcast %60 : vector<8x8x1xf32> to vector<8x8x4xf32>
    %62 = arith.mulf %51, %61 : vector<8x8x4xf32>
    %63 = vector.shape_cast %62 : vector<8x8x4xf32> to vector<64x4xf32>
    %c0_38 = arith.constant 0 : index
    %c0_39 = arith.constant 0 : index
    %64 = vector.load %arg18[%c0_38, %c0_39] : memref<4x32xf32, #tpu.memory_space<vmem>>, vector<4x32xf32>
    %cst_40 = arith.constant dense<0.000000e+00> : vector<64x32xf32>
    %65 = tpu.matmul %63, %64, %cst_40 {dimension_numbers = #tpu.dot_dimension_numbers<[1], [0], [0], [1], [0, 0, 1, 1], [], []>} : vector<64x4xf32>, vector<4x32xf32>, vector<64x32xf32> -> vector<64x32xf32>
    %66 = vector.shape_cast %65 : vector<64x32xf32> to vector<8x8x32xf32>
    %c0_41 = arith.constant 0 : index
    %c32 = arith.constant 32 : index
    %67 = vector.load %arg13[%c0_41, %c32] : memref<16x128xf32, #tpu.memory_space<vmem>>, vector<16x32xf32>
    %cst_42 = arith.constant dense<0.000000e+00> : vector<64x32xf32>
    %68 = tpu.matmul %12, %67, %cst_42 {dimension_numbers = #tpu.dot_dimension_numbers<[1], [0], [0], [1], [0, 0, 1, 1], [], []>} : vector<64x16xf32>, vector<16x32xf32>, vector<64x32xf32> -> vector<64x32xf32>
    %c0_43 = arith.constant 0 : index
    %c32_44 = arith.constant 32 : index
    %69 = vector.load %arg14[%c0_43, %c32_44] : memref<1x128xf32, #tpu.memory_space<vmem>>, vector<1x32xf32>
    %70 = vector.broadcast %69 : vector<1x32xf32> to vector<64x32xf32>
    %71 = arith.addf %68, %70 : vector<64x32xf32>
    %72 = arith.negf %71 : vector<64x32xf32>
    %73 = math.exp %72 : vector<64x32xf32>
    %cst_45 = arith.constant 1.000000e+00 : f32
    %74 = vector.broadcast %cst_45 : f32 to vector<64x32xf32>
    %75 = arith.addf %74, %73 : vector<64x32xf32>
    %76 = arith.divf %74, %75 : vector<64x32xf32>
    %77 = arith.mulf %71, %76 : vector<64x32xf32>
    %78 = vector.shape_cast %77 : vector<64x32xf32> to vector<8x8x32xf32>
    %c0_46 = arith.constant 0 : index
    %c0_47 = arith.constant 0 : index
    %79 = vector.load %arg18[%c0_46, %c0_47] : memref<4x32xf32, #tpu.memory_space<vmem>>, vector<4x32xf32>
    %cst_48 = arith.constant dense<0.000000e+00> : vector<8x32xf32>
    %80 = tpu.matmul %47, %79, %cst_48 {dimension_numbers = #tpu.dot_dimension_numbers<[1], [0], [0], [1], [0, 0, 1, 1], [], []>} : vector<8x4xf32>, vector<4x32xf32>, vector<8x32xf32> -> vector<8x32xf32>
    %81 = arith.mulf %66, %78 : vector<8x8x32xf32>
    %82 = vector.shape_cast %8 : vector<8x32xf32> to vector<1x8x32xf32>
    %83 = vector.broadcast %82 : vector<1x8x32xf32> to vector<8x8x32xf32>
    %84 = arith.mulf %81, %83 : vector<8x8x32xf32>
    %cst_49 = arith.constant dense<0.000000e+00> : vector<8x32xf32>
    %85 = vector.multi_reduction <add>, %84, %cst_49 [1] : vector<8x8x32xf32> to vector<8x32xf32>
    %c0_50 = arith.constant 0 : index
    %c0_51 = arith.constant 0 : index
    %86 = vector.load %arg23[%c0_50, %c0_51] : memref<8x32xf32, #tpu.memory_space<vmem>>, vector<8x32xf32>
    %87 = arith.mulf %86, %80 : vector<8x32xf32>
    %88 = arith.addf %87, %85 : vector<8x32xf32>
    %c0_52 = arith.constant 0 : index
    %c0_53 = arith.constant 0 : index
    %89 = vector.load %arg23[%c0_52, %c0_53] : memref<8x32xf32, #tpu.memory_space<vmem>>, vector<8x32xf32>
    tpu.vector_store %arg23[%c0_52, %c0_53], %88 {strides = array<i32>} : memref<8x32xf32, #tpu.memory_space<vmem>>, vector<8x32xf32>,
    %c0_54 = arith.constant 0 : index
    %c64 = arith.constant 64 : index
    %90 = vector.load %arg13[%c0_54, %c64] : memref<16x128xf32, #tpu.memory_space<vmem>>, vector<16x32xf32>
    %cst_55 = arith.constant dense<0.000000e+00> : vector<64x32xf32>
    %91 = tpu.matmul %12, %90, %cst_55 {dimension_numbers = #tpu.dot_dimension_numbers<[1], [0], [0], [1], [0, 0, 1, 1], [], []>} : vector<64x16xf32>, vector<16x32xf32>, vector<64x32xf32> -> vector<64x32xf32>
    %c0_56 = arith.constant 0 : index
    %c64_57 = arith.constant 64 : index
    %92 = vector.load %arg14[%c0_56, %c64_57] : memref<1x128xf32, #tpu.memory_space<vmem>>, vector<1x32xf32>
    %93 = vector.broadcast %92 : vector<1x32xf32> to vector<64x32xf32>
    %94 = arith.addf %91, %93 : vector<64x32xf32>
    %95 = arith.negf %94 : vector<64x32xf32>
    %96 = math.exp %95 : vector<64x32xf32>
    %cst_58 = arith.constant 1.000000e+00 : f32
    %97 = vector.broadcast %cst_58 : f32 to vector<64x32xf32>
    %98 = arith.addf %97, %96 : vector<64x32xf32>
    %99 = arith.divf %97, %98 : vector<64x32xf32>
    %100 = arith.mulf %94, %99 : vector<64x32xf32>
    %101 = vector.shape_cast %100 : vector<64x32xf32> to vector<8x8x32xf32>
    %c0_59 = arith.constant 0 : index
    %c96 = arith.constant 96 : index
    %102 = vector.load %arg13[%c0_59, %c96] : memref<16x128xf32, #tpu.memory_space<vmem>>, vector<16x32xf32>
    %cst_60 = arith.constant dense<0.000000e+00> : vector<64x32xf32>
    %103 = tpu.matmul %12, %102, %cst_60 {dimension_numbers = #tpu.dot_dimension_numbers<[1], [0], [0], [1], [0, 0, 1, 1], [], []>} : vector<64x16xf32>, vector<16x32xf32>, vector<64x32xf32> -> vector<64x32xf32>
    %c0_61 = arith.constant 0 : index
    %c96_62 = arith.constant 96 : index
    %104 = vector.load %arg14[%c0_61, %c96_62] : memref<1x128xf32, #tpu.memory_space<vmem>>, vector<1x32xf32>
    %105 = vector.broadcast %104 : vector<1x32xf32> to vector<64x32xf32>
    %106 = arith.addf %103, %105 : vector<64x32xf32>
    %107 = arith.negf %106 : vector<64x32xf32>
    %108 = math.exp %107 : vector<64x32xf32>
    %cst_63 = arith.constant 1.000000e+00 : f32
    %109 = vector.broadcast %cst_63 : f32 to vector<64x32xf32>
    %110 = arith.addf %109, %108 : vector<64x32xf32>
    %111 = arith.divf %109, %110 : vector<64x32xf32>
    %112 = arith.mulf %106, %111 : vector<64x32xf32>
    %113 = vector.shape_cast %112 : vector<64x32xf32> to vector<8x8x32xf32>
    %114 = vector.shape_cast %9 : vector<8x32xf32> to vector<1x8x32xf32>
    %115 = vector.broadcast %114 : vector<1x8x32xf32> to vector<8x8x32xf32>
    %116 = arith.mulf %115, %113 : vector<8x8x32xf32>
    %c0_64 = arith.constant 0 : index
    %c0_65 = arith.constant 0 : index
    %c0_66 = arith.constant 0 : index
    %c0_67 = arith.constant 0 : index
    %117 = vector.load %arg7[%c0_64, %c0_65, %c0_66, %c0_67] : memref<1x3x8x32xf32, #tpu.memory_space<vmem>>, vector<1x3x8x32xf32>
    %118 = vector.shape_cast %117 : vector<1x3x8x32xf32> to vector<3x8x32xf32>
    %c0_68 = arith.constant 0 : index
    %c0_69 = arith.constant 0 : index
    %c0_70 = arith.constant 0 : index
    %c0_71 = arith.constant 0 : index
    %119 = vector.load %arg9[%c0_68, %c0_69, %c0_70, %c0_71] : memref<1x3x8x8xf32, #tpu.memory_space<vmem>>, vector<1x3x8x8xf32>
    %120 = vector.shape_cast %119 : vector<1x3x8x8xf32> to vector<3x8x8xf32>
    %121 = vector.extract_strided_slice %118 {offsets = [0, 0, 0], sizes = [1, 8, 32], strides = [1, 1, 1]} : vector<3x8x32xf32> to vector<1x8x32xf32>
    %122 = vector.shape_cast %121 : vector<1x8x32xf32> to vector<8x32xf32>
    %123 = vector.shape_cast %122 : vector<8x32xf32> to vector<1x8x32xf32>
    %124 = vector.broadcast %123 : vector<1x8x32xf32> to vector<8x8x32xf32>
    %125 = arith.mulf %101, %124 : vector<8x8x32xf32>
    %cst_72 = arith.constant dense<0.000000e+00> : vector<8x32xf32>
    %126 = vector.multi_reduction <add>, %125, %cst_72 [1] : vector<8x8x32xf32> to vector<8x32xf32>
    %127 = vector.extract_strided_slice %120 {offsets = [0, 0, 0], sizes = [1, 8, 8], strides = [1, 1, 1]} : vector<3x8x8xf32> to vector<1x8x8xf32>
    %128 = vector.shape_cast %127 : vector<1x8x8xf32> to vector<8x8xf32>
    %129 = vector.shape_cast %128 : vector<8x8xf32> to vector<8x8x1xf32>
    %130 = vector.broadcast %129 : vector<8x8x1xf32> to vector<8x8x32xf32>
    %131 = arith.mulf %116, %130 : vector<8x8x32xf32>
    %cst_73 = arith.constant dense<0.000000e+00> : vector<8x32xf32>
    %132 = vector.multi_reduction <add>, %131, %cst_73 [1] : vector<8x8x32xf32> to vector<8x32xf32>
    %c0_74 = arith.constant 0 : index
    %c0_75 = arith.constant 0 : index
    %c0_76 = arith.constant 0 : index
    %133 = vector.load %arg24[%c0_74, %c0_75, %c0_76] : memref<3x8x32xf32, #tpu.memory_space<vmem>>, vector<1x8x32xf32>
    %134 = vector.shape_cast %133 : vector<1x8x32xf32> to vector<8x32xf32>
    %135 = arith.addf %134, %126 : vector<8x32xf32>
    %136 = arith.addf %135, %132 : vector<8x32xf32>
    %c0_77 = arith.constant 0 : index
    %c0_78 = arith.constant 0 : index
    %c0_79 = arith.constant 0 : index
    %137 = vector.load %arg24[%c0_77, %c0_78, %c0_79] : memref<3x8x32xf32, #tpu.memory_space<vmem>>, vector<1x8x32xf32>
    %138 = vector.shape_cast %137 : vector<1x8x32xf32> to vector<8x32xf32>
    %139 = vector.shape_cast %136 : vector<8x32xf32> to vector<1x8x32xf32>
    tpu.vector_store %arg24[%c0_77, %c0_78, %c0_79], %139 {strides = array<i32>} : memref<3x8x32xf32, #tpu.memory_space<vmem>>, vector<1x8x32xf32>,
    %140 = vector.extract_strided_slice %118 {offsets = [1, 0, 0], sizes = [1, 8, 32], strides = [1, 1, 1]} : vector<3x8x32xf32> to vector<1x8x32xf32>
    %141 = vector.shape_cast %140 : vector<1x8x32xf32> to vector<8x32xf32>
    %142 = vector.shape_cast %141 : vector<8x32xf32> to vector<1x8x32xf32>
    %143 = vector.broadcast %142 : vector<1x8x32xf32> to vector<8x8x32xf32>
    %144 = arith.mulf %101, %143 : vector<8x8x32xf32>
    %cst_80 = arith.constant dense<0.000000e+00> : vector<8x32xf32>
    %145 = vector.multi_reduction <add>, %144, %cst_80 [1] : vector<8x8x32xf32> to vector<8x32xf32>
    %146 = vector.extract_strided_slice %120 {offsets = [1, 0, 0], sizes = [1, 8, 8], strides = [1, 1, 1]} : vector<3x8x8xf32> to vector<1x8x8xf32>
    %147 = vector.shape_cast %146 : vector<1x8x8xf32> to vector<8x8xf32>
    %148 = vector.shape_cast %147 : vector<8x8xf32> to vector<8x8x1xf32>
    %149 = vector.broadcast %148 : vector<8x8x1xf32> to vector<8x8x32xf32>
    %150 = arith.mulf %116, %149 : vector<8x8x32xf32>
    %cst_81 = arith.constant dense<0.000000e+00> : vector<8x32xf32>
    %151 = vector.multi_reduction <add>, %150, %cst_81 [1] : vector<8x8x32xf32> to vector<8x32xf32>
    %c1 = arith.constant 1 : index
    %c0_82 = arith.constant 0 : index
    %c0_83 = arith.constant 0 : index
    %152 = vector.load %arg24[%c1, %c0_82, %c0_83] : memref<3x8x32xf32, #tpu.memory_space<vmem>>, vector<1x8x32xf32>
    %153 = vector.shape_cast %152 : vector<1x8x32xf32> to vector<8x32xf32>
    %154 = arith.addf %153, %145 : vector<8x32xf32>
    %155 = arith.addf %154, %151 : vector<8x32xf32>
    %c1_84 = arith.constant 1 : index
    %c0_85 = arith.constant 0 : index
    %c0_86 = arith.constant 0 : index
    %156 = vector.load %arg24[%c1_84, %c0_85, %c0_86] : memref<3x8x32xf32, #tpu.memory_space<vmem>>, vector<1x8x32xf32>
    %157 = vector.shape_cast %156 : vector<1x8x32xf32> to vector<8x32xf32>
    %158 = vector.shape_cast %155 : vector<8x32xf32> to vector<1x8x32xf32>
    tpu.vector_store %arg24[%c1_84, %c0_85, %c0_86], %158 {strides = array<i32>} : memref<3x8x32xf32, #tpu.memory_space<vmem>>, vector<1x8x32xf32>,
    %159 = vector.extract_strided_slice %118 {offsets = [2, 0, 0], sizes = [1, 8, 32], strides = [1, 1, 1]} : vector<3x8x32xf32> to vector<1x8x32xf32>
    %160 = vector.shape_cast %159 : vector<1x8x32xf32> to vector<8x32xf32>
    %161 = vector.shape_cast %160 : vector<8x32xf32> to vector<1x8x32xf32>
    %162 = vector.broadcast %161 : vector<1x8x32xf32> to vector<8x8x32xf32>
    %163 = arith.mulf %101, %162 : vector<8x8x32xf32>
    %cst_87 = arith.constant dense<0.000000e+00> : vector<8x32xf32>
    %164 = vector.multi_reduction <add>, %163, %cst_87 [1] : vector<8x8x32xf32> to vector<8x32xf32>
    %165 = vector.extract_strided_slice %120 {offsets = [2, 0, 0], sizes = [1, 8, 8], strides = [1, 1, 1]} : vector<3x8x8xf32> to vector<1x8x8xf32>
    %166 = vector.shape_cast %165 : vector<1x8x8xf32> to vector<8x8xf32>
    %167 = vector.shape_cast %166 : vector<8x8xf32> to vector<8x8x1xf32>
    %168 = vector.broadcast %167 : vector<8x8x1xf32> to vector<8x8x32xf32>
    %169 = arith.mulf %116, %168 : vector<8x8x32xf32>
    %cst_88 = arith.constant dense<0.000000e+00> : vector<8x32xf32>
    %170 = vector.multi_reduction <add>, %169, %cst_88 [1] : vector<8x8x32xf32> to vector<8x32xf32>
    %c2 = arith.constant 2 : index
    %c0_89 = arith.constant 0 : index
    %c0_90 = arith.constant 0 : index
    %171 = vector.load %arg24[%c2, %c0_89, %c0_90] : memref<3x8x32xf32, #tpu.memory_space<vmem>>, vector<1x8x32xf32>
    %172 = vector.shape_cast %171 : vector<1x8x32xf32> to vector<8x32xf32>
    %173 = arith.addf %172, %164 : vector<8x32xf32>
    %174 = arith.addf %173, %170 : vector<8x32xf32>
    %c2_91 = arith.constant 2 : index
    %c0_92 = arith.constant 0 : index
    %c0_93 = arith.constant 0 : index
    %175 = vector.load %arg24[%c2_91, %c0_92, %c0_93] : memref<3x8x32xf32, #tpu.memory_space<vmem>>, vector<1x8x32xf32>
    %176 = vector.shape_cast %175 : vector<1x8x32xf32> to vector<8x32xf32>
    %177 = vector.shape_cast %174 : vector<8x32xf32> to vector<1x8x32xf32>
    tpu.vector_store %arg24[%c2_91, %c0_92, %c0_93], %177 {strides = array<i32>} : memref<3x8x32xf32, #tpu.memory_space<vmem>>, vector<1x8x32xf32>,
    %c0_i32_94 = arith.constant 0 : i32
    %178 = arith.cmpi eq, %arg2, %c0_i32_94 : i32
    %179 = arith.extui %178 : i1 to i32
    %c0_i32_95 = arith.constant 0 : i32
    %180 = arith.cmpi ne, %179, %c0_i32_95 : i32
    scf.if %180 {
      %c0_96 = arith.constant 0 : index
      %c0_97 = arith.constant 0 : index
      %181 = vector.load %arg22[%c0_96, %c0_97] : memref<8x4xf32, #tpu.memory_space<vmem>>, vector<8x4xf32>
      %cst_98 = arith.constant 1.000000e+00 : f32
      %182 = vector.broadcast %cst_98 : f32 to vector<8x4xf32>
      %183 = arith.divf %182, %181 : vector<8x4xf32>
      %c0_99 = arith.constant 0 : index
      %c0_100 = arith.constant 0 : index
      %184 = vector.load %arg18[%c0_99, %c0_100] : memref<4x32xf32, #tpu.memory_space<vmem>>, vector<4x32xf32>
      %cst_101 = arith.constant dense<0.000000e+00> : vector<8x32xf32>
      %185 = tpu.matmul %183, %184, %cst_101 {dimension_numbers = #tpu.dot_dimension_numbers<[1], [0], [0], [1], [0, 0, 1, 1], [], []>} : vector<8x4xf32>, vector<4x32xf32>, vector<8x32xf32> -> vector<8x32xf32>
      %c0_102 = arith.constant 0 : index
      %c0_103 = arith.constant 0 : index
      %186 = vector.load %arg23[%c0_102, %c0_103] : memref<8x32xf32, #tpu.memory_space<vmem>>, vector<8x32xf32>
      %187 = arith.mulf %186, %185 : vector<8x32xf32>
      %c0_104 = arith.constant 0 : index
      %c0_105 = arith.constant 0 : index
      %188 = vector.load %arg15[%c0_104, %c0_105] : memref<32x96xf32, #tpu.memory_space<vmem>>, vector<32x96xf32>
      %cst_106 = arith.constant dense<0.000000e+00> : vector<8x96xf32>
      %189 = tpu.matmul %187, %188, %cst_106 {dimension_numbers = #tpu.dot_dimension_numbers<[1], [0], [0], [1], [0, 0, 1, 1], [], []>} : vector<8x32xf32>, vector<32x96xf32>, vector<8x96xf32> -> vector<8x96xf32>
      %c0_107 = arith.constant 0 : index
      %c0_108 = arith.constant 0 : index
      %190 = vector.load %arg16[%c0_107, %c0_108] : memref<1x96xf32, #tpu.memory_space<vmem>>, vector<1x96xf32>
      %191 = vector.broadcast %190 : vector<1x96xf32> to vector<8x96xf32>
      %192 = arith.addf %189, %191 : vector<8x96xf32>
      %193 = vector.extract_strided_slice %192 {offsets = [0, 0], sizes = [8, 32], strides = [1, 1]} : vector<8x96xf32> to vector<8x32xf32>
      %194 = vector.extract_strided_slice %192 {offsets = [0, 32], sizes = [8, 32], strides = [1, 1]} : vector<8x96xf32> to vector<8x32xf32>
      %195 = vector.extract_strided_slice %192 {offsets = [0, 64], sizes = [8, 32], strides = [1, 1]} : vector<8x96xf32> to vector<8x32xf32>
      %c0_109 = arith.constant 0 : index
      %c0_110 = arith.constant 0 : index
      %c0_111 = arith.constant 0 : index
      %196 = vector.load %arg4[%c0_109, %c0_110, %c0_111] : memref<1x8x32xf32, #tpu.memory_space<vmem>>, vector<1x8x32xf32>
      %197 = vector.shape_cast %196 : vector<1x8x32xf32> to vector<8x32xf32>
      %198 = arith.mulf %197, %194 : vector<8x32xf32>
      %199 = arith.addf %198, %195 : vector<8x32xf32>
      %c0_112 = arith.constant 0 : index
      %c0_113 = arith.constant 0 : index
      %c0_114 = arith.constant 0 : index
      %200 = vector.load %arg19[%c0_112, %c0_113, %c0_114] : memref<1x8x32xf32, #tpu.memory_space<vmem>>, vector<1x8x32xf32>
      %201 = vector.shape_cast %200 : vector<1x8x32xf32> to vector<8x32xf32>
      %202 = vector.shape_cast %199 : vector<8x32xf32> to vector<1x8x32xf32>
      tpu.vector_store %arg19[%c0_112, %c0_113, %c0_114], %202 {strides = array<i32>} : memref<1x8x32xf32, #tpu.memory_space<vmem>>, vector<1x8x32xf32>,
      %c0_115 = arith.constant 0 : index
      %c0_116 = arith.constant 0 : index
      %c0_117 = arith.constant 0 : index
      %c0_118 = arith.constant 0 : index
      %203 = vector.load %arg5[%c0_115, %c0_116, %c0_117, %c0_118] : memref<1x3x8x32xf32, #tpu.memory_space<vmem>>, vector<1x3x8x32xf32>
      %204 = vector.shape_cast %203 : vector<1x3x8x32xf32> to vector<3x8x32xf32>
      %205 = vector.extract_strided_slice %204 {offsets = [0, 0, 0], sizes = [1, 8, 32], strides = [1, 1, 1]} : vector<3x8x32xf32> to vector<1x8x32xf32>
      %206 = vector.shape_cast %205 : vector<1x8x32xf32> to vector<8x32xf32>
      %207 = arith.mulf %206, %193 : vector<8x32xf32>
      %c0_119 = arith.constant 0 : index
      %c0_120 = arith.constant 0 : index
      %c0_121 = arith.constant 0 : index
      %208 = vector.load %arg24[%c0_119, %c0_120, %c0_121] : memref<3x8x32xf32, #tpu.memory_space<vmem>>, vector<1x8x32xf32>
      %209 = vector.shape_cast %208 : vector<1x8x32xf32> to vector<8x32xf32>
      %210 = arith.addf %207, %209 : vector<8x32xf32>
      %c0_122 = arith.constant 0 : index
      %c0_123 = arith.constant 0 : index
      %c0_124 = arith.constant 0 : index
      %c0_125 = arith.constant 0 : index
      %211 = vector.load %arg20[%c0_122, %c0_123, %c0_124, %c0_125] : memref<1x3x8x32xf32, #tpu.memory_space<vmem>>, vector<1x1x8x32xf32>
      %212 = vector.shape_cast %211 : vector<1x1x8x32xf32> to vector<8x32xf32>
      %213 = vector.shape_cast %210 : vector<8x32xf32> to vector<1x1x8x32xf32>
      tpu.vector_store %arg20[%c0_122, %c0_123, %c0_124, %c0_125], %213 {strides = array<i32>} : memref<1x3x8x32xf32, #tpu.memory_space<vmem>>, vector<1x1x8x32xf32>,
      %214 = vector.extract_strided_slice %204 {offsets = [1, 0, 0], sizes = [1, 8, 32], strides = [1, 1, 1]} : vector<3x8x32xf32> to vector<1x8x32xf32>
      %215 = vector.shape_cast %214 : vector<1x8x32xf32> to vector<8x32xf32>
      %216 = arith.mulf %215, %193 : vector<8x32xf32>
      %c1_126 = arith.constant 1 : index
      %c0_127 = arith.constant 0 : index
      %c0_128 = arith.constant 0 : index
      %217 = vector.load %arg24[%c1_126, %c0_127, %c0_128] : memref<3x8x32xf32, #tpu.memory_space<vmem>>, vector<1x8x32xf32>
      %218 = vector.shape_cast %217 : vector<1x8x32xf32> to vector<8x32xf32>
      %219 = arith.addf %216, %218 : vector<8x32xf32>
      %c0_129 = arith.constant 0 : index
      %c1_130 = arith.constant 1 : index
      %c0_131 = arith.constant 0 : index
      %c0_132 = arith.constant 0 : index
      %220 = vector.load %arg20[%c0_129, %c1_130, %c0_131, %c0_132] : memref<1x3x8x32xf32, #tpu.memory_space<vmem>>, vector<1x1x8x32xf32>
      %221 = vector.shape_cast %220 : vector<1x1x8x32xf32> to vector<8x32xf32>
      %222 = vector.shape_cast %219 : vector<8x32xf32> to vector<1x1x8x32xf32>
      tpu.vector_store %arg20[%c0_129, %c1_130, %c0_131, %c0_132], %222 {strides = array<i32>} : memref<1x3x8x32xf32, #tpu.memory_space<vmem>>, vector<1x1x8x32xf32>,
      %223 = vector.extract_strided_slice %204 {offsets = [2, 0, 0], sizes = [1, 8, 32], strides = [1, 1, 1]} : vector<3x8x32xf32> to vector<1x8x32xf32>
      %224 = vector.shape_cast %223 : vector<1x8x32xf32> to vector<8x32xf32>
      %225 = arith.mulf %224, %193 : vector<8x32xf32>
      %c2_133 = arith.constant 2 : index
      %c0_134 = arith.constant 0 : index
      %c0_135 = arith.constant 0 : index
      %226 = vector.load %arg24[%c2_133, %c0_134, %c0_135] : memref<3x8x32xf32, #tpu.memory_space<vmem>>, vector<1x8x32xf32>
      %227 = vector.shape_cast %226 : vector<1x8x32xf32> to vector<8x32xf32>
      %228 = arith.addf %225, %227 : vector<8x32xf32>
      %c0_136 = arith.constant 0 : index
      %c2_137 = arith.constant 2 : index
      %c0_138 = arith.constant 0 : index
      %c0_139 = arith.constant 0 : index
      %229 = vector.load %arg20[%c0_136, %c2_137, %c0_138, %c0_139] : memref<1x3x8x32xf32, #tpu.memory_space<vmem>>, vector<1x1x8x32xf32>
      %230 = vector.shape_cast %229 : vector<1x1x8x32xf32> to vector<8x32xf32>
      %231 = vector.shape_cast %228 : vector<8x32xf32> to vector<1x1x8x32xf32>
      tpu.vector_store %arg20[%c0_136, %c2_137, %c0_138, %c0_139], %231 {strides = array<i32>} : memref<1x3x8x32xf32, #tpu.memory_space<vmem>>, vector<1x1x8x32xf32>,
    } else {
    }
    return
  }
  func.func @transform_0(%arg0: i32, %arg1: i32, %arg2: i32) -> (i32, i32, i32) {
    %c0_i32 = arith.constant 0 : i32
    %c0_i32_0 = arith.constant 0 : i32
    return %arg0, %arg1, %c0_i32 : i32, i32, i32
  }
  func.func @transform_1(%arg0: i32, %arg1: i32, %arg2: i32) -> (i32, i32, i32) {
    %c0_i32 = arith.constant 0 : i32
    %c0_i32_0 = arith.constant 0 : i32
    return %arg0, %arg1, %c0_i32 : i32, i32, i32
  }
  func.func @transform_2(%arg0: i32, %arg1: i32, %arg2: i32) -> (i32, i32, i32, i32) {
    %c0_i32 = arith.constant 0 : i32
    %c0_i32_0 = arith.constant 0 : i32
    %c0_i32_1 = arith.constant 0 : i32
    return %arg0, %c0_i32, %arg1, %c0_i32_0 : i32, i32, i32, i32
  }
  func.func @transform_3(%arg0: i32, %arg1: i32, %arg2: i32) -> (i32, i32, i32) {
    %c0_i32 = arith.constant 0 : i32
    %c0_i32_0 = arith.constant 0 : i32
    return %arg0, %arg2, %c0_i32 : i32, i32, i32
  }
  func.func @transform_4(%arg0: i32, %arg1: i32, %arg2: i32) -> (i32, i32, i32, i32) {
    %c0_i32 = arith.constant 0 : i32
    %c0_i32_0 = arith.constant 0 : i32
    %c0_i32_1 = arith.constant 0 : i32
    return %arg0, %c0_i32, %arg2, %c0_i32_0 : i32, i32, i32, i32
  }
  func.func @transform_5(%arg0: i32, %arg1: i32, %arg2: i32) -> (i32, i32, i32, i32) {
    %c0_i32 = arith.constant 0 : i32
    %c0_i32_0 = arith.constant 0 : i32
    return %arg0, %arg1, %arg2, %c0_i32 : i32, i32, i32, i32
  }
  func.func @transform_6(%arg0: i32, %arg1: i32, %arg2: i32) -> (i32, i32, i32, i32) {
    %c0_i32 = arith.constant 0 : i32
    %c0_i32_0 = arith.constant 0 : i32
    return %arg0, %c0_i32, %arg1, %arg2 : i32, i32, i32, i32
  }
  func.func @transform_7(%arg0: i32, %arg1: i32, %arg2: i32) -> (i32, i32, i32) {
    %c0_i32 = arith.constant 0 : i32
    return %arg0, %arg1, %arg2 : i32, i32, i32
  }
  func.func @transform_8(%arg0: i32, %arg1: i32, %arg2: i32) -> (i32, i32, i32, i32) {
    %c0_i32 = arith.constant 0 : i32
    %c0_i32_0 = arith.constant 0 : i32
    return %arg0, %arg1, %arg2, %c0_i32 : i32, i32, i32, i32
  }
  func.func @transform_9(%arg0: i32, %arg1: i32, %arg2: i32) -> (i32, i32, i32) {
    %c0_i32 = arith.constant 0 : i32
    %c0_i32_0 = arith.constant 0 : i32
    return %arg0, %c0_i32, %arg2 : i32, i32, i32
  }
  func.func @transform_10(%arg0: i32, %arg1: i32, %arg2: i32) -> (i32, i32) {
    %c0_i32 = arith.constant 0 : i32
    %c0_i32_0 = arith.constant 0 : i32
    %c0_i32_1 = arith.constant 0 : i32
    return %c0_i32, %c0_i32_0 : i32, i32
  }
  func.func @transform_11(%arg0: i32, %arg1: i32, %arg2: i32) -> (i32, i32) {
    %c0_i32 = arith.constant 0 : i32
    %c0_i32_0 = arith.constant 0 : i32
    %c0_i32_1 = arith.constant 0 : i32
    return %c0_i32, %c0_i32_0 : i32, i32
  }
  func.func @transform_12(%arg0: i32, %arg1: i32, %arg2: i32) -> (i32, i32) {
    %c0_i32 = arith.constant 0 : i32
    %c0_i32_0 = arith.constant 0 : i32
    %c0_i32_1 = arith.constant 0 : i32
    return %c0_i32, %c0_i32_0 : i32, i32
  }
  func.func @transform_13(%arg0: i32, %arg1: i32, %arg2: i32) -> (i32, i32) {
    %c0_i32 = arith.constant 0 : i32
    %c0_i32_0 = arith.constant 0 : i32
    %c0_i32_1 = arith.constant 0 : i32
    return %c0_i32, %c0_i32_0 : i32, i32
  }
  func.func @transform_14(%arg0: i32, %arg1: i32, %arg2: i32) -> (i32, i32) {
    %c0_i32 = arith.constant 0 : i32
    %c0_i32_0 = arith.constant 0 : i32
    %c0_i32_1 = arith.constant 0 : i32
    return %c0_i32, %c0_i32_0 : i32, i32
  }
  func.func @transform_15(%arg0: i32, %arg1: i32, %arg2: i32) -> (i32, i32) {
    %c0_i32 = arith.constant 0 : i32
    %c0_i32_0 = arith.constant 0 : i32
    %c0_i32_1 = arith.constant 0 : i32
    return %c0_i32, %c0_i32_0 : i32, i32
  }
  func.func @transform_16(%arg0: i32, %arg1: i32, %arg2: i32) -> (i32, i32, i32) {
    %c0_i32 = arith.constant 0 : i32
    %c0_i32_0 = arith.constant 0 : i32
    return %arg0, %arg1, %c0_i32 : i32, i32, i32
  }
  func.func @transform_17(%arg0: i32, %arg1: i32, %arg2: i32) -> (i32, i32, i32, i32) {
    %c0_i32 = arith.constant 0 : i32
    %c0_i32_0 = arith.constant 0 : i32
    %c0_i32_1 = arith.constant 0 : i32
    return %arg0, %c0_i32, %arg1, %c0_i32_0 : i32, i32, i32, i32
  }
}

</mosaic_0001>

<bundles_post_ra>
// kernel: tpu_custom_call.1
= control target key start
LH: loop header
LB: loop body
LE: loop exit
PB: predicated region body
PF: predicated region fallthrough
CT: control target
= control target key end

     0   :  { %s6478_s0 = inlined_call_operand.vmem [shape: f32[2,8,32], index: 0, kind: input, shape index: {}]   ;;  %s6479_s1 = inlined_call_operand.hbm [shape: f32[2,8,32], index: 1, kind: input, shape index: {}]   ;;  %s6480_s2 = inlined_call_operand.vmem [shape: f32[2,3,8,32], index: 2, kind: input, shape index: {}]   ;;  %s6481_s3 = inlined_call_operand.hbm [shape: f32[2,8,96], index: 3, kind: input, shape index: {}]   ;;  %s6482_s4 = inlined_call_operand.hbm [shape: f32[2,3,8,32], index: 4, kind: input, shape index: {}]   ;;  %s6483_s5 = inlined_call_operand.vmem [shape: f32[2,8,8,16], index: 5, kind: input, shape index: {}]   ;;  %s6484_s6 = inlined_call_operand.hbm [shape: f32[2,3,8,8], index: 6, kind: input, shape index: {}]   ;;  %s6485_s7 = inlined_call_operand.hbm [shape: f32[2,8,8], index: 7, kind: input, shape index: {}]   ;;  %s6486_s8 = inlined_call_operand.vmem [shape: f32[2,8,8,4], index: 8, kind: input, shape index: {}]   ;;  %s6487_s9 = inlined_call_operand.hbm [shape: f32[2,1,8], index: 9, kind: input, shape index: {}]   ;;  %s6488_s10 = inlined_call_operand.hbm [shape: f32[16,128], index: 10, kind: input, shape index: {}]   ;;  %s6489_s11 = inlined_call_operand.vmem [shape: f32[1,128], index: 11, kind: input, shape index: {}]   ;;  %s6490_s12 = inlined_call_operand.hbm [shape: f32[32,96], index: 12, kind: input, shape index: {}]   ;;  %s6491_s13 = inlined_call_operand.vmem [shape: f32[1,96], index: 13, kind: input, shape index: {}]   ;;  %s6492_s14 = inlined_call_operand.vmem [shape: f32[32,4], index: 14, kind: input, shape index: {}]   ;;  %s6493_s15 = inlined_call_operand.vmem [shape: f32[4,32], index: 15, kind: input, shape index: {}]   ;;  %s6494_s16 = inlined_call_operand.hbm [shape: f32[2,8,32], index: 16, kind: output, shape index: {0}]   ;;  %s6495_s17 = inlined_call_operand.hbm [shape: f32[2,3,8,32], index: 17, kind: output, shape index: {1}]  }
   0x1   :  { %6529 = sst [smem:[#allocation38_spill]] %s6478_s0 }
   0x2   :  { %6530 = sst [smem:[#allocation39_spill]] %s6479_s1 }
   0x3   :  { %6531 = sst [smem:[#allocation40_spill]] %s6480_s2 }
   0x4   :  { %6532 = sst [smem:[#allocation41_spill]] %s6481_s3 }
   0x5   :  { %6533 = sst [smem:[#allocation42_spill]] %s6483_s5 }
   0x6   :  { %6534 = sst [smem:[#allocation43_spill]] %s6484_s6 }
   0x7   :  { %6535 = sst [smem:[#allocation44_spill]] %s6486_s8 }
   0x8   :  { %6536 = sst [smem:[#allocation45_spill]] %s6488_s10 }
   0x9   :  { %6537 = sst [smem:[#allocation46_spill]] %s6489_s11 }
   0xa   :  { %6538 = sst [smem:[#allocation47_spill]] %s6491_s13 }
   0xb   :  { %6539 = sst [smem:[#allocation48_spill]] %s6492_s14 }
   0xc   :  { %6540 = sst [smem:[#allocation49_spill]] %s6493_s15 }
   0xd   :  { %6541 = sst [smem:[#allocation50_spill]] %s6494_s16 }
   0xe   :  { %6542 = sst [smem:[#allocation51_spill]] %s6495_s17 }
   0xf   :  { %23 = vsyncpa [#allocation7], 0 }
  0x10   :  { %25 = vsyncpa [#allocation7 + $0x1], 0 }
  0x11   :  { %26 = vsyncpa [#allocation10], 0 }
  0x12   :  { %28 = vsyncpa [#allocation10 + $0x1], 0 }
  0x13   :  { %29 = vsyncpa [#allocation13], 0 }
  0x14   :  { %31 = vsyncpa [#allocation13 + $0x1], 0 }
  0x15   :  { %32 = vsyncpa [#allocation16], 0 }
  0x16   :  { %34 = vsyncpa [#allocation16 + $0x1], 0 }
  0x17   :  { %35 = vsyncpa [#allocation19], 0 }
  0x18   :  { %36 = vsyncpa [#allocation8], 0 }
  0x19   :  { %38 = vsyncpa [#allocation8 + $0x1], 0 }
  0x1a   :  { %39 = vsyncpa [#allocation22], 0 }
  0x1b   :  { %41 = vsyncpa [#allocation22 + $0x1], 0  ;;  %s5061_s24 = smov 0   ;;  %s5063_s25 = smov 0  }
  0x1c   :  { %s5065_s26 = smov 0   ;;  %s5067_s27 = smov 0  }
  0x1d   :  { %s5069_s28 = smov 0   ;;  %s5071_s29 = smov 0  }
  0x1e LB: > { %6543 = sst [smem:[#allocation31_spill]] %s4927_s24  ;;  %s5092_s0 = sadd.s32 4294967295, %s4947_s29   ;;  %s4947_s29 = sphi %s5071_s29, %s47_s29   ;;  %s4943_s28 = sphi %s5069_s28, %s6605_s28   ;;  %s4939_s27 = sphi %s5067_s27, %s6604_s27   ;;  %s4935_s26 = sphi %s5065_s26, %s6600_s26   ;;  %s4931_s25 = sphi %s5063_s25, %s6603_s25   ;;  %s4927_s24 = sphi %s5061_s24, %s6602_s24  }
  0x1f   : > { %6544 = sst [smem:[#allocation32_spill]] %s4935_s26  ;;  %s3925_s30 = sadd.s32 4294967294, %s4947_s29  }
  0x20   : > { %6545 = sst [smem:[#allocation33_spill]] %s4947_s29  ;;  %p116_p0 = scmp.ne.s32.totalorder %s4931_s25, %s4927_s24 }
  0x21   : > { %p6501_p1 = scmp.eq.s32.totalorder %s5092_s0, 0  ;;  %p506_p3 = scmp.eq.s32.totalorder %s3925_s30, 1 }
  0x22   : > { %p3926_p5 = scmp.ge.s32.totalorder %s4947_s29, 1  ;;  %p541_p7 = scmp.lt.s32.totalorder %s4947_s29, 3 }
  0x23   : > { %p5101_p4 = por %p6501_p1, %p116_p0  ;;  %p5106_p6 = por %p506_p3, %p116_p0 }
  0x24   : > { %p5111_p8 = pnand %p3926_p5, %p541_p7  ;;  %s4949_s20 = smov [#allocation17]  }
  0x25   : > { %s6546_s18 = scalar_select %p5101_p4, 1, 0 }
  0x26   : > { %s6547_s19 = scalar_select %p5106_p6, 1, 0 }
  0x27   : > { %s6549_s1 = scalar_select %p5111_p8, 1, 0 }
  0x28   : > { %6548 = sst [smem:[#allocation34_spill]] %s6547_s19  ;;  %s553_s21 = sshll.u32 %s4949_s20, 4  ;;  %s554_s21 = int_to_ptr.vmem [resolvable:$true] %s553_s21 }
  0x29   : > { %p4302_p9 = pneg %p5111_p8  ;;  %s66_s23 = sadd.s32 1, %s4943_s28 }
  0x2a   : > { %s6551_s10 = sld [smem:[#allocation45_spill]] }
  0x2b   : > { %p5120_p11 = pnand %p4302_p9, %p6501_p1 }
  0x2d   : > { %s6550_s22 = scalar_select %p5120_p11, 1, 0 }
  0x2e   : > { %p6516_p13 = pneg %p5120_p11 }
  0x30   : > { %s4577_s24 = scalar_lea.hbm %s6551_s10, 256 }
  0x31   : > { %p4578_p12 = scmp.ne.s32.totalorder %s6551_s10, %s4577_s24  ;;  %p4584_p5 = scmp.lt.u32.totalorder %s4577_s24, %s6551_s10 }
  0x33   : > { %p4580_p0 = pnand %p6516_p13, %p4578_p12 }
  0x35   : > { %p4581_p3 = pneg %p4580_p0 }
  0x37   : > { %p4586_p7 = pnand %p4584_p5, %p4581_p3 }
  0x39   : > { %4589 = shalt.err (!%p4586_p7)
}
  0x3a   : > { %s4590_s2 = scalar_lea.vmem %s554_s21, 256  ;;  %p4598_p2 = scmp.lt.s32.totalorder %s554_s21, %s554_s21 }
  0x3b   : > { %p4591_p9 = scmp.ne.s32.totalorder %s554_s21, %s4590_s2  ;;  %p4599_p6 = scmp.lt.s32.totalorder %s4590_s2, %s4590_s2 }
  0x3d   : > { %p4593_p10 = pnand %p4591_p9, %p6516_p13  ;;  %p4600_p4 = por %p4599_p6, %p4598_p2 }
  0x3f   : > { %p4594_p1 = pneg %p4593_p10 }
  0x41   : > { %p4601_p8 = pnand %p4600_p4, %p4594_p1 }
  0x43   : > { %4604 = shalt.err (!%p4601_p8)
}
  0x44   : > { %s6504_s16 = smov 128   ;;  %s6506_s13 = smov 8  }
  0x45   : > { %4305 = dma.hbm_to_vmem [thread:$0]  (!%p5120_p11), %s6551_s10, 256, %s554_s21, [#allocation16], %s6504_s16, %s6504_s16, %s6506_s13  }
  0x46   : > { %p68_p1 = scmp.ge.s32.totalorder %s66_s23, 2  ;;  %s103_s24 = sadd.s32 1, %s4935_s26 }
  0x47   : > { %p110_p2 = scmp.ne.s32.totalorder %s4935_s26, %s4931_s25  ;;  %p111_p4 = scmp.eq.s32.totalorder %s4947_s29, 0 }
  0x48   : > { %s6607_s23 = smov (%p68_p1, %s66_s23), 0  ;;  %p6553_p8 = scmp.eq.s32.totalorder %s5092_s0, 1 }
  0x49   : > { %6552 = sst [smem:[#allocation35_spill]] %s6607_s23  ;;  %p112_p6 = por %p111_p4, %p110_p2 }
  0x4a   : > { %p5158_p10 = por %p6553_p8, %p110_p2  ;;  %s98_s30 = ssub.s32 %s4943_s28, %s6607_s23 }
  0x4b   : > { %p4337_p12 = scmp.lt.s32.totalorder %s4947_s29, 2  ;;  %p101_p0 = scmp.eq.s32.totalorder %s98_s30, 0 }
  0x4c   : > { %s6554_s19 = scalar_select %p5158_p10, 1, 0 }
  0x4d   : > { %s5166_s20 = sand.u32 1, %s4935_s26   ;;  %s5172_s2 = sshll.u32 %s4943_s28, 7 }
  0x4e   : > { %6555 = sst [smem:[#allocation36_spill]] %s6554_s19  ;;  %s5169_s21 = sshll.u32 %s5166_s20, 3 }
  0x4f   : > { %s5175_s17 = scalar_select %p101_p0, %s4935_s26, %s103_s24  }
  0x50   : > { %p5177_p3 = pnand %p4337_p12, %p112_p6  ;;  %s5182_s13 = sand.u32 1, %s4947_s29  }
  0x51   : > { %6556 = sst [smem:[#allocation37_spill]] %s5175_s17  ;;  %s6558_s3 = sld [smem:[#allocation41_spill]] }
  0x52   : > { %s6557_s16 = scalar_select %p5177_p3, 1, 0 }
  0x53   : > { %s636_s19 = scalar_lea.vmem [#allocation9], %s5169_s21  ;;  %s6521_s26 = scalar_lea.sflag [#allocation10], %s5182_s13 }
  0x54   : > { %s644_s24 = sshll.u32 %s636_s19, 4  ;;  %p5199_p7 = pneg %p5177_p3  ;;  %s5191_s24 = int_to_ptr.vmem [resolvable:$true] %s644_s24 }
  0x56   : > { %s6559_s29 = scalar_select %p5199_p7, 1, 0 }
  0x57   : > { %s5188_s23 = scalar_lea.hbm %s6558_s3, %s5172_s2  ;;  %s4610_s15 = scalar_lea.hbm %s6558_s3, 256 }
  0x58   : > { %s4605_s8 = scalar_lea.hbm %s5188_s23, 128  ;;  %p4611_p2 = scmp.lt.u32.totalorder %s5188_s23, %s6558_s3 }
  0x59   : > { %p4606_p5 = scmp.ne.s32.totalorder %s5188_s23, %s4605_s8  ;;  %p4612_p4 = scmp.lt.u32.totalorder %s4610_s15, %s4605_s8 }
  0x5a   : > { %p4614_p8 = scmp.lt.u32.totalorder %s4605_s8, %s5188_s23 }
  0x5b   : > { %p4608_p9 = pnand %p5199_p7, %p4606_p5  ;;  %p4613_p6 = por %p4612_p4, %p4611_p2 }
  0x5d   : > { %p4609_p1 = pneg %p4608_p9  ;;  %p4615_p12 = por %p4614_p8, %p4613_p6 }
  0x5f   : > { %p4616_p0 = pnand %p4615_p12, %p4609_p1 }
  0x61   : > { %4619 = shalt.err (!%p4616_p0)
}
  0x62   : > { %s4620_s17 = scalar_lea.vmem %s5191_s24, 128  ;;  %s4952_s10 = smov [#allocation9]  }
  0x63   : > { %p4621_p5 = scmp.ne.s32.totalorder %s5191_s24, %s4620_s17  ;;  %s4625_s30 = sshll.u32 %s4952_s10, 4  ;;  %s4626_s30 = int_to_ptr.vmem [resolvable:$false] %s4625_s30 }
  0x64   : > { %s4627_s11 = scalar_lea.vmem %s4626_s30, 256  ;;  %p4628_p10 = scmp.lt.s32.totalorder %s5191_s24, %s4626_s30 }
  0x65   : > { %p4623_p9 = pnand %p4621_p5, %p5199_p7  ;;  %p4629_p11 = scmp.lt.s32.totalorder %s4627_s11, %s4620_s17 }
  0x67   : > { %p4624_p13 = pneg %p4623_p9  ;;  %p4630_p2 = por %p4629_p11, %p4628_p10 }
  0x69   : > { %p4631_p4 = pnand %p4630_p2, %p4624_p13 }
  0x6b   : > { %4634 = shalt.err (!%p4631_p4)
}
  0x6c   : > { %4315 = dma.hbm_to_vmem [thread:$0]  (!%p5177_p3), %s5188_s23, 128, %s5191_s24, %s6521_s26  }
  0x6d   : > { %s6522_s8 = smul.u32 384, %s4943_s28  ;;  %s6561_s6 = sld [smem:[#allocation43_spill]] }
  0x6e   : > { %s6560_s15 = smul.u32 24, %s5166_s20  ;;  %s6527_s3 = scalar_lea.sflag [#allocation13], %s5182_s13 }
  0x70   : > { %s693_s19 = scalar_lea.vmem [#allocation12], %s6560_s15 }
  0x71   : > { %s702_s10 = sshll.u32 %s693_s19, 4  ;;  %s5234_s10 = int_to_ptr.vmem [resolvable:$true] %s702_s10 }
  0x73   : > { %s5232_s11 = scalar_lea.hbm %s6561_s6, %s6522_s8  ;;  %s4640_s15 = scalar_lea.hbm %s6561_s6, 768 }
  0x74   : > { %s4635_s14 = scalar_lea.hbm %s5232_s11, 384  ;;  %p4641_p1 = scmp.lt.u32.totalorder %s5232_s11, %s6561_s6 }
  0x75   : > { %p4636_p11 = scmp.ne.s32.totalorder %s5232_s11, %s4635_s14  ;;  %p4642_p6 = scmp.lt.u32.totalorder %s4640_s15, %s4635_s14 }
  0x76   : > { %p4644_p12 = scmp.lt.u32.totalorder %s4635_s14, %s5232_s11 }
  0x77   : > { %p4638_p13 = pnand %p4636_p11, %p5199_p7  ;;  %p4643_p8 = por %p4642_p6, %p4641_p1 }
  0x79   : > { %p4639_p10 = pneg %p4638_p13  ;;  %p4645_p0 = por %p4644_p12, %p4643_p8 }
  0x7b   : > { %p4646_p5 = pnand %p4645_p0, %p4639_p10 }
  0x7d   : > { %4649 = shalt.err (!%p4646_p5)
}
  0x7e   : > { %s4650_s30 = scalar_lea.vmem %s5234_s10, 384  ;;  %s4953_s23 = smov [#allocation12]  }
  0x7f   : > { %p4651_p9 = scmp.ne.s32.totalorder %s5234_s10, %s4650_s30  ;;  %s4655_s24 = sshll.u32 %s4953_s23, 4  ;;  %s4656_s24 = int_to_ptr.vmem [resolvable:$false] %s4655_s24 }
  0x80   : > { %s4657_s19 = scalar_lea.vmem %s4656_s24, 768  ;;  %p4658_p11 = scmp.lt.s32.totalorder %s5234_s10, %s4656_s24 }
  0x81   : > { %p4653_p2 = pnand %p4651_p9, %p5199_p7  ;;  %p4659_p13 = scmp.lt.s32.totalorder %s4657_s19, %s4650_s30 }
  0x83   : > { %p4654_p4 = pneg %p4653_p2  ;;  %p4660_p1 = por %p4659_p13, %p4658_p11 }
  0x85   : > { %p4661_p6 = pnand %p4660_p1, %p4654_p4 }
  0x87   : > { %4664 = shalt.err (!%p4661_p6)
}
  0x88   : > { %s6562_s14 = smov 8   ;;  %s6563_s15 = smov 128  }
  0x89   : > { %4321 = dma.hbm_to_vmem [thread:$0]  (!%p5177_p3), %s5232_s11, 384, %s5234_s10, %s6527_s3, %s6563_s15, %s6563_s15, %s6562_s14  }
  0x8a   : > { %s4954_s17 = smov [#allocation18]   ;;  %s4665_s30 = scalar_lea.hbm %s6490_s12, 512 }
  0x8b   : > { %s569_s23 = sshll.u32 %s4954_s17, 4  ;;  %p4666_p10 = scmp.ne.s32.totalorder %s6490_s12, %s4665_s30  ;;  %s570_s23 = int_to_ptr.vmem [resolvable:$true] %s569_s23 }
  0x8c   : > { %p6564_p8 = scmp.ne.s32.totalorder %s6550_s22, 0  ;;  %p4672_p9 = scmp.lt.u32.totalorder %s4665_s30, %s6490_s12 }
  0x8e   : > { %p6565_p12 = pneg %p6564_p8 }
  0x90   : > { %p4668_p0 = pnand %p4666_p10, %p6565_p12 }
  0x92   : > { %p4669_p5 = pneg %p4668_p0 }
  0x94   : > { %p4674_p2 = pnand %p4672_p9, %p4669_p5 }
  0x96   : > { %4677 = shalt.err (!%p4674_p2)
}
  0x97   : > { %s4678_s10 = scalar_lea.vmem %s570_s23, 512  ;;  %p6566_p11 = pmov %p6565_p12 }
  0x98   : > { %p4679_p4 = scmp.ne.s32.totalorder %s570_s23, %s4678_s10  ;;  %p4686_p6 = scmp.lt.s32.totalorder %s570_s23, %s570_s23 }
  0x99   : > { %p4687_p3 = scmp.lt.s32.totalorder %s4678_s10, %s4678_s10 }
  0x9a   : > { %p4681_p13 = pnand %p4679_p4, %p6566_p11 }
  0x9b   : > { %p4688_p7 = por %p4687_p3, %p4686_p6 }
  0x9c   : > { %p4682_p1 = pneg %p4681_p13 }
  0x9e   : > { %p4689_p10 = pnand %p4688_p7, %p4682_p1 }
  0xa0   : > { %4692 = shalt.err (!%p4689_p10)
}
  0xa1   : > { %4308 = dma.hbm_to_vmem [thread:$0]  (!%p6564_p8), %s6490_s12, 512, %s570_s23, [#allocation19], %s6563_s15, %s6563_s15, %s6562_s14  }
  0xa2   : > { %s6567_s11 = sld [smem:[#allocation39_spill]]  ;;  %s606_s22 = scalar_lea.vmem [#allocation6], %s5169_s21 }
  0xa3   : > { %s614_s24 = sshll.u32 %s606_s22, 4  ;;  %s603_s30 = scalar_lea.sflag [#allocation7], %s5166_s20  ;;  %s615_s24 = int_to_ptr.vmem [resolvable:$true] %s614_s24 }
  0xa4   : > { %p6568_p7 = scmp.ne.s32.totalorder %s6559_s29, 0 }
  0xa8   : > { %s5290_s17 = scalar_lea.hbm %s6567_s11, %s5172_s2  ;;  %s4698_s5 = scalar_lea.hbm %s6567_s11, 256 }
  0xa9   : > { %s4693_s19 = scalar_lea.hbm %s5290_s17, 128  ;;  %p4699_p8 = scmp.lt.u32.totalorder %s5290_s17, %s6567_s11 }
  0xaa   : > { %p4694_p3 = scmp.ne.s32.totalorder %s5290_s17, %s4693_s19  ;;  %p4700_p5 = scmp.lt.u32.totalorder %s4698_s5, %s4693_s19 }
  0xab   : > { %p4702_p2 = scmp.lt.u32.totalorder %s4693_s19, %s5290_s17 }
  0xac   : > { %p4696_p12 = pnand %p4694_p3, %p6568_p7  ;;  %p4701_p9 = por %p4700_p5, %p4699_p8 }
  0xae   : > { %p4697_p0 = pneg %p4696_p12  ;;  %p4703_p4 = por %p4702_p2, %p4701_p9 }
  0xb0   : > { %p4704_p11 = pnand %p4703_p4, %p4697_p0 }
  0xb2   : > { %4707 = shalt.err (!%p4704_p11)
}
  0xb3   : > { %s4708_s8 = scalar_lea.vmem %s615_s24, 128  ;;  %s4955_s22 = smov [#allocation6]  }
  0xb4   : > { %p4709_p13 = scmp.ne.s32.totalorder %s615_s24, %s4708_s8  ;;  %s4713_s3 = sshll.u32 %s4955_s22, 4  ;;  %s4714_s3 = int_to_ptr.vmem [resolvable:$false] %s4713_s3 }
  0xb5   : > { %s4715_s10 = scalar_lea.vmem %s4714_s3, 256  ;;  %p4716_p10 = scmp.lt.s32.totalorder %s615_s24, %s4714_s3 }
  0xb6   : > { %p4711_p1 = pnand %p4709_p13, %p6568_p7  ;;  %p4717_p3 = scmp.lt.s32.totalorder %s4715_s10, %s4708_s8 }
  0xb8   : > { %p4712_p6 = pneg %p4711_p1  ;;  %p4718_p12 = por %p4717_p3, %p4716_p10 }
  0xba   : > { %p4719_p5 = pnand %p4718_p12, %p4712_p6 }
  0xbc   : > { %4722 = shalt.err (!%p4719_p5)
}
  0xbd   : > { %p6569_p8 = scmp.ne.s32.totalorder %s6557_s16, 0  ;;  %s6570_s19 = smul.u32 384, %s4943_s28 }
  0xbe   : > { %s6571_s26 = smul.u32 24, %s5166_s20 }
  0xbf   : > { %4312 = dma.hbm_to_vmem [thread:$0]  (!%p6569_p8), %s5290_s17, 128, %s615_s24, %s603_s30  }
  0xc0   : > { %s5316_s6 = scalar_lea.hbm %s6482_s4, %s6570_s19  ;;  %s655_s3 = scalar_lea.vmem [#allocation11], %s6571_s26 }
  0xc1   : > { %s663_s8 = sshll.u32 %s655_s3, 4  ;;  %s4723_s22 = scalar_lea.hbm %s5316_s6, 384  ;;  %s5320_s8 = int_to_ptr.vmem [resolvable:$true] %s663_s8 }
  0xc2   : > { %p4724_p0 = scmp.ne.s32.totalorder %s5316_s6, %s4723_s22  ;;  %s4728_s30 = scalar_lea.hbm %s6482_s4, 768 }
  0xc3   : > { %p4729_p4 = scmp.lt.u32.totalorder %s5316_s6, %s6482_s4  ;;  %p4730_p11 = scmp.lt.u32.totalorder %s4728_s30, %s4723_s22 }
  0xc4   : > { %p4726_p9 = pnand %p4724_p0, %p6568_p7  ;;  %p4732_p1 = scmp.lt.u32.totalorder %s4723_s22, %s5316_s6 }
  0xc5   : > { %p4731_p13 = por %p4730_p11, %p4729_p4 }
  0xc6   : > { %p4727_p2 = pneg %p4726_p9 }
  0xc7   : > { %p4733_p6 = por %p4732_p1, %p4731_p13 }
  0xc9   : > { %p4734_p10 = pnand %p4733_p6, %p4727_p2 }
  0xcb   : > { %4737 = shalt.err (!%p4734_p10)
}
  0xcc   : > { %s4738_s23 = scalar_lea.vmem %s5320_s8, 384  ;;  %s4956_s5 = smov [#allocation11]  }
  0xcd   : > { %p4739_p3 = scmp.ne.s32.totalorder %s5320_s8, %s4738_s23  ;;  %s4743_s26 = sshll.u32 %s4956_s5, 4  ;;  %s4744_s26 = int_to_ptr.vmem [resolvable:$false] %s4743_s26 }
  0xce   : > { %s4745_s3 = scalar_lea.vmem %s4744_s26, 768  ;;  %p4746_p0 = scmp.lt.s32.totalorder %s5320_s8, %s4744_s26 }
  0xcf   : > { %p4741_p12 = pnand %p4739_p3, %p6568_p7  ;;  %p4747_p9 = scmp.lt.s32.totalorder %s4745_s3, %s4738_s23 }
  0xd1   : > { %p4742_p5 = pneg %p4741_p12  ;;  %p4748_p4 = por %p4747_p9, %p4746_p0 }
  0xd3   : > { %p4749_p11 = pnand %p4748_p4, %p4742_p5 }
  0xd5   : > { %4752 = shalt.err (!%p4749_p11)
}
  0xd6   : > { %s6572_s22 = scalar_lea.sflag [#allocation10], %s5182_s13  ;;  %s5352_s30 = scalar_lea.hbm %s6485_s7, %s5172_s2 }
  0xd7   : > { %4318 = dma.hbm_to_vmem [thread:$0]  (!%p6569_p8), %s5316_s6, 384, %s5320_s8, %s6572_s22, %s6563_s15, %s6563_s15, %s6562_s14  }
  0xd8   : > { %s716_s10 = scalar_lea.vmem [#allocation14], %s5169_s21  ;;  %s4753_s23 = scalar_lea.hbm %s5352_s30, 128 }
  0xd9   : > { %s725_s19 = sshll.u32 %s716_s10, 4  ;;  %p4754_p2 = scmp.ne.s32.totalorder %s5352_s30, %s4753_s23  ;;  %s726_s19 = int_to_ptr.vmem [resolvable:$true] %s725_s19 }
  0xda   : > { %s4758_s14 = scalar_lea.hbm %s6485_s7, 256  ;;  %p4759_p6 = scmp.lt.u32.totalorder %s5352_s30, %s6485_s7 }
  0xdb   : > { %p4756_p13 = pnand %p4754_p2, %p6568_p7  ;;  %p4760_p10 = scmp.lt.u32.totalorder %s4758_s14, %s4753_s23 }
  0xdc   : > { %p4762_p12 = scmp.lt.u32.totalorder %s4753_s23, %s5352_s30 }
  0xdd   : > { %p4757_p1 = pneg %p4756_p13  ;;  %p4761_p3 = por %p4760_p10, %p4759_p6 }
  0xdf   : > { %p4763_p5 = por %p4762_p12, %p4761_p3 }
  0xe1   : > { %p4764_p0 = pnand %p4763_p5, %p4757_p1 }
  0xe3   : > { %4767 = shalt.err (!%p4764_p0)
}
  0xe4   : > { %s4768_s21 = scalar_lea.vmem %s726_s19, 128  ;;  %s4957_s2 = smov [#allocation14]  }
  0xe5   : > { %p4769_p9 = scmp.ne.s32.totalorder %s726_s19, %s4768_s21  ;;  %s4773_s8 = sshll.u32 %s4957_s2, 4  ;;  %s4774_s8 = int_to_ptr.vmem [resolvable:$false] %s4773_s8 }
  0xe6   : > { %s4775_s3 = scalar_lea.vmem %s4774_s8, 256  ;;  %p4776_p2 = scmp.lt.s32.totalorder %s726_s19, %s4774_s8 }
  0xe7   : > { %p4771_p4 = pnand %p4769_p9, %p6568_p7  ;;  %p4777_p13 = scmp.lt.s32.totalorder %s4775_s3, %s4768_s21 }
  0xe9   : > { %p4772_p11 = pneg %p4771_p4  ;;  %p4778_p8 = por %p4777_p13, %p4776_p2 }
  0xeb   : > { %p4779_p6 = pnand %p4778_p8, %p4772_p11 }
  0xed   : > { %4782 = shalt.err (!%p4779_p6)
}
  0xee   : > { %p6573_p10 = scmp.ne.s32.totalorder %s6557_s16, 0  ;;  %s6574_s22 = scalar_lea.sflag [#allocation13], %s5182_s13 }
  0xef   : > { %s3938_s17 = sshll.u32 %s4943_s28, 4  ;;  %s751_s5 = scalar_lea.vmem [#allocation15], %s5166_s20 }
  0xf0   : > { %4324 = dma.hbm_to_vmem [thread:$0]  (!%p6573_p10), %s5352_s30, 128, %s726_s19, %s6574_s22  }
  0xf1   : > { %s5378_s23 = scalar_lea.hbm %s6487_s9, %s3938_s17  ;;  %s759_s26 = sshll.u32 %s751_s5, 4  ;;  %s760_s26 = int_to_ptr.vmem [resolvable:$true] %s759_s26 }
  0xf2   : > { %s749_s14 = scalar_lea.sflag [#allocation16], %s5182_s13  ;;  %s4783_s15 = scalar_lea.hbm %s5378_s23, 16 }
  0xf3   : > { %p4784_p8 = scmp.ne.s32.totalorder %s5378_s23, %s4783_s15  ;;  %s4788_s6 = scalar_lea.hbm %s6487_s9, 32 }
  0xf4   : > { %p4789_p12 = scmp.lt.u32.totalorder %s5378_s23, %s6487_s9  ;;  %p4790_p5 = scmp.lt.u32.totalorder %s4788_s6, %s4783_s15 }
  0xf5   : > { %p4786_p1 = pnand %p4784_p8, %p6568_p7  ;;  %p4792_p9 = scmp.lt.u32.totalorder %s4783_s15, %s5378_s23 }
  0xf6   : > { %p4791_p0 = por %p4790_p5, %p4789_p12 }
  0xf7   : > { %p4787_p3 = pneg %p4786_p1 }
  0xf8   : > { %p4793_p4 = por %p4792_p9, %p4791_p0 }
  0xfa   : > { %p4794_p11 = pnand %p4793_p4, %p4787_p3 }
  0xfc   : > { %4797 = shalt.err (!%p4794_p11)
}
  0xfd   : > { %s4798_s13 = scalar_lea.vmem %s760_s26, 16  ;;  %s4958_s20 = smov [#allocation15]  }
  0xfe   : > { %p4799_p2 = scmp.ne.s32.totalorder %s760_s26, %s4798_s13  ;;  %s4803_s8 = sshll.u32 %s4958_s20, 4  ;;  %s4804_s8 = int_to_ptr.vmem [resolvable:$false] %s4803_s8 }
  0xff   : > { %s4805_s3 = scalar_lea.vmem %s4804_s8, 32  ;;  %p4806_p8 = scmp.lt.s32.totalorder %s760_s26, %s4804_s8 }
 0x100   : > { %p4801_p13 = pnand %p4799_p2, %p6568_p7  ;;  %p4807_p1 = scmp.lt.s32.totalorder %s4805_s3, %s4798_s13 }
 0x102   : > { %p4802_p6 = pneg %p4801_p13  ;;  %p4808_p10 = por %p4807_p1, %p4806_p8 }
 0x104   : > { %p4809_p5 = pnand %p4808_p10, %p4802_p6 }
 0x106   : > { %4812 = shalt.err (!%p4809_p5)
}
 0x107   : > { %p6575_p12 = scmp.ne.s32.totalorder %s6557_s16, 0  ;;  %p6576_p3 = scmp.ne.s32.totalorder %s6549_s1, 0 }
 0x108   : > { %s5402_s29 = sand.u32 (!%p6576_p3), 1, %s4931_s25   ;;  %p6577_p7 = scmp.ne.s32.totalorder (!%p6576_p3), %s6546_s18, 0 }
 0x109   : > { %4327 = dma.hbm_to_vmem [thread:$0]  (!%p6575_p12), %s5378_s23, 16, %s760_s26, %s749_s14  }
 0x10a   : > { %768 = sbr.rel (%p6576_p3) target bundleno = 1431 (0x597), region = 84  ;;  %s5405_s22 = sshll.u32 (!%p6576_p3), %s5402_s29, 3 }
 0x10b   : > { %s771_s17 = scalar_lea.sflag (!%p6576_p3), [#allocation7], %s5402_s29  ;;  %s774_s24 = scalar_lea.vmem (!%p6576_p3), [#allocation6], %s5405_s22 }
 0x111   : > { %4894 = dma.done.wait (%p6577_p7), %s771_s17, 128  }
 0x112   : > { %4896 = vsyncadd (%p6577_p7), %s771_s17, 4294967168  ;;  %s779_s1 = sand.u32 1, %s5092_s0   ;;  %s783_s10 = scalar_lea.vmem [#allocation9], %s5405_s22 }
 0x113   : > { %s780_s16 = scalar_lea.sflag [#allocation10], %s779_s1 }
 0x114   : > { %4898 = dma.done.wait (%p6577_p7), %s780_s16, 512  }
 0x115   : > { %4900 = vsyncadd (%p6577_p7), %s780_s16, 4294966784  ;;  %s5420_s23 = smul.u32 24, %s5402_s29  ;;  %s798_s26 = scalar_lea.sflag [#allocation13], %s779_s1 }
 0x117   : > { %s5423_s5 = scalar_lea.vmem [#allocation11], %s5420_s23  ;;  %s5426_s14 = scalar_lea.vmem [#allocation12], %s5420_s23 }
 0x118   : > { %4902 = dma.done.wait (%p6577_p7), %s798_s26, 512  }
 0x119   : > { %4904 = vsyncadd (%p6577_p7), %s798_s26, 4294966784  ;;  %s810_s15 = scalar_lea.vmem [#allocation14], %s5405_s22  ;;  %s816_s30 = scalar_lea.sflag [#allocation16], %s779_s1 }
 0x11a   : > { %s818_s19 = scalar_lea.vmem [#allocation15], %s5402_s29 }
 0x11b   : > { %4906 = dma.done.wait (%p6577_p7), %s816_s30, 16  }
 0x11c   : > { %4908 = vsyncadd (%p6577_p7), %s816_s30, 4294967280  ;;  %p6578_p10 = scmp.eq.s32.totalorder %s5092_s0, 0 }
 0x11e   : > { %4910 = dma.done.wait (%p6578_p10), [#allocation16], 256   ;;  %p6579_p0 = pmov %p6578_p10 }
 0x120   : > { %4912 = vsyncadd (%p6579_p0), [#allocation16], 4294967040  ;;  %p6580_p9 = pmov %p6579_p0 }
 0x121   : > { %p6581_p4 = pmov %p6579_p0 }
 0x122   : > { %4914 = dma.done.wait (%p6580_p9), [#allocation19], 512  }
 0x123   : > { %4916 = vsyncadd (%p6581_p4), [#allocation19], 4294966784  ;;  %p945_p11 = scmp.lt.s32.totalorder %s4939_s27, 1  ;;  %v1208_v0 = vlaneseq  ;;  %s6582_s13 = sld [smem:[#allocation42_spill]]  ;;  %vm1017_vm0 = vcmask 130048   ;;  %v1008_v2 = vld [vmem:[#allocation17] sm:$0xff] }
 0x124   : > { %v1009_v3 = vld [vmem:[#allocation17 + $0x8] sm:$0xff]  ;;  %v3977_v9 = vld [vmem:[%s818_s19] ss:$0 sm:$0xff]  ;;  %s4959_s0 = smov 96   ;;  %s4960_s8 = smov 32   ;;  %vm993_vm1 = vcmask 261120  }
 0x125   : > { %s5448_s6 = scalar_select %p945_p11, %s4939_s27, 1  ;;  %v5450_v1 = vshrl.u32 %v1208_v0, 7  ;;  %v4241_v6 = vpack.c.bf16 %v1009_v3, %v1008_v2  ;;  %v1751_v8 = vld [vmem:[%s810_s15] sm:$0xff]  ;;  %1465 = vbcast.lane.b32.xlu0 %v3977_v9, 256  ;;  %v4403_v12 = vpack.i.bf16 %v1009_v3, %v1008_v2  ;;  %v5524_v26 = vld [vmem:[%s783_s10] sm:$0xff]  ;;  %vm990_vm2 = vcmask 31744  }
 0x126   : > { %s6583_s1 = sld [smem:[#allocation48_spill]]  ;;  %s4961_s2 = smov 64   ;;  %v4962_v48 = vmov 1966171168   ;;  %vm1841_vm3 = vcmask 1043456   ;;  %vm4965_vm4 = vmmov 0  }
 0x127   : > { %s4050_s18 = sshll.u32 %s5448_s6, 6  ;;  %v5464_v5 = vsub.s32 0, %v5450_v1  ;;  %v5469_v7 = vsub.s32 1, %v5450_v1  ;;  %4242 = vmatprep.subr.bf16.mxu0 %v4241_v6  ;;  %v5480_v15 = vsub.s32 3, %v5450_v1  ;;  %v5495_v19 = vsub.s32 5, %v5450_v1  ;;  %s6584_s17 = sld [smem:[#allocation46_spill]] }
 0x128   : > { %4244 = vmatpush3.bf16.msra.mxu0 %v4241_v6  ;;  %v5509_v23 = vsub.s32 7, %v5450_v1  ;;  %v5546_v38 = vsub.s32 2, %v5450_v1  ;;  %v5549_v39 = vsub.s32 4, %v5450_v1  ;;  %v5554_v42 = vsub.s32 6, %v5450_v1  ;;  %s3946_s16 = sshll.u32 %s5448_s6, 3  ;;  %s6585_s15 = sld [smem:[#allocation38_spill]] }
 0x129   : > { %s5458_s20 = scalar_lea.vmem %s6582_s13, %s4050_s18  ;;  %v1755_v11 = vrot.slane %v1751_v8, %v5464_v5  ;;  %v1762_v14 = vrot.slane %v1751_v8, %v5469_v7  ;;  %4404 = vrot.lane.b32.xlu0 %v4403_v12, %s4959_s0  ;;  %v1776_v18 = vrot.slane %v1751_v8, %v5480_v15  ;;  %v1790_v22 = vrot.slane %v1751_v8, %v5495_v19  ;;  %s6586_s21 = sld [smem:[#allocation49_spill]] }
 0x12a   : > { %v5461_v4 = vld [vmem:[%s5458_s20] sm:$0xff]  ;;  %v5472_v10 = vld [vmem:[%s5458_s20 + $0x8] sm:$0xff]  ;;  %v5476_v13 = vld [vmem:[%s5458_s20 + $0x10] sm:$0xff]  ;;  %v1804_v25 = vrot.slane %v1751_v8, %v5509_v23  ;;  %v1769_v40 = vrot.slane %v1751_v8, %v5546_v38  ;;  %v1783_v41 = vrot.slane %v1751_v8, %v5549_v39  ;;  %v1797_v43 = vrot.slane %v1751_v8, %v5554_v42 }
 0x12b   : > { %4126 = vmatprep.mubr.msk.f32.mxu0 %vm1017_vm0, %v5461_v4  ;;  %1757 = vbcast.lane.b32.xlu1 %v1755_v11, 256  ;;  %v5487_v16 = vld [vmem:[%s5458_s20 + $0x18] sm:$0xff]  ;;  %v5491_v17 = vld [vmem:[%s5458_s20 + $0x20] sm:$0xff]  ;;  %v5502_v20 = vld [vmem:[%s5458_s20 + $0x28] sm:$0xff]  ;;  %v1206_v49 = vunpack.c.l.s4 %v4962_v48  ;;  %vm1541_vm5 = vcmask 1041409   ;;  %vm1543_vm6 = vcmask 1042434  }
 0x12c   : > { %4127 = vmatmul.mubr.msk.f32.vlgmr.msra.gmra.mrb[0].mxu0 %vm1017_vm0, %v5472_v10  ;;  %v5505_v21 = vld [vmem:[%s5458_s20 + $0x30] sm:$0xff]  ;;  %v5516_v24 = vld [vmem:[%s5458_s20 + $0x38] sm:$0xff]  ;;  %v1309_v27 = vld [vmem:[%s6583_s1] sm:$0xff]  ;;  %vm1545_vm7 = vcmask 1043459   ;;  %vm1547_vm8 = vcmask 1044484   ;;  %vm1549_vm9 = vcmask 1045509  }
 0x12d   : > { %4129 = vmatprep.mubr.msk.f32.mxu0 %vm1017_vm0, %v5476_v13  ;;  %v1310_v28 = vld [vmem:[%s6583_s1 + $0x8] sm:$0xff]  ;;  %v1311_v30 = vld [vmem:[%s6583_s1 + $0x10] sm:$0xff]  ;;  %v1312_v31 = vld [vmem:[%s6583_s1 + $0x18] sm:$0xff]  ;;  %1771 = vbcast.lane.b32.xlu0 %v1769_v40, 256  ;;  %v1207_v56 = vunpack.c.0.s8 %v1206_v49  ;;  %vm1551_vm10 = vcmask 1046534   ;;  %vm1553_vm11 = vcmask 1047559  }
 0x12e   : > { %v4245_v29 = vpack.c.bf16 %v1310_v28, %v1309_v27  ;;  %v4249_v32 = vpack.c.bf16 %v1312_v31, %v1311_v30  ;;  %v3952_v44 = vld [vmem:[%s6584_s17] ss:$0 sm:$0xff]  ;;  %s951_s30 = scalar_lea.vmem %s6585_s15, %s3946_s16  ;;  %s6587_s16 = sld [smem:[#allocation44_spill]]  ;;  %vm2823_vm12 = vcmask 785920  }
 0x12f   : > { %1764 = vbcast.lane.b32.xlu1 %v1762_v14, 256  ;;  %v5586_v0 = vsub.s32 %v1207_v56, %v5450_v1  ;;  %v998_v6 = vld [vmem:[%s951_s30] sm:$0xff]  ;;  %s6591_s30 = sld [smem:[#allocation51_spill]] }
 0x130   : > { %4130 = vmatmul.mubr.msk.f32.gmra.mrb[2].mxu0 %vm1017_vm0, %v5487_v16  ;;  %4246 = vmatprep.subr.bf16.mxu1 %v4245_v29  ;;  %v1204_v31 = vcombine.high %v998_v6, %v998_v6 }
 0x131   : > { %4132 = vmatprep.mubr.msk.f32.mxu0 %vm1017_vm0, %v5491_v17  ;;  %4248 = vmatpush3.bf16.msra.mxu1 %v4245_v29  ;;  %v1211_v14 = vrot.slane %v998_v6, %v5586_v0 }
 0x132   : > { %4250 = vmatprep.subr.bf16.mxu1 %v4249_v32  ;;  %1785 = vbcast.lane.b32.xlu0 %v1783_v41, 256 }
 0x133   : > { %1778 = vbcast.lane.b32.xlu1 %v1776_v18, 256 }
 0x134   : > { %4133 = vmatmul.mubr.msk.f32.gmra.mrb[4].mxu0 %vm1017_vm0, %v5502_v20 }
 0x135   : > { %4135 = vmatprep.mubr.msk.f32.mxu0 %vm1017_vm0, %v5505_v21  ;;  %4252 = vmatpush3.bf16.msra.mxu1 %v4249_v32 }
 0x136   : > { %1799 = vbcast.lane.b32.xlu0 %v1797_v43, 256  ;;  %v1227_v43 = vrot.slane %v1211_v14, %v5586_v0 }
 0x137   : > { %1792 = vbcast.lane.b32.xlu1 %v1790_v22, 256 }
 0x138   : > { %4136 = vmatmul.mubr.msk.f32.gmra.mrb[6].mxu0 %vm1017_vm0, %v5516_v24 }
 0x13a   : > { %4409 = vrot.lane.b32.xlu0 %v4403_v12, %s4961_s2 }
 0x13b   : > { %1806 = vbcast.lane.b32.xlu1 %v1804_v25, 256 }
 0x13e   : > { %1966 = vrot.lane.b32.xlu0 %v3952_v44, %s4959_s0 }
 0x13f   : > { %4414 = vrot.lane.b32.xlu1 %v4403_v12, %s4960_s8 }
 0x142   : > { %2485 = vrot.lane.b32.xlu0 %v3952_v44, %s4960_s8  ;;  %s5754_s8 = scalar_lea.vmem %s6587_s16, %s4050_s18  ;;  %s6589_s16 = sld [smem:[#allocation47_spill]] }
 0x143   : > { %2212 = vrot.lane.b32.xlu1 %v5524_v26, %s4959_s0  ;;  %s944_s18 = scalar_lea.vmem [#allocation21], %s5420_s23 }
 0x144   : > { %s3595_s26 = sshll.u32 %s944_s18, 4  ;;  %s6387_s26 = int_to_ptr.vmem [resolvable:$true] %s3595_s26 }
 0x197   : > { %v5540_v33 = vpop.permute.xlu0 %1465 }
 0x19b   : > { %v4405_v34 = vpop.permute.xlu0 %4404 }
 0x19c   : > { %v4407_v35 = vunpack.i.h.bf16 %v4405_v34  ;;  %v4406_v36 = vunpack.i.l.bf16 %v4405_v34  ;;  %v1219_v34 = vcombine.high %v1211_v14, %v1211_v14 }
 0x19d   : > { %v5563_v45 = vpop.permute.xlu1 %1757 }
 0x19e   : > { %v5542_v37 = vpack.c.bf16 %v4407_v35, %v4406_v36  ;;  %v1241_v48 = vrot.slane %v1219_v34, %v5586_v0 }
 0x1a0   : > { %4254 = vmatprep.subr.bf16.mxu1 %v5542_v37 }
 0x1a1   : > { %v5569_v52 = vpop.permute.xlu1 %1764 }
 0x1a5   : > { %v5583_v63 = vpop.permute.xlu1 %1778 }
 0x1a9   : > { %v5599_v25 = vpop.permute.xlu1 %1792 }
 0x1ff   : > { %v4128_v46 = vpop.f32.mrb[0].mxu0 }
 0x200   : > { %v5565_v47 = vadd.f32 %v4128_v46, %v3952_v44  ;;  %v1108_v50 = vpop.f32.mrb[1].mxu0  ;;  %v5605_v46 = vpop.permute.xlu1 %1806 }
 0x201   : > { %v5567_v51 = vadd.f32 %v3952_v44, %v1108_v50 }
 0x202   : > { %v3962_v53 = vmul.f32 -1.442695, %v5565_v47 }
 0x203   : > { %v3961_v54 = vmul.f32 -1.442695, %v5567_v51  ;;  %v4131_v55 = vpop.f32.mrb[2].mxu0 }
 0x204   : > { %4419 = vpow2.f32 %v3962_v53  ;;  %v5574_v57 = vadd.f32 %v4131_v55, %v3952_v44  ;;  %v1118_v58 = vpop.f32.mrb[3].mxu0  ;;  %v1251_v53 = vcombine.high %v1241_v48, %v1241_v48 }
 0x205   : > { %4421 = vpow2.f32 %v3961_v54  ;;  %v5576_v59 = vadd.f32 %v3952_v44, %v1118_v58  ;;  %v1249_v54 = vcombine.high %v1227_v43, %v1227_v43 }
 0x206   : > { %v3964_v60 = vmul.f32 -1.442695, %v5574_v57 }
 0x207   : > { %v3963_v61 = vmul.f32 -1.442695, %v5576_v59  ;;  %v4134_v62 = vpop.f32.mrb[4].mxu0 }
 0x208   : > { %4423 = vpow2.f32 %v3964_v60  ;;  %v5588_v2 = vadd.f32 %v4134_v62, %v3952_v44  ;;  %v1128_v3 = vpop.f32.mrb[5].mxu0  ;;  %v1256_v60 = vrot.slane %v1227_v43, %v5464_v5 }
 0x209   : > { %4425 = vpow2.f32 %v3963_v61  ;;  %v5590_v8 = vadd.f32 %v3952_v44, %v1128_v3  ;;  %v1260_v61 = vrot.slane %v1241_v48, %v5464_v5  ;;  %v4415_v3 = vpop.permute.xlu1 %4414 }
 0x20a   : > { %v3966_v9 = vmul.f32 -1.442695, %v5588_v2  ;;  %v4416_v34 = vunpack.i.l.bf16 %v4415_v3 }
 0x20b   : > { %v3965_v11 = vmul.f32 -1.442695, %v5590_v8  ;;  %v4137_v12 = vpop.f32.mrb[6].mxu0 }
 0x20c   : > { %4427 = vpow2.f32 %v3966_v9  ;;  %v5595_v18 = vadd.f32 %v4137_v12, %v3952_v44  ;;  %v1138_v1 = vpop.f32.mrb[7].mxu0  ;;  %v1268_v9 = vrot.slane %v1251_v53, %v5464_v5 }
 0x20d   : > { %4429 = vpow2.f32 %v3965_v11  ;;  %v5597_v22 = vadd.f32 %v3952_v44, %v1138_v1  ;;  %v1218_v44 = vrot.slane %v1204_v31, %v5586_v0  ;;  %v1264_v11 = vrot.slane %v1249_v54, %v5464_v5 }
 0x20e   : > { %v4420_v27 = vpop.eup %4419  ;;  %v3968_v28 = vmul.f32 -1.442695, %v5595_v18  ;;  %v1294_v31 = vmul.f32 %v1260_v61, %v5524_v26 }
 0x20f   : > { %v4422_v29 = vpop.eup %4421  ;;  %v1172_v30 = vadd.f32 1.0, %v4420_v27  ;;  %v3967_v32 = vmul.f32 -1.442695, %v5597_v22  ;;  %v1220_v58 = vcombine.high %v1218_v44, %v1218_v44  ;;  %v1234_v1 = vrot.slane %v1218_v44, %v5586_v0 }
 0x210   : > { %v1171_v35 = vadd.f32 1.0, %v4422_v29  ;;  %4431 = vpow2.f32 %v3968_v28  ;;  %v1293_v28 = vmul.f32 %v1256_v60, %v5524_v26  ;;  %v1295_v44 = vmul.f32 %v1264_v11, %v5524_v26 }
 0x211   : > { %4433 = vrcp.f32 %v1172_v30  ;;  %v1248_v14 = vrot.slane %v1220_v58, %v5586_v0 }
 0x212   : > { %v4424_v36 = vpop.eup %4423  ;;  %4435 = vrcp.f32 %v1171_v35 }
 0x213   : > { %v4426_v40 = vpop.eup %4425  ;;  %v1174_v41 = vadd.f32 1.0, %v4424_v36  ;;  %4437 = vpow2.f32 %v3967_v32  ;;  %v4417_v32 = vunpack.i.h.bf16 %v4415_v3  ;;  %v1276_v48 = vrot.slane %v1248_v14, %v5464_v5 }
 0x214   : > { %v1173_v49 = vadd.f32 1.0, %v4426_v40  ;;  %v1296_v40 = vmul.f32 %v1268_v9, %v5524_v26  ;;  %v1252_v58 = vcombine.high %v1248_v14, %v1248_v14 }
 0x215   : > { %4439 = vrcp.f32 %v1174_v41  ;;  %v1298_v9 = vmul.f32 %v1276_v48, %v5524_v26 }
 0x216   : > { %v4428_v50 = vpop.eup %4427  ;;  %4441 = vrcp.f32 %v1173_v49  ;;  %v1272_v49 = vrot.slane %v1234_v1, %v5464_v5 }
 0x217   : > { %v4430_v55 = vpop.eup %4429  ;;  %v1176_v56 = vadd.f32 1.0, %v4428_v50 }
 0x218   : > { %v1175_v62 = vadd.f32 1.0, %v4430_v55  ;;  %v4261_v55 = vpack.c.bf16 %v4417_v32, %v4416_v34 }
 0x219   : > { %4443 = vrcp.f32 %v1176_v56  ;;  %v1250_v56 = vcombine.high %v1234_v1, %v1234_v1 }
 0x21a   : > { %v4432_v6 = vpop.eup %4431  ;;  %4445 = vrcp.f32 %v1175_v62  ;;  %v1297_v62 = vmul.f32 %v1272_v49, %v5524_v26 }
 0x21b   : > { %v4434_v12 = vpop.eup %4433  ;;  %v1178_v27 = vadd.f32 1.0, %v4432_v6  ;;  %v1280_v11 = vrot.slane %v1250_v56, %v5464_v5 }
 0x21c   : > { %v4436_v29 = vpop.eup %4435  ;;  %v1196_v30 = vmul.f32 %v4434_v12, %v5565_v47  ;;  %v1284_v12 = vrot.slane %v1252_v58, %v5464_v5 }
 0x21d   : > { %v4438_v35 = vpop.eup %4437  ;;  %v1195_v36 = vmul.f32 %v4436_v29, %v5567_v51  ;;  %4447 = vrcp.f32 %v1178_v27  ;;  %v1299_v27 = vmul.f32 %v1280_v11, %v5524_v26 }
 0x21e   : > { %v1177_v41 = vadd.f32 1.0, %v4438_v35  ;;  %v1302_v53 = vmul.f32 %v1294_v31, %v1196_v30  ;;  %v5714_v35 = vld [vmem:[%s6586_s21] sm:$0xf] }
 0x21f   : > { %v4440_v43 = vpop.eup %4439  ;;  %v1301_v47 = vmul.f32 %v1293_v28, %v1195_v36  ;;  %4158 = vmatprep.subr.msk.mxu0 %vm1841_vm3, %v5714_v35 }
 0x220   : > { %v4442_v50 = vpop.eup %4441  ;;  %v1198_v54 = vmul.f32 %v4440_v43, %v5574_v57  ;;  %4449 = vrcp.f32 %v1177_v41  ;;  %4159 = vmatpush3.msk.msra.mxu0 %vm1841_vm3, %v5714_v35 }
 0x221   : > { %v1197_v51 = vmul.f32 %v4442_v50, %v5576_v59  ;;  %4146 = vmatprep.mubr.msk.f32.mxu1 %vm993_vm1, %v1301_v47 }
 0x222   : > { %4147 = vmatmul.mubr.msk.f32.vlgmr.msra.gmra.mrb[0].mxu1 %vm993_vm1, %v1302_v53  ;;  %v1304_v6 = vmul.f32 %v1296_v40, %v1198_v54  ;;  %v1443_v54 = vld [vmem:[%s5754_s8] sm:$0xff] }
 0x223   : > { %v4444_v60 = vpop.eup %4443  ;;  %v1303_v61 = vmul.f32 %v1295_v44, %v1197_v51  ;;  %4256 = vmatpush3.bf16.msra.mxu1 %v5542_v37 }
 0x224   : > { %v4446_v3 = vpop.eup %4445  ;;  %v1200_v57 = vmul.f32 %v4444_v60, %v5588_v2  ;;  %4262 = vmatprep.subr.bf16.mxu1 %v4261_v55  ;;  %v1445_v60 = vld [vmem:[%s5754_s8 + $0x10] sm:$0xff] }
 0x225   : > { %v1199_v59 = vmul.f32 %v4446_v3, %v5590_v8  ;;  %4149 = vmatprep.mubr.msk.f32.mxu1 %vm993_vm1, %v1303_v61  ;;  %v1300_v8 = vmul.f32 %v1284_v12, %v5524_v26  ;;  %v4964_v26 = vmov 0.0   ;;  %v5763_v61 = vpop.permute.xlu0 %1771 }
 0x226   : > { %4150 = vmatmul.mubr.msk.f32.gmra.mrb[2].mxu1 %vm993_vm1, %v1304_v6  ;;  %v1306_v37 = vmul.f32 %v1298_v9, %v1200_v57  ;;  %992 = vst.msk [vmem:[#allocation3] sm:$0xff] %vm990_vm2, %v4964_v26  ;;  %4188 = vmatprep.subr.mxu0 %v4964_v26 }
 0x227   : > { %v4448_v14 = vpop.eup %4447  ;;  %v1305_v1 = vmul.f32 %v1297_v62, %v1199_v59  ;;  %994 = vst.msk [vmem:[#allocation4] sm:$0xff] %vm993_vm1, %v4964_v26  ;;  %995 = vst.msk [vmem:[#allocation5] sm:$0xff] %vm993_vm1, %v4964_v26 }
 0x228   : > { %v1202_v28 = vmul.f32 %v4448_v14, %v5595_v18  ;;  %996 = vst.msk [vmem:[#allocation5 + $0x8] sm:$0xff] %vm993_vm1, %v4964_v26  ;;  %997 = vst.msk [vmem:[#allocation5 + $0x10] sm:$0xff] %vm993_vm1, %v4964_v26  ;;  %v1448_v14 = vld [vmem:[%s5754_s8 + $0x28] sm:$0xff] }
 0x229   : > { %4152 = vmatprep.mubr.msk.f32.mxu1 %vm993_vm1, %v1305_v1 }
 0x22a   : > { %v4450_v2 = vpop.eup %4449  ;;  %4153 = vmatmul.mubr.msk.f32.gmra.mrb[4].mxu1 %vm993_vm1, %v1306_v37  ;;  %v1308_v31 = vmul.f32 %v1300_v8, %v1202_v28 }
 0x22b   : > { %v1201_v29 = vmul.f32 %v4450_v2, %v5597_v22 }
 0x22d   : > { %v1307_v30 = vmul.f32 %v1299_v27, %v1201_v29  ;;  %v1447_v27 = vld [vmem:[%s5754_s8 + $0x20] sm:$0xff] }
 0x22f   : > { %4155 = vmatprep.mubr.msk.f32.mxu1 %vm993_vm1, %v1307_v30 }
 0x230   : > { %4156 = vmatmul.mubr.msk.f32.gmra.mrb[6].mxu1 %vm993_vm1, %v1308_v31 }
 0x231   : > { %4176 = vmatprep.mubr.msk.f32.mxu1 %vm1017_vm0, %v5461_v4 }
 0x234   : > { %4177 = vmatmul.mubr.msk.f32.vlgmr.msra.gmra.mrb[8].mxu1 %vm1017_vm0, %v5472_v10 }
 0x235   : > { %4179 = vmatprep.mubr.msk.f32.mxu1 %vm1017_vm0, %v5476_v13  ;;  %4264 = vmatpush3.bf16.msra.mxu1 %v4261_v55 }
 0x238   : > { %4180 = vmatmul.mubr.msk.f32.gmra.mrb[10].mxu1 %vm1017_vm0, %v5487_v16 }
 0x239   : > { %4182 = vmatprep.mubr.msk.f32.mxu1 %vm1017_vm0, %v5491_v17 }
 0x23c   : > { %4183 = vmatmul.mubr.msk.f32.gmra.mrb[12].mxu1 %vm1017_vm0, %v5502_v20 }
 0x23d   : > { %4185 = vmatprep.mubr.msk.f32.mxu1 %vm1017_vm0, %v5505_v21 }
 0x240   : > { %4186 = vmatmul.mubr.msk.f32.gmra.mrb[14].mxu1 %vm1017_vm0, %v5516_v24 }
 0x241   : > { %4213 = vmatprep.mubr.msk.f32.mxu1 %vm1017_vm0, %v5461_v4  ;;  %v4963_v4 = vmov -inf  }
 0x242   : > { %991 = vst.msk [vmem:[#allocation2] sm:$0xff] %vm990_vm2, %v4963_v4 }
 0x244   : > { %4214 = vmatmul.mubr.msk.f32.vlgmr.msra.gmra.mrb[16].mxu1 %vm1017_vm0, %v5472_v10  ;;  %v5677_v10 = vld [vmem:[%s5426_s14] sm:$0xff] }
 0x245   : > { %4216 = vmatprep.mubr.msk.f32.mxu1 %vm1017_vm0, %v5476_v13  ;;  %v2762_v13 = vrot.slane %v5677_v10, %v5464_v5  ;;  %v2776_v34 = vrot.slane %v5677_v10, %v5546_v38  ;;  %v2783_v41 = vrot.slane %v5677_v10, %v5480_v15  ;;  %v2790_v48 = vrot.slane %v5677_v10, %v5549_v39 }
 0x246   : > { %v2797_v47 = vrot.slane %v5677_v10, %v5495_v19 }
 0x247   : > { %2764 = vbcast.lane.b32.xlu1 %v2762_v13, 256  ;;  %v5782_v13 = vpop.permute.xlu0 %1785 }
 0x248   : > { %4217 = vmatmul.mubr.msk.f32.gmra.mrb[18].mxu1 %vm1017_vm0, %v5487_v16  ;;  %v2769_v16 = vrot.slane %v5677_v10, %v5469_v7 }
 0x249   : > { %4219 = vmatprep.mubr.msk.f32.mxu1 %vm1017_vm0, %v5491_v17  ;;  %v5684_v17 = vld [vmem:[%s5426_s14 + $0x8] sm:$0xff] }
 0x24a   : > { %2771 = vbcast.lane.b32.xlu0 %v2769_v16, 256  ;;  %v2999_v32 = vrot.slane %v5684_v17, %v5546_v38  ;;  %v3013_v40 = vrot.slane %v5684_v17, %v5549_v39  ;;  %v3020_v43 = vrot.slane %v5684_v17, %v5495_v19  ;;  %v3027_v53 = vrot.slane %v5684_v17, %v5554_v42 }
 0x24c   : > { %4220 = vmatmul.mubr.msk.f32.gmra.mrb[20].mxu1 %vm1017_vm0, %v5502_v20  ;;  %v2985_v20 = vrot.slane %v5684_v17, %v5464_v5 }
 0x24d   : > { %4222 = vmatprep.mubr.msk.f32.mxu1 %vm1017_vm0, %v5505_v21  ;;  %v2992_v21 = vrot.slane %v5684_v17, %v5469_v7 }
 0x24e   : > { %2987 = vbcast.lane.b32.xlu1 %v2985_v20, 256 }
 0x24f   : > { %2994 = vbcast.lane.b32.xlu0 %v2992_v21, 256 }
 0x250   : > { %4223 = vmatmul.mubr.msk.f32.gmra.mrb[22].mxu1 %vm1017_vm0, %v5516_v24  ;;  %v5691_v24 = vld [vmem:[%s5426_s14 + $0x10] sm:$0xff]  ;;  %s6588_s14 = sld [smem:[#allocation40_spill]] }
 0x251   : > { %v3208_v18 = vrot.slane %v5691_v24, %v5464_v5  ;;  %v3215_v22 = vrot.slane %v5691_v24, %v5469_v7  ;;  %v3006_v7 = vrot.slane %v5684_v17, %v5480_v15  ;;  %v3222_v36 = vrot.slane %v5691_v24, %v5546_v38  ;;  %4238 = vmatprep.mubr.msk.f32.mxu1 %vm4965_vm4, %v4964_v26 }
 0x252   : > { %v3229_v44 = vrot.slane %v5691_v24, %v5480_v15  ;;  %v2804_v38 = vrot.slane %v5677_v10, %v5554_v42  ;;  %v3250_v49 = vrot.slane %v5691_v24, %v5554_v42  ;;  %v3236_v15 = vrot.slane %v5691_v24, %v5549_v39  ;;  %v1444_v39 = vld [vmem:[%s5754_s8 + $0x8] sm:$0xff]  ;;  %v1446_v42 = vld [vmem:[%s5754_s8 + $0x18] sm:$0xff] }
 0x253   : > { %3210 = vbcast.lane.b32.xlu1 %v3208_v18, 256  ;;  %3217 = vbcast.lane.b32.xlu0 %v3215_v22, 256  ;;  %v3243_v50 = vrot.slane %v5691_v24, %v5495_v19 }
 0x257   : > { %3001 = vbcast.lane.b32.xlu1 %v2999_v32, 256  ;;  %2778 = vbcast.lane.b32.xlu0 %v2776_v34, 256 }
 0x25b   : > { %3008 = vbcast.lane.b32.xlu1 %v3006_v7, 256  ;;  %3224 = vbcast.lane.b32.xlu0 %v3222_v36, 256 }
 0x25f   : > { %3015 = vbcast.lane.b32.xlu1 %v3013_v40, 256  ;;  %2785 = vbcast.lane.b32.xlu0 %v2783_v41, 256  ;;  %v1450_v41 = vld [vmem:[%s5754_s8 + $0x38] sm:$0xff] }
 0x263   : > { %3022 = vbcast.lane.b32.xlu1 %v3020_v43, 256  ;;  %3231 = vbcast.lane.b32.xlu0 %v3229_v44, 256 }
 0x267   : > { %2806 = vbcast.lane.b32.xlu1 %v2804_v38, 256  ;;  %2792 = vbcast.lane.b32.xlu0 %v2790_v48, 256  ;;  %v1449_v48 = vld [vmem:[%s5754_s8 + $0x30] sm:$0xff]  ;;  %s4277_s8 = smul.u32 384, %s4939_s27 }
 0x26b   : > { %3252 = vbcast.lane.b32.xlu1 %v3250_v49, 256  ;;  %3238 = vbcast.lane.b32.xlu0 %v3236_v15, 256 }
 0x26f   : > { %2799 = vbcast.lane.b32.xlu0 %v2797_v47, 256 }
 0x273   : > { %3245 = vbcast.lane.b32.xlu0 %v3243_v50, 256 }
 0x277   : > { %3029 = vbcast.lane.b32.xlu0 %v3027_v53, 256 }
 0x2f5   : > { %v4148_v55 = vpop.f32.mrb[0].mxu1 }
 0x2f6   : > { %v1452_v19 = vadd.f32 %v4148_v55, %v1444_v39  ;;  %v1404_v51 = vpop.f32.mrb[1].mxu1 }
 0x2f7   : > { %v1451_v56 = vadd.f32 %v1443_v54, %v1404_v51 }
 0x2f8   : > { %v5760_v58 = vadd.f32 %v5540_v33, %v1452_v19 }
 0x2f9   : > { %v5766_v62 = vadd.f32 %v5540_v33, %v1451_v56  ;;  %v4151_v3 = vpop.f32.mrb[2].mxu1  ;;  %v5798_v56 = vpop.permute.xlu0 %1799 }
 0x2fa   : > { %v1484_v6 = vsel %vm990_vm2, %v5760_v58, -inf  ;;  %v1454_v57 = vadd.f32 %v4151_v3, %v1446_v42  ;;  %v1414_v9 = vpop.f32.mrb[3].mxu1 }
 0x2fb   : > { %v1485_v59 = vrot.slane %v1484_v6, 4  ;;  %v1477_v11 = vsel %vm990_vm2, %v5766_v62, -inf  ;;  %v1453_v12 = vadd.f32 %v1445_v60, %v1414_v9 }
 0x2fc   : > { %v1478_v1 = vrot.slane %v1477_v11, 4  ;;  %v5774_v37 = vadd.f32 %v5540_v33, %v1454_v57 }
 0x2fd   : > { %v1486_v2 = vmax.f32 %v1484_v6, %v1485_v59  ;;  %v5778_v28 = vadd.f32 %v5540_v33, %v1453_v12  ;;  %v4154_v8 = vpop.f32.mrb[4].mxu1 }
 0x2fe   : > { %v1479_v29 = vmax.f32 %v1477_v11, %v1478_v1  ;;  %v1498_v30 = vsel %vm990_vm2, %v5774_v37, -inf  ;;  %v1456_v31 = vadd.f32 %v4154_v8, %v1448_v14  ;;  %v1424_v4 = vpop.f32.mrb[5].mxu1 }
 0x2ff   : > { %v1487_v16 = vrot.slane %v1486_v2, 2  ;;  %v1499_v20 = vrot.slane %v1498_v30, 4  ;;  %v1491_v21 = vsel %vm990_vm2, %v5778_v28, -inf  ;;  %v1455_v18 = vadd.f32 %v1447_v27, %v1424_v4 }
 0x300   : > { %v1480_v22 = vrot.slane %v1479_v29, 2  ;;  %v1492_v32 = vrot.slane %v1491_v21, 4  ;;  %v5787_v34 = vadd.f32 %v5540_v33, %v1456_v31 }
 0x301   : > { %v1488_v7 = vmax.f32 %v1486_v2, %v1487_v16  ;;  %v1500_v36 = vmax.f32 %v1498_v30, %v1499_v20  ;;  %v5790_v40 = vadd.f32 %v5540_v33, %v1455_v18 }
 0x302   : > { %v1481_v43 = vmax.f32 %v1479_v29, %v1480_v22  ;;  %v1493_v44 = vmax.f32 %v1491_v21, %v1492_v32  ;;  %v1512_v38 = vsel %vm990_vm2, %v5787_v34, -inf  ;;  %v5815_v22 = vpop.permute.xlu0 %4409 }
 0x303   : > { %v1489_v49 = vrot.slane %v1488_v7, 1  ;;  %v1501_v15 = vrot.slane %v1500_v36, 2  ;;  %v1513_v47 = vrot.slane %v1512_v38, 4  ;;  %v1505_v50 = vsel %vm990_vm2, %v5790_v40, -inf  ;;  %v4157_v53 = vpop.f32.mrb[6].mxu1 }
 0x304   : > { %v1482_v39 = vrot.slane %v1481_v43, 1  ;;  %v1494_v54 = vrot.slane %v1493_v44, 2  ;;  %v1506_v55 = vrot.slane %v1505_v50, 4  ;;  %v1458_v19 = vadd.f32 %v4157_v53, %v1450_v41  ;;  %v1434_v51 = vpop.f32.mrb[7].mxu1 }
 0x305   : > { %v1490_v42 = vmax.f32 %v1488_v7, %v1489_v49  ;;  %v1502_v60 = vmax.f32 %v1500_v36, %v1501_v15  ;;  %v1514_v3 = vmax.f32 %v1512_v38, %v1513_v47  ;;  %v1457_v6 = vadd.f32 %v1449_v48, %v1434_v51 }
 0x306   : > { %v1483_v57 = vmax.f32 %v1481_v43, %v1482_v39  ;;  %v1495_v9 = vmax.f32 %v1493_v44, %v1494_v54  ;;  %v1507_v59 = vmax.f32 %v1505_v50, %v1506_v55  ;;  %v5801_v11 = vadd.f32 %v5540_v33, %v1458_v19  ;;  %v5826_v51 = vpop.permute.xlu0 %1966 }
 0x307   : > { %v1503_v12 = vrot.slane %v1502_v60, 1  ;;  %v1515_v14 = vrot.slane %v1514_v3, 2  ;;  %v5804_v1 = vadd.f32 %v5540_v33, %v1457_v6  ;;  %v5806_v27 = vpop.f32.mrb[8].mxu1 }
 0x308   : > { %v1542_v2 = vsel %vm1541_vm5, %v1490_v42, %v1483_v57  ;;  %v1496_v8 = vrot.slane %v1495_v9, 1  ;;  %v1508_v29 = vrot.slane %v1507_v59, 2  ;;  %v1526_v30 = vsel %vm990_vm2, %v5801_v11, -inf  ;;  %v5811_v31 = vpop.f32.mrb[9].mxu1 }
 0x309   : > { %v1516_v4 = vmax.f32 %v1514_v3, %v1515_v14  ;;  %v1527_v16 = vrot.slane %v1526_v30, 4  ;;  %v1519_v20 = vsel %vm990_vm2, %v5804_v1, -inf  ;;  %v1504_v32 = vmax.f32 %v1502_v60, %v1503_v12  ;;  %v5835_v14 = vld [vmem:[#allocation2] sm:$0xff] }
 0x30a   : > { %v1497_v21 = vmax.f32 %v1495_v9, %v1496_v8  ;;  %v1509_v33 = vmax.f32 %v1507_v59, %v1508_v29  ;;  %v1520_v18 = vrot.slane %v1519_v20, 4  ;;  %v5838_v8 = vpop.permute.xlu0 %2485 }
 0x30b   : > { %v1517_v7 = vrot.slane %v1516_v4, 1  ;;  %v1528_v36 = vmax.f32 %v1526_v30, %v1527_v16  ;;  %v5817_v41 = vpop.f32.mrb[10].mxu1 }
 0x30c   : > { %v1544_v43 = vsel %vm1543_vm6, %v1497_v21, %v1542_v2  ;;  %v1510_v44 = vrot.slane %v1509_v33, 1  ;;  %v1521_v38 = vmax.f32 %v1519_v20, %v1520_v18  ;;  %v5820_v48 = vpop.f32.mrb[11].mxu1 }
 0x30d   : > { %v1546_v49 = vsel %vm1545_vm7, %v1504_v32, %v1544_v43  ;;  %v1529_v15 = vrot.slane %v1528_v36, 2  ;;  %v1518_v53 = vmax.f32 %v1516_v4, %v1517_v7 }
 0x30e   : > { %v1511_v47 = vmax.f32 %v1509_v33, %v1510_v44  ;;  %v1522_v50 = vrot.slane %v1521_v38, 2 }
 0x30f   : > { %v1530_v39 = vmax.f32 %v1528_v36, %v1529_v15  ;;  %v5823_v54 = vpop.f32.mrb[12].mxu1 }
 0x310   : > { %v1548_v55 = vsel %vm1547_vm8, %v1511_v47, %v1546_v49  ;;  %v1523_v19 = vmax.f32 %v1521_v38, %v1522_v50  ;;  %v5828_v42 = vpop.f32.mrb[13].mxu1 }
 0x311   : > { %v1531_v60 = vrot.slane %v1530_v39, 1  ;;  %v1550_v3 = vsel %vm1549_vm9, %v1518_v53, %v1548_v55 }
 0x312   : > { %v1524_v6 = vrot.slane %v1523_v19, 1 }
 0x313   : > { %v5831_v57 = vpop.f32.mrb[14].mxu1  ;;  %v1532_v12 = vmax.f32 %v1530_v39, %v1531_v60 }
 0x314   : > { %v1525_v9 = vmax.f32 %v1523_v19, %v1524_v6  ;;  %v5833_v59 = vpop.f32.mrb[15].mxu1 }
 0x316   : > { %v1552_v2 = vsel %vm1551_vm10, %v1525_v9, %v1550_v3 }
 0x317   : > { %v1554_v29 = vsel %vm1553_vm11, %v1532_v12, %v1552_v2  ;;  %v5841_v30 = vpop.f32.mrb[16].mxu1 }
 0x318   : > { %v5844_v4 = vmax.f32 %v5835_v14, %v1554_v29  ;;  %v2554_v16 = vpop.f32.mrb[17].mxu1 }
 0x319   : > { %v5847_v20 = vadd.f32 %v2554_v16, %v5838_v8 }
 0x31a   : > { %v1561_v21 = vcombine.high %v5844_v4, %v5844_v4  ;;  %1750 = vst.msk [vmem:[#allocation2] sm:$0xff] %vm990_vm2, %v5844_v4  ;;  %v1568_v33 = vrot.slane %v5844_v4, %v5586_v0 }
 0x31b   : > { %v4031_v18 = vmul.f32 -1.442695, %v5847_v20  ;;  %v4218_v32 = vpop.f32.mrb[18].mxu1 }
 0x31c   : > { %v1575_v7 = vrot.slane %v1561_v21, %v5586_v0  ;;  %v1576_v36 = vcombine.high %v1568_v33, %v1568_v33  ;;  %v1584_v43 = vrot.slane %v1568_v33, %v5586_v0  ;;  %v2564_v44 = vpop.f32.mrb[19].mxu1  ;;  %v5864_v50 = vadd.f32 %v4218_v32, %v5838_v8 }
 0x31d   : > { %4451 = vpow2.f32 %v4031_v18  ;;  %v5859_v38 = vadd.f32 %v2564_v44, %v5838_v8 }
 0x31e   : > { %v1577_v49 = vcombine.high %v1575_v7, %v1575_v7  ;;  %v1591_v15 = vrot.slane %v1575_v7, %v5586_v0  ;;  %v1598_v47 = vrot.slane %v1576_v36, %v5586_v0  ;;  %v1606_v53 = vcombine.high %v1584_v43, %v1584_v43 }
 0x31f   : > { %v1613_v39 = vrot.slane %v1584_v43, %v5464_v5  ;;  %v4033_v55 = vmul.f32 -1.442695, %v5859_v38  ;;  %v4221_v19 = vpop.f32.mrb[20].mxu1  ;;  %v4034_v18 = vmul.f32 -1.442695, %v5864_v50 }
 0x320   : > { %v1605_v60 = vrot.slane %v1577_v49, %v5586_v0  ;;  %v1607_v3 = vcombine.high %v1591_v15, %v1591_v15  ;;  %v1629_v6 = vrot.slane %v1591_v15, %v5464_v5  ;;  %v1617_v9 = vrot.slane %v1598_v47, %v5464_v5  ;;  %v2574_v12 = vpop.f32.mrb[21].mxu1 }
 0x321   : > { %v1621_v2 = vrot.slane %v1606_v53, %v5464_v5  ;;  %v1650_v29 = vsub.f32 %v5766_v62, %v1613_v39  ;;  %4453 = vpow2.f32 %v4033_v55 }
 0x322   : > { %v1609_v16 = vcombine.high %v1605_v60, %v1605_v60  ;;  %v1637_v21 = vrot.slane %v1607_v3, %v5464_v5  ;;  %v1651_v33 = vsub.f32 %v5760_v58, %v1617_v9  ;;  %v1654_v0 = vsub.f32 %v5790_v40, %v1629_v6 }
 0x323   : > { %v1652_v32 = vsub.f32 %v5778_v28, %v1621_v2  ;;  %v4224_v7 = vpop.f32.mrb[22].mxu1  ;;  %v1633_v36 = vrot.slane %v1605_v60, %v5464_v5  ;;  %4455 = vpow2.f32 %v4034_v18  ;;  %v5882_v58 = vadd.f32 %v4221_v19, %v5838_v8 }
 0x324   : > { %v1656_v43 = vsub.f32 %v5804_v1, %v1637_v21  ;;  %v2584_v44 = vpop.f32.mrb[23].mxu1  ;;  %v1666_v62 = vmul.f32 1.442695, %v1654_v0  ;;  %v1641_v15 = vrot.slane %v1609_v16, %v5464_v5  ;;  %v1658_v28 = vmul.f32 1.442695, %v1650_v29 }
 0x325   : > { %v1662_v49 = vmul.f32 1.442695, %v1652_v32  ;;  %v5885_v40 = vadd.f32 %v2574_v12, %v5838_v8  ;;  %v1608_v60 = vcombine.high %v1598_v47, %v1598_v47  ;;  %v4036_v55 = vmul.f32 -1.442695, %v5882_v58 }
 0x326   : > { %v1670_v53 = vmul.f32 1.442695, %v1656_v43  ;;  %v1655_v3 = vsub.f32 %v5787_v34, %v1633_v36  ;;  %v1660_v6 = vmul.f32 1.442695, %v1651_v33  ;;  %v5891_v19 = vadd.f32 %v4224_v7, %v5838_v8 }
 0x327   : > { %v4452_v39 = vpop.eup %4451  ;;  %4457 = vpow2.f32 %v1662_v49  ;;  %v1625_v9 = vrot.slane %v1608_v60, %v5464_v5  ;;  %v1657_v2 = vsub.f32 %v5801_v11, %v1641_v15  ;;  %v4035_v12 = vmul.f32 -1.442695, %v5885_v40 }
 0x328   : > { %4459 = vpow2.f32 %v1670_v53  ;;  %v2617_v1 = vadd.f32 1.0, %v4452_v39  ;;  %v5897_v29 = vadd.f32 %v2584_v44, %v5838_v8  ;;  %v1557_v5 = vsub.f32 %v5835_v14, %v5844_v4 }
 0x329   : > { %4461 = vpow2.f32 %v1666_v62  ;;  %v1653_v47 = vsub.f32 %v5774_v37, %v1625_v9  ;;  %v4038_v21 = vmul.f32 -1.442695, %v5891_v19  ;;  %v5904_v11 = vadd.f32 %v5841_v30, %v5838_v8 }
 0x32a   : > { %4463 = vrcp.f32 %v2617_v1  ;;  %v1668_v18 = vmul.f32 1.442695, %v1655_v3  ;;  %v4037_v32 = vmul.f32 -1.442695, %v5897_v29  ;;  %v4412_v7 = vunpack.i.h.bf16 %v5815_v22 }
 0x32b   : > { %4465 = vpow2.f32 %v1658_v28  ;;  %v1664_v34 = vmul.f32 1.442695, %v1653_v47  ;;  %v4454_v16 = vpop.eup %4453  ;;  %v4411_v36 = vunpack.i.l.bf16 %v5815_v22  ;;  %v1672_v14 = vmul.f32 1.442695, %v1657_v2 }
 0x32c   : > { %4467 = vpow2.f32 %v4036_v55  ;;  %v2619_v33 = vadd.f32 1.0, %v4454_v16  ;;  %v1558_v43 = vmul.f32 1.442695, %v1557_v5  ;;  %v4032_v8 = vmul.f32 -1.442695, %v5904_v11 }
 0x32d   : > { %4469 = vpow2.f32 %v1660_v6  ;;  %v4456_v37 = vpop.eup %4455 }
 0x32e   : > { %4471 = vpow2.f32 %v4035_v12  ;;  %v2620_v15 = vadd.f32 1.0, %v4456_v37 }
 0x32f   : > { %4473 = vpow2.f32 %v1664_v34 }
 0x330   : > { %4475 = vrcp.f32 %v2619_v33 }
 0x331   : > { %v4458_v0 = vpop.eup %4457  ;;  %4477 = vpow2.f32 %v4038_v21  ;;  %v5918_v21 = vpack.c.bf16 %v4412_v7, %v4411_v36 }
 0x332   : > { %v4460_v4 = vpop.eup %4459  ;;  %v1690_v44 = vsel %vm990_vm2, %v4458_v0, 0.0  ;;  %4479 = vpow2.f32 %v1668_v18  ;;  %v1810_v28 = vmul.f32 %v4458_v0, %v5763_v61 }
 0x333   : > { %v4462_v30 = vpop.eup %4461  ;;  %v1718_v49 = vsel %vm990_vm2, %v4460_v4, 0.0  ;;  %v1691_v62 = vrot.slane %v1690_v44, 4  ;;  %4481 = vpow2.f32 %v4037_v32 }
 0x334   : > { %v4464_v53 = vpop.eup %4463  ;;  %v1719_v39 = vrot.slane %v1718_v49, 4  ;;  %v1704_v22 = vsel %vm990_vm2, %v4462_v30, 0.0  ;;  %4483 = vpow2.f32 %v1672_v14 }
 0x335   : > { %v4466_v60 = vpop.eup %4465  ;;  %v1692_v1 = vadd.f32 %v1691_v62, %v1690_v44  ;;  %v1705_v55 = vrot.slane %v1704_v22, 4  ;;  %v2641_v3 = vmul.f32 %v4464_v53, %v5847_v20  ;;  %4485 = vpow2.f32 %v4032_v8 }
 0x336   : > { %v4468_v6 = vpop.eup %4467  ;;  %v1720_v9 = vadd.f32 %v1719_v39, %v1718_v49  ;;  %v1676_v2 = vsel %vm990_vm2, %v4466_v60, 0.0  ;;  %v1808_v12 = vmul.f32 %v4466_v60, %v5563_v45  ;;  %4487 = vpow2.f32 %v1558_v43 }
 0x337   : > { %v4470_v47 = vpop.eup %4469  ;;  %v1693_v34 = vrot.slane %v1692_v1, 2  ;;  %v1706_v16 = vadd.f32 %v1705_v55, %v1704_v22  ;;  %v1677_v61 = vrot.slane %v1676_v2, 4  ;;  %v2622_v5 = vadd.f32 1.0, %v4468_v6  ;;  %2657 = vrot.lane.b32.xlu1 %v2641_v3, %s4961_s2 }
 0x338   : > { %4160 = vmatprep.mubr.msk.f32.mxu0 %vm990_vm2, %v1808_v12  ;;  %v1683_v20 = vsel %vm990_vm2, %v4470_v47, 0.0  ;;  %v1809_v33 = vmul.f32 %v4470_v47, %v5569_v52  ;;  %v4472_v18 = vpop.eup %4471  ;;  %4489 = vrcp.f32 %v2620_v15  ;;  %v1721_v43 = vrot.slane %v1720_v9, 2 }
 0x339   : > { %v1694_v37 = vadd.f32 %v1693_v34, %v1692_v1  ;;  %v1678_v45 = vadd.f32 %v1677_v61, %v1676_v2  ;;  %v4474_v32 = vpop.eup %4473  ;;  %4491 = vrcp.f32 %v2622_v5  ;;  %v1684_v0 = vrot.slane %v1683_v20, 4 }
 0x33a   : > { %4161 = vmatmul.mubr.msk.f32.vlgmr.msra.gmra.mrb[8].mxu0 %vm990_vm2, %v1809_v33  ;;  %v2621_v14 = vadd.f32 1.0, %v4472_v18  ;;  %v4476_v44 = vpop.eup %4475  ;;  %v1707_v7 = vrot.slane %v1706_v16, 2  ;;  %v1697_v8 = vsel %vm990_vm2, %v4474_v32, 0.0  ;;  %v1814_v39 = vmul.f32 %v4460_v4, %v5798_v56 }
 0x33b   : > { %v1679_v36 = vrot.slane %v1678_v45, 2  ;;  %4163 = vmatprep.mubr.msk.f32.mxu0 %vm990_vm2, %v1810_v28  ;;  %4189 = vmatpush3.msk.msra.mxu0 %vm1841_vm3, %v5714_v35  ;;  %v4478_v52 = vpop.eup %4477  ;;  %v2643_v49 = vmul.f32 %v4476_v44, %v5859_v38  ;;  %v1685_v62 = vadd.f32 %v1684_v0, %v1683_v20  ;;  %v1695_v53 = vrot.slane %v1694_v37, 1 }
 0x33c   : > { %4493 = vrcp.f32 %v2621_v14  ;;  %4258 = vmatprep.subr.bf16.mxu0 %v5918_v21  ;;  %v4480_v15 = vpop.eup %4479  ;;  %v1698_v60 = vrot.slane %v1697_v8, 4  ;;  %v1812_v28 = vmul.f32 %v4462_v30, %v5782_v13  ;;  %v1811_v3 = vmul.f32 %v4474_v32, %v5583_v63 }
 0x33d   : > { %v1680_v22 = vadd.f32 %v1679_v36, %v1678_v45  ;;  %v4482_v1 = vpop.eup %4481  ;;  %v1686_v55 = vrot.slane %v1685_v62, 2  ;;  %v2624_v35 = vadd.f32 1.0, %v4478_v52  ;;  %2661 = vrot.lane.b32.xlu1 %v2643_v49, %s4961_s2  ;;  %v1722_v6 = vadd.f32 %v1721_v43, %v1720_v9 }
 0x33e   : > { %v4484_v38 = vpop.eup %4483  ;;  %v1708_v2 = vadd.f32 %v1707_v7, %v1706_v16  ;;  %v1699_v12 = vadd.f32 %v1698_v60, %v1697_v8  ;;  %v1711_v47 = vsel %vm990_vm2, %v4480_v15, 0.0  ;;  %4164 = vmatmul.mubr.msk.f32.gmra.mrb[10].mxu0 %vm990_vm2, %v1811_v3  ;;  %v1696_v13 = vadd.f32 %v1695_v53, %v1694_v37 }
 0x33f   : > { %v4486_v34 = vpop.eup %4485  ;;  %v1681_v61 = vrot.slane %v1680_v22, 1  ;;  %v1687_v56 = vadd.f32 %v1686_v55, %v1685_v62  ;;  %4495 = vrcp.f32 %v2624_v35  ;;  %v1712_v4 = vrot.slane %v1711_v47, 4  ;;  %4166 = vmatprep.mubr.msk.f32.mxu0 %vm990_vm2, %v1812_v28 }
 0x340   : > { %v1700_v30 = vrot.slane %v1699_v12, 2  ;;  %v2623_v63 = vadd.f32 1.0, %v4482_v1  ;;  %v1725_v5 = vsel %vm990_vm2, %v4484_v38, 0.0  ;;  %v4488_v20 = vpop.eup %4487  ;;  %v1813_v33 = vmul.f32 %v4480_v15, %v5599_v25 }
 0x341   : > { %v1688_v9 = vrot.slane %v1687_v56, 1  ;;  %v1713_v16 = vadd.f32 %v1712_v4, %v1711_v47  ;;  %v1726_v18 = vrot.slane %v1725_v5, 4  ;;  %v1709_v32 = vrot.slane %v1708_v2, 1 }
 0x342   : > { %v4490_v45 = vpop.eup %4489  ;;  %v1701_v0 = vadd.f32 %v1700_v30, %v1699_v12  ;;  %4497 = vrcp.f32 %v2623_v63  ;;  %v2618_v14 = vadd.f32 1.0, %v4486_v34  ;;  %v1682_v43 = vadd.f32 %v1681_v61, %v1680_v22  ;;  %4167 = vmatmul.mubr.msk.f32.gmra.mrb[12].mxu0 %vm990_vm2, %v1813_v33  ;;  %v4567_v30 = vld [vmem:[%s5458_s20] sm:$0xff] }
 0x343   : > { %v4492_v44 = vpop.eup %4491  ;;  %v1689_v37 = vadd.f32 %v1688_v9, %v1687_v56  ;;  %v1714_v7 = vrot.slane %v1713_v16, 2  ;;  %v1727_v36 = vadd.f32 %v1726_v18, %v1725_v5  ;;  %4169 = vmatprep.mubr.msk.f32.mxu0 %vm990_vm2, %v1814_v39  ;;  %v1815_v53 = vmul.f32 %v4484_v38, %v5605_v46  ;;  %v1674_v38 = vld [vmem:[#allocation3] sm:$0xff]  ;;  %v4570_v18 = vld [vmem:[%s5458_s20 + $0x18] sm:$0xff] }
 0x344   : > { %v2646_v8 = vmul.f32 %v4492_v44, %v5882_v58  ;;  %v1702_v52 = vrot.slane %v1701_v0, 1  ;;  %4499 = vrcp.f32 %v2618_v14  ;;  %v1723_v60 = vrot.slane %v1722_v6, 1  ;;  %v4574_v14 = vld [vmem:[%s6584_s17] ss:$0 sm:$0xff] }
 0x345   : > { %v1740_v49 = vsel %vm1541_vm5, %v1689_v37, %v1682_v43  ;;  %v1715_v62 = vadd.f32 %v1714_v7, %v1713_v16  ;;  %v1728_v15 = vrot.slane %v1727_v36, 2  ;;  %v1710_v58 = vadd.f32 %v1709_v32, %v1708_v2  ;;  %v4569_v16 = vld [vmem:[%s5458_s20 + $0x10] sm:$0xff]  ;;  %v6001_v43 = vpop.permute.xlu1 %2212 }
 0x346   : > { %v4494_v25 = vpop.eup %4493  ;;  %v1703_v1 = vadd.f32 %v1702_v52, %v1701_v0  ;;  %v1741_v28 = vsel %vm1543_vm6, %v1696_v13, %v1740_v49  ;;  %2667 = vrot.lane.b32.xlu1 %v2646_v8, %s4961_s2  ;;  %4170 = vmatmul.mubr.msk.f32.gmra.mrb[14].mxu0 %vm990_vm2, %v1815_v53  ;;  %v1724_v47 = vadd.f32 %v1723_v60, %v1722_v6  ;;  %v3370_v6 = vld [vmem:[%s6586_s21] sm:$0xf]  ;;  %v4573_v0 = vld [vmem:[%s5458_s20 + $0x30] sm:$0xff] }
 0x347   : > { %v2645_v22 = vmul.f32 %v4494_v25, %v5885_v40  ;;  %v1716_v55 = vrot.slane %v1715_v62, 1  ;;  %v1729_v3 = vadd.f32 %v1728_v15, %v1727_v36  ;;  %4190 = vmatprep.mubr.msk.f32.mxu0 %vm4965_vm4, %v4964_v26  ;;  %v1675_v13 = vmul.f32 %v4488_v20, %v1674_v38 }
 0x348   : > { %v1742_v39 = vsel %vm1545_vm7, %v1703_v1, %v1741_v28  ;;  %v3034_v33 = vrot.slane %v5684_v17, %v5509_v23  ;;  %v2811_v32 = vrot.slane %v5677_v10, %v5509_v23  ;;  %v3257_v17 = vrot.slane %v5691_v24, %v5509_v23  ;;  %v4575_v10 = vld [vmem:[%s5458_s20 + $0x38] sm:$0xff]  ;;  %v6003_v24 = vpop.permute.xlu0 %2771 }
 0x349   : > { %v4496_v46 = vpop.eup %4495  ;;  %v1743_v35 = vsel %vm1547_vm8, %v1710_v58, %v1742_v39  ;;  %v1717_v40 = vadd.f32 %v1716_v55, %v1715_v62  ;;  %v1730_v12 = vrot.slane %v1729_v3, 1  ;;  %v2765_v37 = vpop.permute.xlu1 %2764  ;;  %v6025_v55 = vld [vmem:[%s783_s10] sm:$0xff]  ;;  %s4276_s10 = smul.u32 24, %s5448_s6  ;;  %s6590_s6 = sld [smem:[#allocation36_spill]] }
 0x34a   : > { %v2648_v34 = vmul.f32 %v4496_v46, %v5891_v19  ;;  %2665 = vrot.lane.b32.xlu1 %v2645_v22, %s4961_s2  ;;  %4191 = vmatmul.mubr.msk.f32.vlgmr.msra.gmra.mrb[16].mxu0 %vm990_vm2, %v4488_v20 }
 0x34b   : > { %v1744_v2 = vsel %vm1549_vm9, %v1717_v40, %v1743_v35  ;;  %v1731_v61 = vadd.f32 %v1730_v12, %v1729_v3  ;;  %4260 = vmatpush3.bf16.msra.mxu0 %v5918_v21  ;;  %4197 = vmatprep.mubr.msk.f32.mxu0 %vm1017_vm0, %v4567_v30  ;;  %v4568_v21 = vld [vmem:[%s5458_s20 + $0x8] sm:$0xff]  ;;  %s959_s19 = scalar_lea.vmem %s6588_s14, %s4276_s10  ;;  %s6392_s10 = scalar_lea.hbm %s6591_s30, %s4277_s8 }
 0x34c   : > { %v4498_v56 = vpop.eup %4497  ;;  %v1745_v4 = vsel %vm1551_vm10, %v1724_v47, %v1744_v2  ;;  %4225 = vmatprep.subr.mxu0 %v4964_v26  ;;  %v6005_v36 = vpop.permute.xlu0 %2994 }
 0x34d   : > { %v1746_v19 = vsel %vm1553_vm11, %v1731_v61, %v1745_v4  ;;  %v2647_v5 = vmul.f32 %v4498_v56, %v5897_v29  ;;  %v2644_v29 = vmul.f32 %v4490_v45, %v5864_v50  ;;  %v4572_v45 = vld [vmem:[%s5458_s20 + $0x28] sm:$0xff]  ;;  %v2988_v23 = vpop.permute.xlu1 %2987 }
 0x34e   : > { %v4500_v63 = vpop.eup %4499  ;;  %v1748_v9 = vadd.f32 %v1746_v19, %v1675_v13  ;;  %2671 = vrot.lane.b32.xlu1 %v2648_v34, %s4961_s2  ;;  %4198 = vmatmul.mubr.msk.f32.vlgmr.msra.gmra.mrb[18].mxu0 %vm1017_vm0, %v4568_v21 }
 0x34f   : > { %v2642_v20 = vmul.f32 %v4500_v63, %v5904_v11  ;;  %4200 = vmatprep.mubr.msk.f32.mxu0 %vm1017_vm0, %v4569_v16  ;;  %4226 = vmatpush3.msk.msra.mxu0 %vm1841_vm3, %v3370_v6  ;;  %v4571_v11 = vld [vmem:[%s5458_s20 + $0x20] sm:$0xff]  ;;  %p6592_p13 = scmp.ne.s32.totalorder %s6590_s6, 0 }
 0x350   : > { %1749 = vst.msk [vmem:[#allocation3] sm:$0xff] %vm990_vm2, %v1748_v9  ;;  %v6007_v52 = vpop.permute.xlu0 %3217 }
 0x351   : > { %2659 = vrot.lane.b32.xlu0 %v2642_v20, %s4961_s2  ;;  %v3211_v7 = vpop.permute.xlu1 %3210 }
 0x352   : > { %2669 = vrot.lane.b32.xlu1 %v2647_v5, %s4961_s2  ;;  %4201 = vmatmul.mubr.msk.f32.gmra.mrb[20].mxu0 %vm1017_vm0, %v4570_v18 }
 0x353   : > { %4203 = vmatprep.mubr.msk.f32.mxu0 %vm1017_vm0, %v4571_v11 }
 0x355   : > { %2663 = vrot.lane.b32.xlu0 %v2644_v29, %s4961_s2  ;;  %v3002_v8 = vpop.permute.xlu1 %3001 }
 0x356   : > { %3036 = vbcast.lane.b32.xlu1 %v3034_v33, 256  ;;  %4204 = vmatmul.mubr.msk.f32.gmra.mrb[22].mxu0 %vm1017_vm0, %v4572_v45 }
 0x357   : > { %v3367_v50 = vld [vmem:[#allocation3] sm:$0xff]  ;;  %4206 = vmatprep.mubr.msk.f32.mxu0 %vm1017_vm0, %v4573_v0 }
 0x358   : > { %4501 = vrcp.f32 %v3367_v50 }
 0x359   : > { %2813 = vbcast.lane.b32.xlu0 %v2811_v32, 256  ;;  %v6009_v25 = vpop.permute.xlu1 %3008 }
 0x35a   : > { %2315 = vrot.lane.b32.xlu1 %v4574_v14, %s4961_s2  ;;  %4207 = vmatmul.mubr.msk.f32.gmra.mrb[24].mxu0 %vm1017_vm0, %v4575_v10 }
 0x35b   : > { %4227 = vmatprep.mubr.msk.f32.mxu0 %vm4965_vm4, %v4964_v26  ;;  %v2779_v26 = vpop.permute.xlu0 %2778 }
 0x35d   : > { %3259 = vbcast.lane.b32.xlu0 %v3257_v17, 256  ;;  %v6011_v49 = vpop.permute.xlu1 %3015 }
 0x35f   : > { %v3225_v62 = vpop.permute.xlu0 %3224 }
 0x361   : > { %v3023_v15 = vpop.permute.xlu1 %3022 }
 0x362   : > { %v4502_v44 = vpop.eup %4501 }
 0x363   : > { %4228 = vmatmul.mubr.msk.f32.vlgmr.msra.gmra.mrb[26].mxu0 %vm990_vm2, %v4502_v44  ;;  %v6013_v53 = vpop.permute.xlu0 %2785 }
 0x365   : > { %v6015_v60 = vpop.permute.xlu1 %2806 }
 0x367   : > { %v6017_v22 = vpop.permute.xlu0 %3231 }
 0x369   : > { %v6019_v1 = vpop.permute.xlu1 %3252 }
 0x36b   : > { %v6021_v28 = vpop.permute.xlu0 %2792 }
 0x36f   : > { %v6028_v39 = vpop.permute.xlu0 %3238 }
 0x373   : > { %v2800_v6 = vpop.permute.xlu0 %2799 }
 0x377   : > { %v3246_v10 = vpop.permute.xlu0 %3245 }
 0x3a9   : > { %v2658_v58 = vpop.permute.xlu1 %2657 }
 0x3aa   : > { %v2681_v3 = vmul.f32 %v6025_v55, %v2658_v58 }
 0x3ac   : > { %v2815_v46 = vmul.f32 %v2765_v37, %v2681_v3  ;;  %v3038_v35 = vmul.f32 %v2988_v23, %v2681_v3  ;;  %v3261_v40 = vmul.f32 %v3211_v7, %v2681_v3 }
 0x3ae   : > { %v2824_v38 = vsel %vm2823_vm12, %v2815_v46, 0.0  ;;  %v3046_v12 = vsel %vm2823_vm12, %v3038_v35, 0.0  ;;  %v3269_v47 = vsel %vm2823_vm12, %v3261_v40, 0.0  ;;  %v6040_v46 = vadd.f32 %v5806_v27, %v5826_v51 }
 0x3af   : > { %v2825_v34 = vrot.slane %v2824_v38, 4  ;;  %v3047_v2 = vrot.slane %v3046_v12, 4  ;;  %v3270_v61 = vrot.slane %v3269_v47, 4  ;;  %v2662_v56 = vpop.permute.xlu1 %2661  ;;  %v6044_v35 = vadd.f32 %v5811_v31, %v5826_v51 }
 0x3b0   : > { %v2683_v19 = vmul.f32 %v6025_v55, %v2662_v56 }
 0x3b1   : > { %v2826_v4 = vadd.f32 %v2825_v34, %v2824_v38  ;;  %v3048_v13 = vadd.f32 %v3047_v2, %v3046_v12  ;;  %v3271_v30 = vadd.f32 %v3270_v61, %v3269_v47 }
 0x3b2   : > { %v2817_v21 = vmul.f32 %v2779_v26, %v2683_v19  ;;  %v3040_v20 = vmul.f32 %v3002_v8, %v2683_v19  ;;  %v3263_v16 = vmul.f32 %v3225_v62, %v2683_v19 }
 0x3b3   : > { %v2827_v63 = vrot.slane %v2826_v4, 2  ;;  %v3049_v5 = vrot.slane %v3048_v13, 2  ;;  %v3272_v9 = vrot.slane %v3271_v30, 2 }
 0x3b4   : > { %v2838_v18 = vsel %vm2823_vm12, %v2817_v21, 0.0  ;;  %v3060_v32 = vsel %vm2823_vm12, %v3040_v20, 0.0  ;;  %v3283_v50 = vsel %vm2823_vm12, %v3263_v16, 0.0 }
 0x3b5   : > { %v2828_v29 = vadd.f32 %v2827_v63, %v2826_v4  ;;  %v3050_v33 = vadd.f32 %v3049_v5, %v3048_v13  ;;  %v2839_v11 = vrot.slane %v2838_v18, 4  ;;  %v3273_v45 = vadd.f32 %v3272_v9, %v3271_v30  ;;  %v6052_v63 = vpop.permute.xlu0 %3029 }
 0x3b6   : > { %v3061_v0 = vrot.slane %v3060_v32, 4  ;;  %v3284_v14 = vrot.slane %v3283_v50, 4 }
 0x3b7   : > { %v2840_v17 = vadd.f32 %v2839_v11, %v2838_v18  ;;  %v2829_v44 = vrot.slane %v2828_v29, 1  ;;  %v3051_v37 = vrot.slane %v3050_v33, 1  ;;  %v3274_v58 = vrot.slane %v3273_v45, 1 }
 0x3b8   : > { %v3062_v23 = vadd.f32 %v3061_v0, %v3060_v32  ;;  %v2668_v7 = vpop.permute.xlu1 %2667  ;;  %v3285_v26 = vadd.f32 %v3284_v14, %v3283_v50  ;;  %v4966_v14 = vmov 0.0|0.0  }
 0x3b9   : > { %v2841_v8 = vrot.slane %v2840_v17, 2  ;;  %v2686_v62 = vmul.f32 %v6025_v55, %v2668_v7  ;;  %v6046_v34 = vadd.f32 %v2829_v44, %v2828_v29  ;;  %v6048_v2 = vadd.f32 %v3051_v37, %v3050_v33  ;;  %4265 = vmatprep.subr.bf16.mxu1 %v4966_v14 }
 0x3ba   : > { %v3063_v3 = vrot.slane %v3062_v23, 2  ;;  %v3286_v38 = vrot.slane %v3285_v26, 2 }
 0x3bb   : > { %v2842_v40 = vadd.f32 %v2841_v8, %v2840_v17  ;;  %v2820_v12 = vmul.f32 %v2800_v6, %v2686_v62  ;;  %v3043_v47 = vmul.f32 %v3023_v15, %v2686_v62  ;;  %v3266_v56 = vmul.f32 %v3246_v10, %v2686_v62 }
 0x3bc   : > { %v3064_v61 = vadd.f32 %v3063_v3, %v3062_v23  ;;  %v2666_v4 = vpop.permute.xlu1 %2665  ;;  %v3287_v30 = vadd.f32 %v3286_v38, %v3285_v26  ;;  %v6055_v6 = vadd.f32 %v3274_v58, %v3273_v45 }
 0x3bd   : > { %v2843_v13 = vrot.slane %v2842_v40, 1  ;;  %v2859_v27 = vsel %vm2823_vm12, %v2820_v12, 0.0  ;;  %v3081_v19 = vsel %vm2823_vm12, %v3043_v47, 0.0  ;;  %v3304_v15 = vsel %vm2823_vm12, %v3266_v56, 0.0 }
 0x3be   : > { %v3065_v31 = vrot.slane %v3064_v61, 1  ;;  %v2860_v5 = vrot.slane %v2859_v27, 4  ;;  %v3082_v9 = vrot.slane %v3081_v19, 4  ;;  %v3288_v21 = vrot.slane %v3287_v30, 1 }
 0x3bf   : > { %v3305_v20 = vrot.slane %v3304_v15, 4  ;;  %v2685_v16 = vmul.f32 %v6025_v55, %v2666_v4  ;;  %v6058_v29 = vadd.f32 %v2843_v13, %v2842_v40 }
 0x3c0   : > { %v2861_v33 = vadd.f32 %v2860_v5, %v2859_v27  ;;  %v3083_v18 = vadd.f32 %v3082_v9, %v3081_v19  ;;  %v2672_v11 = vpop.permute.xlu1 %2671  ;;  %v6060_v32 = vadd.f32 %v3065_v31, %v3064_v61  ;;  %v6065_v45 = vadd.f32 %v3288_v21, %v3287_v30 }
 0x3c1   : > { %v3306_v50 = vadd.f32 %v3305_v20, %v3304_v15  ;;  %v2819_v0 = vmul.f32 %v6021_v28, %v2685_v16  ;;  %v3042_v17 = vmul.f32 %v6011_v49, %v2685_v16  ;;  %v3265_v37 = vmul.f32 %v6028_v39, %v2685_v16 }
 0x3c2   : > { %v2862_v10 = vrot.slane %v2861_v33, 2  ;;  %v3084_v44 = vrot.slane %v3083_v18, 2  ;;  %v6071_v62 = vmul.f32 %v6025_v55, %v2672_v11 }
 0x3c3   : > { %v3307_v23 = vrot.slane %v3306_v50, 2  ;;  %v2852_v7 = vsel %vm2823_vm12, %v2819_v0, 0.0  ;;  %v3074_v8 = vsel %vm2823_vm12, %v3042_v17, 0.0  ;;  %v2660_v26 = vpop.permute.xlu0 %2659  ;;  %v3297_v39 = vsel %vm2823_vm12, %v3265_v37, 0.0 }
 0x3c4   : > { %v6073_v28 = vadd.f32 %v2862_v10, %v2861_v33  ;;  %v6075_v49 = vadd.f32 %v3084_v44, %v3083_v18  ;;  %v2853_v58 = vrot.slane %v2852_v7, 4  ;;  %v3075_v3 = vrot.slane %v3074_v8, 4  ;;  %v2670_v40 = vpop.permute.xlu1 %2669 }
 0x3c5   : > { %v6077_v38 = vadd.f32 %v3307_v23, %v3306_v50  ;;  %v2682_v12 = vmul.f32 %v6025_v55, %v2660_v26  ;;  %v6082_v47 = vmul.f32 %v6025_v55, %v2670_v40  ;;  %v3298_v27 = vrot.slane %v3297_v39, 4 }
 0x3c6   : > { %v2864_v61 = vrot.slane %v6073_v28, 1  ;;  %v3086_v56 = vrot.slane %v6075_v49, 1  ;;  %v2854_v4 = vadd.f32 %v2853_v58, %v2852_v7  ;;  %v3076_v13 = vadd.f32 %v3075_v3, %v3074_v8 }
 0x3c7   : > { %v3309_v30 = vrot.slane %v6077_v38, 1  ;;  %v2816_v19 = vmul.f32 %v6003_v24, %v2682_v12  ;;  %v3039_v31 = vmul.f32 %v6005_v36, %v2682_v12  ;;  %v2664_v5 = vpop.permute.xlu0 %2663  ;;  %v3262_v21 = vmul.f32 %v6007_v52, %v2682_v12 }
 0x3c8   : > { %v2855_v9 = vrot.slane %v2854_v4, 2  ;;  %v3077_v15 = vrot.slane %v3076_v13, 2  ;;  %v2684_v20 = vmul.f32 %v6025_v55, %v2664_v5  ;;  %v3299_v16 = vadd.f32 %v3298_v27, %v3297_v39 }
 0x3c9   : > { %v2831_v33 = vsel %vm2823_vm12, %v2816_v19, 0.0  ;;  %v3053_v18 = vsel %vm2823_vm12, %v3039_v31, 0.0  ;;  %v2821_v11 = vmul.f32 %v6015_v60, %v6082_v47  ;;  %v3276_v10 = vsel %vm2823_vm12, %v3262_v21, 0.0 }
 0x3ca   : > { %v2856_v50 = vadd.f32 %v2855_v9, %v2854_v4  ;;  %v3078_v0 = vadd.f32 %v3077_v15, %v3076_v13  ;;  %v2832_v24 = vrot.slane %v2831_v33, 4  ;;  %v3054_v17 = vrot.slane %v3053_v18, 4 }
 0x3cb   : > { %v3300_v36 = vrot.slane %v3299_v16, 2  ;;  %v2818_v44 = vmul.f32 %v6013_v53, %v2684_v20  ;;  %v3041_v52 = vmul.f32 %v6009_v25, %v2684_v20  ;;  %v3277_v26 = vrot.slane %v3276_v10, 4 }
 0x3cc   : > { %v2857_v55 = vrot.slane %v2856_v50, 1  ;;  %v3079_v37 = vrot.slane %v3078_v0, 1  ;;  %v2833_v23 = vadd.f32 %v2832_v24, %v2831_v33  ;;  %v3055_v7 = vadd.f32 %v3054_v17, %v3053_v18  ;;  %v2814_v33 = vpop.permute.xlu0 %2813 }
 0x3cd   : > { %v3301_v8 = vadd.f32 %v3300_v36, %v3299_v16  ;;  %v2845_v58 = vsel %vm2823_vm12, %v2818_v44, 0.0  ;;  %v3067_v60 = vsel %vm2823_vm12, %v3041_v52, 0.0  ;;  %v3278_v53 = vadd.f32 %v3277_v26, %v3276_v10 }
 0x3ce   : > { %v6100_v3 = vadd.f32 %v2857_v55, %v2856_v50  ;;  %v6102_v40 = vadd.f32 %v3079_v37, %v3078_v0  ;;  %v2834_v39 = vrot.slane %v2833_v23, 2  ;;  %v3056_v12 = vrot.slane %v3055_v7, 2 }
 0x3cf   : > { %v3302_v4 = vrot.slane %v3301_v8, 1  ;;  %v2846_v13 = vrot.slane %v2845_v58, 4  ;;  %v3068_v25 = vrot.slane %v3067_v60, 4  ;;  %v3264_v31 = vmul.f32 %v6017_v22, %v2684_v20 }
 0x3d0   : > { %v2835_v27 = vadd.f32 %v2834_v39, %v2833_v23  ;;  %v3057_v19 = vadd.f32 %v3056_v12, %v3055_v7  ;;  %v2866_v5 = vsel %vm2823_vm12, %v2821_v11, 0.0  ;;  %v3279_v15 = vrot.slane %v3278_v53, 2 }
 0x3d1   : > { %v6106_v9 = vadd.f32 %v3302_v4, %v3301_v8  ;;  %v2847_v21 = vadd.f32 %v2846_v13, %v2845_v58  ;;  %v3069_v16 = vadd.f32 %v3068_v25, %v3067_v60  ;;  %v3290_v0 = vsel %vm2823_vm12, %v3264_v31, 0.0  ;;  %v3260_v13 = vpop.permute.xlu0 %3259  ;;  %v3037_v25 = vpop.permute.xlu1 %3036 }
 0x3d2   : > { %v2836_v18 = vrot.slane %v2835_v27, 1  ;;  %v3058_v50 = vrot.slane %v3057_v19, 1  ;;  %v2867_v24 = vrot.slane %v2866_v5, 4  ;;  %v3280_v17 = vadd.f32 %v3279_v15, %v3278_v53 }
 0x3d3   : > { %v2848_v36 = vrot.slane %v2847_v21, 2  ;;  %v3070_v10 = vrot.slane %v3069_v16, 2  ;;  %v3291_v44 = vrot.slane %v3290_v0, 4  ;;  %v3044_v20 = vmul.f32 %v6052_v63, %v6082_v47 }
 0x3d4   : > { %v2837_v52 = vadd.f32 %v2836_v18, %v2835_v27  ;;  %v6109_v55 = vadd.f32 %v3058_v50, %v3057_v19  ;;  %v2868_v22 = vadd.f32 %v2867_v24, %v2866_v5  ;;  %v3281_v11 = vrot.slane %v3280_v17, 1 }
 0x3d5   : > { %v2849_v37 = vadd.f32 %v2848_v36, %v2847_v21  ;;  %v3071_v23 = vadd.f32 %v3070_v10, %v3069_v16  ;;  %v3292_v7 = vadd.f32 %v3291_v44, %v3290_v0  ;;  %v3088_v26 = vsel %vm2823_vm12, %v3044_v20, 0.0 }
 0x3d6   : > { %v2869_v8 = vrot.slane %v2868_v22, 2  ;;  %v3267_v58 = vmul.f32 %v6019_v1, %v6082_v47  ;;  %v2822_v60 = vmul.f32 %v2814_v33, %v6071_v62  ;;  %v3282_v39 = vadd.f32 %v3281_v11, %v3280_v17 }
 0x3d7   : > { %v2850_v12 = vrot.slane %v2849_v37, 1  ;;  %v3072_v4 = vrot.slane %v3071_v23, 1  ;;  %v3293_v53 = vrot.slane %v3292_v7, 2  ;;  %v3089_v63 = vrot.slane %v3088_v26, 4 }
 0x3d8   : > { %v2870_v27 = vadd.f32 %v2869_v8, %v2868_v22  ;;  %v3311_v19 = vsel %vm2823_vm12, %v3267_v58, 0.0  ;;  %v2873_v31 = vsel %vm2823_vm12, %v2822_v60, 0.0  ;;  %v3268_v47 = vmul.f32 %v3260_v13, %v6071_v62 }
 0x3d9   : > { %v2851_v5 = vadd.f32 %v2850_v12, %v2849_v37  ;;  %v3073_v15 = vadd.f32 %v3072_v4, %v3071_v23  ;;  %v3294_v21 = vadd.f32 %v3293_v53, %v3292_v7  ;;  %v3312_v16 = vrot.slane %v3311_v19, 4 }
 0x3da   : > { %v3090_v18 = vadd.f32 %v3089_v63, %v3088_v26  ;;  %v2874_v1 = vrot.slane %v2873_v31, 4  ;;  %v3045_v33 = vmul.f32 %v3037_v25, %v6071_v62  ;;  %v2865_v24 = vadd.f32 %v2864_v61, %v6073_v28 }
 0x3db   : > { %v3295_v50 = vrot.slane %v3294_v21, 1  ;;  %v3313_v0 = vadd.f32 %v3312_v16, %v3311_v19  ;;  %v2871_v17 = vrot.slane %v2870_v27, 1  ;;  %v3318_v44 = vsel %vm2823_vm12, %v3268_v47, 0.0  ;;  %v3450_v47 = vld [vmem:[#allocation18 + $0x8] sm:$0xff] }
 0x3dc   : > { %v3091_v36 = vrot.slane %v3090_v18, 2  ;;  %v2875_v10 = vadd.f32 %v2874_v1, %v2873_v31  ;;  %v3095_v22 = vsel %vm2823_vm12, %v3045_v33, 0.0  ;;  %v3319_v37 = vrot.slane %v3318_v44, 4 }
 0x3dd   : > { %v3296_v20 = vadd.f32 %v3295_v50, %v3294_v21  ;;  %v3314_v11 = vrot.slane %v3313_v0, 2  ;;  %v3096_v23 = vrot.slane %v3095_v22, 4  ;;  %v2872_v62 = vadd.f32 %v2871_v17, %v2870_v27 }
 0x3de   : > { %v3092_v7 = vadd.f32 %v3091_v36, %v3090_v18  ;;  %v2876_v8 = vrot.slane %v2875_v10, 2  ;;  %v2906_v26 = vsel %vm1541_vm5, %v2837_v52, %v6046_v34  ;;  %v3320_v60 = vadd.f32 %v3319_v37, %v3318_v44  ;;  %v3451_v36 = vld [vmem:[#allocation18 + $0x10] sm:$0xff] }
 0x3df   : > { %v3315_v58 = vadd.f32 %v3314_v11, %v3313_v0  ;;  %v3097_v28 = vadd.f32 %v3096_v23, %v3095_v22  ;;  %v2907_v61 = vsel %vm1543_vm6, %v6058_v29, %v2906_v26  ;;  %v3310_v53 = vadd.f32 %v3309_v30, %v6077_v38 }
 0x3e0   : > { %v2877_v12 = vadd.f32 %v2876_v8, %v2875_v10  ;;  %v2908_v4 = vsel %vm1545_vm7, %v2851_v5, %v2907_v61  ;;  %v3352_v13 = vsel %vm1541_vm5, %v3282_v39, %v6055_v6  ;;  %v3321_v25 = vrot.slane %v3320_v60, 2 }
 0x3e1   : > { %v3098_v27 = vrot.slane %v3097_v28, 2  ;;  %v2909_v34 = vsel %vm1547_vm8, %v6100_v3, %v2908_v4  ;;  %v3316_v52 = vrot.slane %v3315_v58, 1  ;;  %v3353_v29 = vsel %vm1543_vm6, %v6065_v45, %v3352_v13 }
 0x3e2   : > { %v2878_v63 = vrot.slane %v2877_v12, 1  ;;  %v2910_v19 = vsel %vm1549_vm9, %v2865_v24, %v2909_v34  ;;  %v3087_v31 = vadd.f32 %v3086_v56, %v6075_v49  ;;  %v3322_v38 = vadd.f32 %v3321_v25, %v3320_v60  ;;  %v3449_v56 = vld [vmem:[#allocation18] sm:$0xff] }
 0x3e3   : > { %v3099_v30 = vadd.f32 %v3098_v27, %v3097_v28  ;;  %v2911_v6 = vsel %vm1551_vm10, %v2872_v62, %v2910_v19  ;;  %v3317_v39 = vadd.f32 %v3316_v52, %v3315_v58  ;;  %v3354_v21 = vsel %vm1545_vm7, %v3296_v20, %v3353_v29 }
 0x3e4   : > { %v2879_v5 = vadd.f32 %v2878_v63, %v2877_v12  ;;  %v3093_v3 = vrot.slane %v3092_v7, 1  ;;  %v3129_v16 = vsel %vm1541_vm5, %v6109_v55, %v6048_v2  ;;  %v3323_v18 = vrot.slane %v3322_v38, 1 }
 0x3e5   : > { %v3100_v1 = vrot.slane %v3099_v30, 1  ;;  %v3355_v45 = vsel %vm1547_vm8, %v6106_v9, %v3354_v21  ;;  %v3130_v49 = vsel %vm1543_vm6, %v6060_v32, %v3129_v16  ;;  %v3452_v32 = vld [vmem:[#allocation18 + $0x18] sm:$0xff]  ;;  %v4266_v44 = vpack.c.bf16 %v3450_v47, %v3449_v56 }
 0x3e6   : > { %v2912_v33 = vsel %vm1553_vm11, %v2879_v5, %v2911_v6  ;;  %v3356_v50 = vsel %vm1549_vm9, %v3310_v53, %v3355_v45  ;;  %v3094_v0 = vadd.f32 %v3093_v3, %v3092_v7  ;;  %v3131_v24 = vsel %vm1545_vm7, %v3073_v15, %v3130_v49 }
 0x3e7   : > { %2913 = vrot.lane.b32.xlu0 %v2912_v33, %s4961_s2  ;;  %v3324_v2 = vadd.f32 %v3323_v18, %v3322_v38  ;;  %v3357_v55 = vsel %vm1551_vm10, %v3317_v39, %v3356_v50  ;;  %v3101_v17 = vadd.f32 %v3100_v1, %v3099_v30  ;;  %v3132_v9 = vsel %vm1547_vm8, %v6102_v40, %v3131_v24 }
 0x3e8   : > { %v3133_v10 = vsel %vm1549_vm9, %v3087_v31, %v3132_v9  ;;  %v3997_v15 = vmul.f32 -1.442695, %v6040_v46  ;;  %v3996_v37 = vmul.f32 -1.442695, %v6044_v35  ;;  %4267 = vmatpush3.bf16.msra.mxu1 %v4266_v44  ;;  %v4269_v23 = vpack.c.bf16 %v3452_v32, %v3451_v36 }
 0x3e9   : > { %v3358_v22 = vsel %vm1553_vm11, %v3324_v2, %v3357_v55  ;;  %v3134_v20 = vsel %vm1551_vm10, %v3094_v0, %v3133_v10  ;;  %v2051_v40 = vadd.f32 %v5817_v41, %v5826_v51  ;;  %v6172_v7 = vadd.f32 %v5820_v48, %v5826_v51  ;;  %4268 = vmatprep.subr.bf16.mxu1 %v4966_v14 }
 0x3ea   : > { %v3135_v11 = vsel %vm1553_vm11, %v3101_v17, %v3134_v20  ;;  %4503 = vpow2.f32 %v3997_v15  ;;  %v6177_v62 = vadd.f32 %v5823_v54, %v5826_v51  ;;  %v6181_v26 = vadd.f32 %v5828_v42, %v5826_v51 }
 0x3eb   : > { %3359 = vrot.lane.b32.xlu0 %v3358_v22, %s4961_s2  ;;  %3136 = vrot.lane.b32.xlu1 %v3135_v11, %s4961_s2  ;;  %4505 = vpow2.f32 %v3996_v37  ;;  %v3999_v8 = vmul.f32 -1.442695, %v2051_v40  ;;  %v3998_v41 = vmul.f32 -1.442695, %v6172_v7  ;;  %v6186_v48 = vadd.f32 %v5831_v57, %v5826_v51 }
 0x3ec   : > { %4270 = vmatpush3.bf16.msra.mxu1 %v4269_v23  ;;  %v4001_v14 = vmul.f32 -1.442695, %v6177_v62  ;;  %v4000_v58 = vmul.f32 -1.442695, %v6181_v26  ;;  %v6192_v60 = vadd.f32 %v5833_v59, %v5826_v51 }
 0x3ed   : > { %4507 = vpow2.f32 %v3999_v8  ;;  %v4003_v42 = vmul.f32 -1.442695, %v6186_v48 }
 0x3ee   : > { %4509 = vpow2.f32 %v3998_v41  ;;  %v4002_v61 = vmul.f32 -1.442695, %v6192_v60 }
 0x3ef   : > { %4511 = vpow2.f32 %v4001_v14 }
 0x3f0   : > { %4513 = vpow2.f32 %v4000_v58 }
 0x3f1   : > { %4515 = vpow2.f32 %v4003_v42 }
 0x3f2   : > { %4517 = vpow2.f32 %v4002_v61 }
 0x3f4   : > { %v4504_v54 = vpop.eup %4503 }
 0x3f5   : > { %v4506_v28 = vpop.eup %4505  ;;  %v2099_v57 = vadd.f32 1.0, %v4504_v54 }
 0x3f6   : > { %v2098_v12 = vadd.f32 1.0, %v4506_v28 }
 0x3f7   : > { %v4508_v4 = vpop.eup %4507  ;;  %4519 = vrcp.f32 %v2099_v57 }
 0x3f8   : > { %v4510_v53 = vpop.eup %4509  ;;  %4521 = vrcp.f32 %v2098_v12  ;;  %v2101_v13 = vadd.f32 1.0, %v4508_v4 }
 0x3f9   : > { %v4512_v51 = vpop.eup %4511  ;;  %v2100_v59 = vadd.f32 1.0, %v4510_v53 }
 0x3fa   : > { %v4514_v25 = vpop.eup %4513  ;;  %4523 = vrcp.f32 %v2101_v13  ;;  %v2103_v27 = vadd.f32 1.0, %v4512_v51 }
 0x3fb   : > { %v4516_v34 = vpop.eup %4515  ;;  %v2102_v52 = vadd.f32 1.0, %v4514_v25  ;;  %4525 = vrcp.f32 %v2100_v59 }
 0x3fc   : > { %v4518_v63 = vpop.eup %4517  ;;  %v2105_v29 = vadd.f32 1.0, %v4516_v34  ;;  %4527 = vrcp.f32 %v2103_v27 }
 0x3fd   : > { %4529 = vrcp.f32 %v2102_v52  ;;  %v2104_v38 = vadd.f32 1.0, %v4518_v63 }
 0x3fe   : > { %4531 = vrcp.f32 %v2105_v29 }
 0x3ff   : > { %4533 = vrcp.f32 %v2104_v38 }
 0x401   : > { %v4520_v19 = vpop.eup %4519 }
 0x402   : > { %v4522_v31 = vpop.eup %4521  ;;  %v2123_v30 = vmul.f32 %v4520_v19, %v6040_v46 }
 0x403   : > { %v2122_v39 = vmul.f32 %v4522_v31, %v6044_v35 }
 0x404   : > { %v4524_v3 = vpop.eup %4523 }
 0x405   : > { %v4526_v18 = vpop.eup %4525  ;;  %v2125_v56 = vmul.f32 %v4524_v3, %v2051_v40 }
 0x406   : > { %v4528_v47 = vpop.eup %4527  ;;  %v2124_v35 = vmul.f32 %v4526_v18, %v6172_v7 }
 0x407   : > { %v4530_v0 = vpop.eup %4529  ;;  %v2127_v10 = vmul.f32 %v4528_v47, %v6177_v62  ;;  %v6219_v47 = vpop.permute.xlu1 %2315 }
 0x408   : > { %v4532_v44 = vpop.eup %4531  ;;  %v2126_v11 = vmul.f32 %v4530_v0, %v6181_v26 }
 0x409   : > { %v4534_v37 = vpop.eup %4533  ;;  %v2129_v61 = vmul.f32 %v4532_v44, %v6186_v48 }
 0x40a   : > { %v2128_v53 = vmul.f32 %v4534_v37, %v6192_v60 }
 0x40d   : > { %v4162_v6 = vpop.f32.mrb[8].mxu0 }
 0x40e   : > { %v2204_v5 = vmul.f32 %v4162_v6, %v2123_v30  ;;  %v1911_v21 = vpop.f32.mrb[9].mxu0 }
 0x40f   : > { %v2203_v16 = vmul.f32 %v2122_v39, %v1911_v21 }
 0x410   : > { %v2216_v1 = vmul.f32 %v6001_v43, %v2204_v5 }
 0x411   : > { %v2215_v45 = vmul.f32 %v6001_v43, %v2203_v16  ;;  %v4165_v50 = vpop.f32.mrb[10].mxu0 }
 0x412   : > { %v2230_v49 = vsel %vm993_vm1, %v2216_v1, 0.0  ;;  %v2206_v2 = vmul.f32 %v4165_v50, %v2125_v56  ;;  %v1921_v55 = vpop.f32.mrb[11].mxu0 }
 0x413   : > { %v2231_v33 = vrot.slane %v2230_v49, 4  ;;  %v2223_v46 = vsel %vm993_vm1, %v2215_v45, 0.0  ;;  %v2205_v9 = vmul.f32 %v2124_v35, %v1921_v55 }
 0x414   : > { %v2224_v24 = vrot.slane %v2223_v46, 4  ;;  %v2218_v32 = vmul.f32 %v6001_v43, %v2206_v2 }
 0x415   : > { %v2232_v17 = vadd.f32 %v2231_v33, %v2230_v49  ;;  %v2217_v20 = vmul.f32 %v6001_v43, %v2205_v9  ;;  %v4168_v15 = vpop.f32.mrb[12].mxu0 }
 0x416   : > { %v2225_v36 = vadd.f32 %v2224_v24, %v2223_v46  ;;  %v2244_v40 = vsel %vm993_vm1, %v2218_v32, 0.0  ;;  %v2208_v7 = vmul.f32 %v4168_v15, %v2127_v10  ;;  %v1931_v8 = vpop.f32.mrb[13].mxu0 }
 0x417   : > { %v2233_v22 = vrot.slane %v2232_v17, 2  ;;  %v2245_v14 = vrot.slane %v2244_v40, 4  ;;  %v2237_v58 = vsel %vm993_vm1, %v2217_v20, 0.0  ;;  %v2207_v54 = vmul.f32 %v2126_v11, %v1931_v8 }
 0x418   : > { %v2226_v23 = vrot.slane %v2225_v36, 2  ;;  %v2238_v62 = vrot.slane %v2237_v58, 4  ;;  %v2220_v28 = vmul.f32 %v6001_v43, %v2208_v7 }
 0x419   : > { %v2234_v41 = vadd.f32 %v2233_v22, %v2232_v17  ;;  %v2246_v12 = vadd.f32 %v2245_v14, %v2244_v40  ;;  %v2219_v26 = vmul.f32 %v6001_v43, %v2207_v54  ;;  %v4171_v4 = vpop.f32.mrb[14].mxu0 }
 0x41a   : > { %v2227_v42 = vadd.f32 %v2226_v23, %v2225_v36  ;;  %v2239_v51 = vadd.f32 %v2238_v62, %v2237_v58  ;;  %v2258_v59 = vsel %vm993_vm1, %v2220_v28, 0.0  ;;  %v2210_v25 = vmul.f32 %v4171_v4, %v2129_v61  ;;  %v1941_v27 = vpop.f32.mrb[15].mxu0 }
 0x41b   : > { %v2235_v57 = vrot.slane %v2234_v41, 1  ;;  %v2247_v52 = vrot.slane %v2246_v12, 2  ;;  %v2259_v63 = vrot.slane %v2258_v59, 4  ;;  %v2251_v19 = vsel %vm993_vm1, %v2219_v26, 0.0 }
 0x41c   : > { %v2228_v13 = vrot.slane %v2227_v42, 1  ;;  %v2240_v48 = vrot.slane %v2239_v51, 2  ;;  %v2252_v31 = vrot.slane %v2251_v19, 4  ;;  %v2222_v38 = vmul.f32 %v6001_v43, %v2210_v25 }
 0x41d   : > { %v2236_v34 = vadd.f32 %v2235_v57, %v2234_v41  ;;  %v2248_v30 = vadd.f32 %v2247_v52, %v2246_v12  ;;  %v2260_v6 = vadd.f32 %v2259_v63, %v2258_v59  ;;  %v2209_v39 = vmul.f32 %v2128_v53, %v1941_v27  ;;  %v2199_v60 = vpop.f32.mrb[16].mxu0  ;;  %v2279_v59 = vld [vmem:[#allocation4] sm:$0xff] }
 0x41e   : > { %v2229_v29 = vadd.f32 %v2228_v13, %v2227_v42  ;;  %v2241_v21 = vadd.f32 %v2240_v48, %v2239_v51  ;;  %v2253_v3 = vadd.f32 %v2252_v31, %v2251_v19  ;;  %v2272_v16 = vsel %vm993_vm1, %v2222_v38, 0.0  ;;  %v4192_v18 = vpop.f32.mrb[17].mxu0 }
 0x41f   : > { %v2249_v1 = vrot.slane %v2248_v30, 1  ;;  %v2261_v45 = vrot.slane %v2260_v6, 2  ;;  %v2273_v49 = vrot.slane %v2272_v16, 4  ;;  %v2221_v56 = vmul.f32 %v6001_v43, %v2209_v39 }
 0x420   : > { %v2289_v5 = vsel %vm1541_vm5, %v2236_v34, %v2229_v29  ;;  %v2242_v33 = vrot.slane %v2241_v21, 1  ;;  %v2254_v46 = vrot.slane %v2253_v3, 2  ;;  %v2280_v29 = vmul.f32 %v2279_v59, %v2199_v60 }
 0x421   : > { %v2262_v50 = vadd.f32 %v2261_v45, %v2260_v6  ;;  %v2274_v35 = vadd.f32 %v2273_v49, %v2272_v16  ;;  %v2265_v0 = vsel %vm993_vm1, %v2221_v56, 0.0  ;;  %v4199_v24 = vpop.f32.mrb[18].mxu0  ;;  %v2250_v32 = vadd.f32 %v2249_v1, %v2248_v30 }
 0x422   : > { %v2243_v2 = vadd.f32 %v2242_v33, %v2241_v21  ;;  %v2255_v55 = vadd.f32 %v2254_v46, %v2253_v3  ;;  %v2266_v17 = vrot.slane %v2265_v0, 4  ;;  %v6223_v9 = vadd.f32 %v4199_v24, %v6219_v47  ;;  %v2384_v36 = vpop.f32.mrb[19].mxu0 }
 0x423   : > { %v2263_v10 = vrot.slane %v2262_v50, 1  ;;  %v2275_v44 = vrot.slane %v2274_v35, 2  ;;  %v6226_v43 = vadd.f32 %v2384_v36, %v6219_v47  ;;  %v6263_v36 = vld [vmem:[%s5423_s5] sm:$0xff] }
 0x424   : > { %v2290_v22 = vsel %vm1543_vm6, %v2243_v2, %v2289_v5  ;;  %v2256_v20 = vrot.slane %v2255_v55, 1  ;;  %v2267_v15 = vadd.f32 %v2266_v17, %v2265_v0  ;;  %v4016_v11 = vmul.f32 -1.442695, %v6223_v9 }
 0x425   : > { %v2276_v37 = vadd.f32 %v2275_v44, %v2274_v35  ;;  %v2291_v23 = vsel %vm1545_vm7, %v2250_v32, %v2290_v22  ;;  %v4015_v40 = vmul.f32 -1.442695, %v6226_v43  ;;  %v4202_v7 = vpop.f32.mrb[20].mxu0  ;;  %v2264_v54 = vadd.f32 %v2263_v10, %v2262_v50  ;;  %v6266_v32 = vld [vmem:[%s5423_s5 + $0x8] sm:$0xff]  ;;  %v6269_v10 = vld [vmem:[%s5423_s5 + $0x10] sm:$0xff]  ;;  %s4967_s5 = smov [#allocation21]  }
 0x426   : > { %v2257_v8 = vadd.f32 %v2256_v20, %v2255_v55  ;;  %v2268_v41 = vrot.slane %v2267_v15, 2  ;;  %4535 = vpow2.f32 %v4016_v11  ;;  %v6233_v14 = vadd.f32 %v4202_v7, %v6219_v47  ;;  %v2394_v58 = vpop.f32.mrb[21].mxu0  ;;  %s4817_s20 = sshll.u32 %s4967_s5, 4  ;;  %s4818_s20 = int_to_ptr.vmem [resolvable:$false] %s4817_s20 }
 0x427   : > { %4537 = vpow2.f32 %v4015_v40  ;;  %v6236_v42 = vadd.f32 %v2394_v58, %v6219_v47  ;;  %v2277_v57 = vrot.slane %v2276_v37, 1  ;;  %s4819_s14 = scalar_lea.vmem %s4818_s20, 768  ;;  %p4820_p1 = scmp.lt.s32.totalorder %s6387_s26, %s4818_s20 }
 0x428   : > { %v2269_v62 = vadd.f32 %v2268_v41, %v2267_v15  ;;  %v2292_v28 = vsel %vm1547_vm8, %v2257_v8, %v2291_v23  ;;  %v4018_v61 = vmul.f32 -1.442695, %v6233_v14 }
 0x429   : > { %v2293_v12 = vsel %vm1549_vm9, %v2264_v54, %v2292_v28  ;;  %v4017_v26 = vmul.f32 -1.442695, %v6236_v42  ;;  %v4205_v4 = vpop.f32.mrb[22].mxu0  ;;  %v2278_v52 = vadd.f32 %v2277_v57, %v2276_v37 }
 0x42a   : > { %v2270_v53 = vrot.slane %v2269_v62, 1  ;;  %4539 = vpow2.f32 %v4018_v61  ;;  %v6243_v13 = vadd.f32 %v4205_v4, %v6219_v47  ;;  %v2404_v51 = vpop.f32.mrb[23].mxu0 }
 0x42b   : > { %v6246_v25 = vadd.f32 %v2404_v51, %v6219_v47  ;;  %4541 = vpow2.f32 %v4017_v26 }
 0x42c   : > { %v2271_v27 = vadd.f32 %v2270_v53, %v2269_v62  ;;  %v4020_v34 = vmul.f32 -1.442695, %v6243_v13 }
 0x42d   : > { %v4019_v63 = vmul.f32 -1.442695, %v6246_v25  ;;  %v4208_v19 = vpop.f32.mrb[24].mxu0 }
 0x42e   : > { %v2294_v48 = vsel %vm1551_vm10, %v2271_v27, %v2293_v12  ;;  %4543 = vpow2.f32 %v4020_v34  ;;  %v6252_v31 = vadd.f32 %v4208_v19, %v6219_v47  ;;  %v2414_v38 = vpop.f32.mrb[25].mxu0 }
 0x42f   : > { %v2295_v30 = vsel %vm1553_vm11, %v2278_v52, %v2294_v48  ;;  %4545 = vpow2.f32 %v4019_v63  ;;  %v6258_v1 = vadd.f32 %v2414_v38, %v6219_v47 }
 0x430   : > { %v4536_v6 = vpop.eup %4535  ;;  %v2297_v39 = vadd.f32 %v2295_v30, %v2280_v29  ;;  %v4022_v5 = vmul.f32 -1.442695, %v6252_v31 }
 0x431   : > { %v4538_v21 = vpop.eup %4537  ;;  %v2448_v3 = vadd.f32 1.0, %v4536_v6  ;;  %v4021_v50 = vmul.f32 -1.442695, %v6258_v1 }
 0x432   : > { %2298 = vst.msk [vmem:[#allocation4] sm:$0xff] %vm993_vm1, %v2297_v39  ;;  %v2447_v16 = vadd.f32 1.0, %v4538_v21  ;;  %4547 = vpow2.f32 %v4022_v5 }
 0x433   : > { %4549 = vrcp.f32 %v2448_v3 }
 0x434   : > { %v4540_v60 = vpop.eup %4539  ;;  %4551 = vrcp.f32 %v2447_v16 }
 0x435   : > { %v2450_v18 = vadd.f32 1.0, %v4540_v60  ;;  %v4542_v56 = vpop.eup %4541 }
 0x436   : > { %v3443_v45 = vpop.f32.mrb[26].mxu0  ;;  %v2449_v0 = vadd.f32 1.0, %v4542_v56 }
 0x437   : > { %v4229_v49 = vpop.f32.mrb[27].mxu0  ;;  %4553 = vrcp.f32 %v2450_v18 }
 0x438   : > { %v4544_v33 = vpop.eup %4543  ;;  %4555 = vpow2.f32 %v4021_v50 }
 0x439   : > { %v4546_v46 = vpop.eup %4545  ;;  %v3447_v35 = vld [vmem:[#allocation4] sm:$0xff]  ;;  %v2452_v2 = vadd.f32 1.0, %v4544_v33  ;;  %4557 = vrcp.f32 %v2449_v0 }
 0x43a   : > { %v3448_v24 = vmul.f32 %v3447_v35, %v3443_v45  ;;  %v2451_v17 = vadd.f32 1.0, %v4546_v46 }
 0x43b   : > { %4559 = vrcp.f32 %v2452_v2 }
 0x43c   : > { %v4548_v55 = vpop.eup %4547  ;;  %4239 = vmatmul.mubr.msk.f32.vlgmr.msra.gmra.mrb[24].mxu1 %vm993_vm1, %v3448_v24  ;;  %4561 = vrcp.f32 %v2451_v17 }
 0x43d   : > { %v4550_v47 = vpop.eup %4549  ;;  %v2454_v41 = vadd.f32 1.0, %v4548_v55 }
 0x43e   : > { %v4552_v44 = vpop.eup %4551  ;;  %v2472_v22 = vmul.f32 %v4550_v47, %v6223_v9 }
 0x43f   : > { %v2471_v20 = vmul.f32 %v4552_v44, %v6226_v43  ;;  %4563 = vrcp.f32 %v2454_v41 }
 0x440   : > { %v2696_v15 = vmul.f32 %v6263_v36, %v2472_v22  ;;  %v2919_v11 = vmul.f32 %v6266_v32, %v2472_v22  ;;  %v3142_v37 = vmul.f32 %v6269_v10, %v2472_v22 }
 0x441   : > { %v4554_v23 = vpop.eup %4553  ;;  %v2695_v40 = vmul.f32 %v6263_v36, %v2471_v20  ;;  %v2918_v7 = vmul.f32 %v6266_v32, %v2471_v20  ;;  %v3141_v8 = vmul.f32 %v6269_v10, %v2471_v20 }
 0x442   : > { %v2710_v9 = vsel %vm993_vm1, %v2696_v15, 0.0  ;;  %v2933_v43 = vsel %vm993_vm1, %v2919_v11, 0.0  ;;  %v3156_v58 = vsel %vm993_vm1, %v3142_v37, 0.0  ;;  %v2474_v54 = vmul.f32 %v4554_v23, %v6233_v14  ;;  %v4556_v29 = vpop.eup %4555 }
 0x443   : > { %v2711_v62 = vrot.slane %v2710_v9, 4  ;;  %v2934_v28 = vrot.slane %v2933_v43, 4  ;;  %v3157_v61 = vrot.slane %v3156_v58, 4  ;;  %v2703_v57 = vsel %vm993_vm1, %v2695_v40, 0.0  ;;  %v4558_v39 = vpop.eup %4557 }
 0x444   : > { %v2704_v12 = vrot.slane %v2703_v57, 4  ;;  %v2926_v26 = vsel %vm993_vm1, %v2918_v7, 0.0  ;;  %v3149_v4 = vsel %vm993_vm1, %v3141_v8, 0.0  ;;  %v2698_v53 = vmul.f32 %v6263_v36, %v2474_v54 }
 0x445   : > { %v2712_v51 = vadd.f32 %v2711_v62, %v2710_v9  ;;  %v2935_v59 = vadd.f32 %v2934_v28, %v2933_v43  ;;  %v3158_v27 = vadd.f32 %v3157_v61, %v3156_v58  ;;  %v2927_v34 = vrot.slane %v2926_v26, 4  ;;  %v4560_v60 = vpop.eup %4559 }
 0x446   : > { %v2705_v52 = vadd.f32 %v2704_v12, %v2703_v57  ;;  %v3150_v63 = vrot.slane %v3149_v4, 4  ;;  %v2724_v14 = vsel %vm993_vm1, %v2698_v53, 0.0  ;;  %v2921_v19 = vmul.f32 %v6266_v32, %v2474_v54  ;;  %v4562_v33 = vpop.eup %4561 }
 0x447   : > { %v2713_v48 = vrot.slane %v2712_v51, 2  ;;  %v2936_v38 = vrot.slane %v2935_v59, 2  ;;  %v3159_v30 = vrot.slane %v3158_v27, 2  ;;  %v2928_v6 = vadd.f32 %v2927_v34, %v2926_v26 }
 0x448   : > { %v2706_v5 = vrot.slane %v2705_v52, 2  ;;  %v3151_v21 = vadd.f32 %v3150_v63, %v3149_v4  ;;  %v2725_v3 = vrot.slane %v2724_v14, 4  ;;  %v2947_v16 = vsel %vm993_vm1, %v2921_v19, 0.0 }
 0x449   : > { %v2714_v18 = vadd.f32 %v2713_v48, %v2712_v51  ;;  %v2937_v45 = vadd.f32 %v2936_v38, %v2935_v59  ;;  %v3160_v49 = vadd.f32 %v3159_v30, %v3158_v27  ;;  %v2929_v56 = vrot.slane %v2928_v6, 2 }
 0x44a   : > { %v2707_v46 = vadd.f32 %v2706_v5, %v2705_v52  ;;  %v3152_v50 = vrot.slane %v3151_v21, 2  ;;  %v2726_v35 = vadd.f32 %v2725_v3, %v2724_v14  ;;  %v2948_v0 = vrot.slane %v2947_v16, 4 }
 0x44b   : > { %v2715_v24 = vrot.slane %v2714_v18, 1  ;;  %v2938_v2 = vrot.slane %v2937_v45, 1  ;;  %v3161_v55 = vrot.slane %v3160_v49, 1  ;;  %v2930_v47 = vadd.f32 %v2929_v56, %v2928_v6  ;;  %v4564_v6 = vpop.eup %4563 }
 0x44c   : > { %v2708_v17 = vrot.slane %v2707_v46, 1  ;;  %v3153_v44 = vadd.f32 %v3152_v50, %v3151_v21  ;;  %v2727_v22 = vrot.slane %v2726_v35, 2  ;;  %v2949_v11 = vadd.f32 %v2948_v0, %v2947_v16 }
 0x44d   : > { %v6290_v20 = vadd.f32 %v2715_v24, %v2714_v18  ;;  %v6292_v15 = vadd.f32 %v2938_v2, %v2937_v45  ;;  %v6294_v37 = vadd.f32 1.0, %v4556_v29  ;;  %v6296_v23 = vadd.f32 %v3161_v55, %v3160_v49 }
 0x44e   : > { %v3144_v40 = vmul.f32 %v6269_v10, %v2474_v54  ;;  %v2473_v7 = vmul.f32 %v4558_v39, %v6236_v42  ;;  %v2476_v8 = vmul.f32 %v4560_v60, %v6243_v13  ;;  %v6301_v9 = vadd.f32 %v2708_v17, %v2707_v46 }
 0x44f   : > { %v2931_v43 = vrot.slane %v2930_v47, 1  ;;  %v3154_v58 = vrot.slane %v3153_v44, 1  ;;  %v2728_v41 = vadd.f32 %v2727_v22, %v2726_v35  ;;  %v2950_v12 = vrot.slane %v2949_v11, 2 }
 0x450   : > { %v3170_v62 = vsel %vm993_vm1, %v3144_v40, 0.0  ;;  %v2697_v28 = vmul.f32 %v6263_v36, %v2473_v7  ;;  %v2920_v61 = vmul.f32 %v6266_v32, %v2473_v7  ;;  %v3143_v57 = vmul.f32 %v6269_v10, %v2473_v7 }
 0x451   : > { %v3171_v26 = vrot.slane %v3170_v62, 4  ;;  %v2700_v54 = vmul.f32 %v6263_v36, %v2476_v8  ;;  %v2475_v42 = vmul.f32 %v4562_v33, %v6246_v25  ;;  %v2923_v51 = vmul.f32 %v6266_v32, %v2476_v8 }
 0x452   : > { %v2717_v13 = vsel %vm993_vm1, %v2697_v28, 0.0  ;;  %v2940_v4 = vsel %vm993_vm1, %v2920_v61, 0.0  ;;  %v3163_v53 = vsel %vm993_vm1, %v3143_v57, 0.0  ;;  %v2729_v59 = vrot.slane %v2728_v41, 1 }
 0x453   : > { %v3172_v27 = vadd.f32 %v3171_v26, %v3170_v62  ;;  %v2718_v34 = vrot.slane %v2717_v13, 4  ;;  %v2941_v52 = vrot.slane %v2940_v4, 4  ;;  %v3164_v63 = vrot.slane %v3163_v53, 4 }
 0x454   : > { %v2738_v14 = vsel %vm993_vm1, %v2700_v54, 0.0  ;;  %v2961_v19 = vsel %vm993_vm1, %v2923_v51, 0.0  ;;  %v3146_v29 = vmul.f32 %v6269_v10, %v2476_v8  ;;  %v2699_v3 = vmul.f32 %v6263_v36, %v2475_v42 }
 0x455   : > { %v3173_v25 = vrot.slane %v3172_v27, 2  ;;  %v2719_v48 = vadd.f32 %v2718_v34, %v2717_v13  ;;  %v2942_v38 = vadd.f32 %v2941_v52, %v2940_v4  ;;  %v2739_v30 = vrot.slane %v2738_v14, 4 }
 0x456   : > { %v3165_v39 = vadd.f32 %v3164_v63, %v3163_v53  ;;  %v2962_v5 = vrot.slane %v2961_v19, 4  ;;  %v3184_v21 = vsel %vm993_vm1, %v3146_v29, 0.0  ;;  %v6318_v49 = vadd.f32 %v2950_v12, %v2949_v11 }
 0x457   : > { %v3174_v16 = vadd.f32 %v3173_v25, %v3172_v27  ;;  %v2720_v60 = vrot.slane %v2719_v48, 2  ;;  %v2943_v18 = vrot.slane %v2942_v38, 2  ;;  %v2740_v45 = vadd.f32 %v2739_v30, %v2738_v14 }
 0x458   : > { %v3166_v56 = vrot.slane %v3165_v39, 2  ;;  %v3185_v33 = vrot.slane %v3184_v21, 4  ;;  %v2731_v46 = vsel %vm993_vm1, %v2699_v3, 0.0  ;;  %v2963_v24 = vadd.f32 %v2962_v5, %v2961_v19 }
 0x459   : > { %v3175_v50 = vrot.slane %v3174_v16, 1  ;;  %v2721_v35 = vadd.f32 %v2720_v60, %v2719_v48  ;;  %v2741_v0 = vrot.slane %v2740_v45, 2  ;;  %v2944_v2 = vadd.f32 %v2943_v18, %v2942_v38 }
 0x45a   : > { %v3167_v55 = vadd.f32 %v3166_v56, %v3165_v39  ;;  %v3186_v17 = vadd.f32 %v3185_v33, %v3184_v21  ;;  %v2732_v22 = vrot.slane %v2731_v46, 4  ;;  %v6321_v40 = vadd.f32 %v2931_v43, %v2930_v47 }
 0x45b   : > { %v3155_v7 = vadd.f32 %v3154_v58, %v3153_v44  ;;  %v2722_v8 = vrot.slane %v2721_v35, 1  ;;  %v2742_v62 = vadd.f32 %v2741_v0, %v2740_v45  ;;  %v2730_v28 = vadd.f32 %v2729_v59, %v2728_v41 }
 0x45c   : > { %v3168_v11 = vrot.slane %v3167_v55, 1  ;;  %v3187_v61 = vrot.slane %v3186_v17, 2  ;;  %v2733_v57 = vadd.f32 %v2732_v22, %v2731_v46  ;;  %v2952_v12 = vrot.slane %v6318_v49, 1 }
 0x45d   : > { %v3176_v26 = vadd.f32 %v3175_v50, %v3174_v16  ;;  %v2964_v54 = vrot.slane %v2963_v24, 2  ;;  %v2922_v13 = vmul.f32 %v6266_v32, %v2475_v42  ;;  %v2723_v4 = vadd.f32 %v2722_v8, %v2721_v35 }
 0x45e   : > { %v2945_v53 = vrot.slane %v2944_v2, 1  ;;  %v2743_v51 = vrot.slane %v2742_v62, 1  ;;  %v2734_v27 = vrot.slane %v2733_v57, 2  ;;  %v3145_v44 = vmul.f32 %v6269_v10, %v2475_v42 }
 0x45f   : > { %v2954_v47 = vsel %vm993_vm1, %v2922_v13, 0.0  ;;  %v2478_v43 = vmul.f32 %v4564_v6, %v6252_v31  ;;  %4565 = vrcp.f32 %v6294_v37  ;;  %v3169_v58 = vadd.f32 %v3168_v11, %v3167_v55 }
 0x460   : > { %v3188_v41 = vadd.f32 %v3187_v61, %v3186_v17  ;;  %v2735_v59 = vadd.f32 %v2734_v27, %v2733_v57  ;;  %v2955_v34 = vrot.slane %v2954_v47, 4  ;;  %v3177_v52 = vsel %vm993_vm1, %v3145_v44, 0.0 }
 0x461   : > { %v2702_v63 = vmul.f32 %v6263_v36, %v2478_v43  ;;  %v2925_v14 = vmul.f32 %v6266_v32, %v2478_v43  ;;  %v3148_v19 = vmul.f32 %v6269_v10, %v2478_v43  ;;  %v3178_v48 = vrot.slane %v3177_v52, 4 }
 0x462   : > { %v2736_v29 = vrot.slane %v2735_v59, 1  ;;  %v2956_v25 = vadd.f32 %v2955_v34, %v2954_v47  ;;  %v2889_v31 = vsel %vm1541_vm5, %v6290_v20, %v6301_v9  ;;  %v2744_v60 = vadd.f32 %v2743_v51, %v2742_v62 }
 0x463   : > { %v2752_v37 = vsel %vm993_vm1, %v2702_v63, 0.0  ;;  %v2975_v42 = vsel %vm993_vm1, %v2925_v14, 0.0  ;;  %v3198_v38 = vsel %vm993_vm1, %v3148_v19, 0.0  ;;  %v2890_v30 = vsel %vm1543_vm6, %v2723_v4, %v2889_v31 }
 0x464   : > { %v2737_v6 = vadd.f32 %v2736_v29, %v2735_v59  ;;  %v2957_v39 = vrot.slane %v2956_v25, 2  ;;  %v3179_v5 = vadd.f32 %v3178_v48, %v3177_v52  ;;  %v2753_v21 = vrot.slane %v2752_v37, 4 }
 0x465   : > { %v2976_v3 = vrot.slane %v2975_v42, 4  ;;  %v3199_v16 = vrot.slane %v3198_v38, 4  ;;  %v2891_v18 = vsel %vm1545_vm7, %v2730_v28, %v2890_v30  ;;  %v2965_v45 = vadd.f32 %v2964_v54, %v2963_v24  ;;  %v2914_v30 = vpop.permute.xlu0 %2913 }
 0x466   : > { %v2958_v56 = vadd.f32 %v2957_v39, %v2956_v25  ;;  %v3180_v20 = vrot.slane %v3179_v5, 2  ;;  %v2892_v9 = vsel %vm1547_vm8, %v2737_v6, %v2891_v18  ;;  %v3189_v33 = vrot.slane %v3188_v41, 1 }
 0x467   : > { %v2754_v46 = vadd.f32 %v2753_v21, %v2752_v37  ;;  %v6343_v50 = vsel %vm1549_vm9, %v2744_v60, %v2892_v9  ;;  %v3335_v35 = vsel %vm1541_vm5, %v6296_v23, %v3155_v7  ;;  %v2946_v0 = vadd.f32 %v2945_v53, %v2944_v2 }
 0x468   : > { %v3181_v55 = vadd.f32 %v3180_v20, %v3179_v5  ;;  %v3336_v17 = vsel %vm1543_vm6, %v3169_v58, %v3335_v35  ;;  %v2959_v8 = vrot.slane %v2958_v56, 1  ;;  %v2977_v62 = vadd.f32 %v2976_v3, %v2975_v42  ;;  %v2880_v20 = vld [vmem:[#allocation5] sm:$0xff]  ;;  %v3103_v35 = vld [vmem:[#allocation5 + $0x8] sm:$0xff] }
 0x469   : > { %v4566_v22 = vpop.eup %4565  ;;  %v3200_v24 = vadd.f32 %v3199_v16, %v3198_v38  ;;  %v3337_v28 = vsel %vm1545_vm7, %v3176_v26, %v3336_v17  ;;  %v2953_v11 = vadd.f32 %v2952_v12, %v6318_v49  ;;  %v2966_v54 = vrot.slane %v2965_v45, 1 }
 0x46a   : > { %v3182_v61 = vrot.slane %v3181_v55, 1  ;;  %v2477_v57 = vmul.f32 %v4566_v22, %v6258_v1  ;;  %v2755_v13 = vrot.slane %v2754_v46, 2  ;;  %v3190_v4 = vadd.f32 %v3189_v33, %v3188_v41  ;;  %v3326_v33 = vld [vmem:[#allocation5 + $0x10] sm:$0xff] }
 0x46b   : > { %v3112_v23 = vsel %vm1541_vm5, %v6292_v15, %v6321_v40  ;;  %v2960_v26 = vadd.f32 %v2959_v8, %v2958_v56  ;;  %v3201_v27 = vrot.slane %v3200_v24, 2  ;;  %v2978_v49 = vrot.slane %v2977_v62, 2  ;;  %v3360_v8 = vpop.permute.xlu0 %3359 }
 0x46c   : > { %v3183_v2 = vadd.f32 %v3182_v61, %v3181_v55  ;;  %v2701_v7 = vmul.f32 %v6263_v36, %v2477_v57  ;;  %v2924_v53 = vmul.f32 %v6266_v32, %v2477_v57  ;;  %v3147_v51 = vmul.f32 %v6269_v10, %v2477_v57 }
 0x46d   : > { %v3113_v12 = vsel %vm1543_vm6, %v2946_v0, %v3112_v23  ;;  %v2967_v58 = vadd.f32 %v2966_v54, %v2965_v45  ;;  %v2756_v63 = vadd.f32 %v2755_v13, %v2754_v46  ;;  %v3202_v14 = vadd.f32 %v3201_v27, %v3200_v24  ;;  %v3137_v24 = vpop.permute.xlu1 %3136 }
 0x46e   : > { %v2745_v1 = vsel %vm993_vm1, %v2701_v7, 0.0  ;;  %v2968_v47 = vsel %vm993_vm1, %v2924_v53, 0.0  ;;  %v3191_v44 = vsel %vm993_vm1, %v3147_v51, 0.0  ;;  %v3338_v15 = vsel %vm1547_vm8, %v3183_v2, %v3337_v28  ;;  %v3544_v2 = vld [vmem:[%s959_s19] sm:$0xff]  ;;  %v3545_v7 = vld [vmem:[%s959_s19 + $0x8] sm:$0xff]  ;;  %v3546_v53 = vld [vmem:[%s959_s19 + $0x10] sm:$0xff] }
 0x46f   : > { %v2746_v40 = vrot.slane %v2745_v1, 4  ;;  %v2969_v43 = vrot.slane %v2968_v47, 4  ;;  %v3192_v36 = vrot.slane %v3191_v44, 4  ;;  %v3339_v32 = vsel %vm1549_vm9, %v3190_v4, %v3338_v15  ;;  %v4041_v4 = vld [vmem:[%s6589_s16] ss:$0 sm:$0xff] }
 0x470   : > { %v3114_v10 = vsel %vm1545_vm7, %v2953_v11, %v3113_v12  ;;  %v2979_v19 = vadd.f32 %v2978_v49, %v2977_v62  ;;  %v2757_v6 = vrot.slane %v2756_v63, 1  ;;  %v3203_v39 = vrot.slane %v3202_v14, 1 }
 0x471   : > { %v2747_v41 = vadd.f32 %v2746_v40, %v2745_v1  ;;  %v2970_v59 = vadd.f32 %v2969_v43, %v2968_v47  ;;  %v3193_v34 = vadd.f32 %v3192_v36, %v3191_v44  ;;  %v3115_v52 = vsel %vm1547_vm8, %v2960_v26, %v3114_v10 }
 0x472   : > { %v3116_v29 = vsel %vm1549_vm9, %v2967_v58, %v3115_v52  ;;  %v2980_v5 = vrot.slane %v2979_v19, 1  ;;  %v2758_v56 = vadd.f32 %v2757_v6, %v2756_v63  ;;  %v3204_v9 = vadd.f32 %v3203_v39, %v3202_v14 }
 0x473   : > { %v2748_v25 = vrot.slane %v2747_v41, 2  ;;  %v2971_v48 = vrot.slane %v2970_v59, 2  ;;  %v3194_v31 = vrot.slane %v3193_v34, 2 }
 0x474   : > { %v2981_v46 = vadd.f32 %v2980_v5, %v2979_v19 }
 0x475   : > { %v2749_v37 = vadd.f32 %v2748_v25, %v2747_v41  ;;  %v2972_v42 = vadd.f32 %v2971_v48, %v2970_v59  ;;  %v3195_v38 = vadd.f32 %v3194_v31, %v3193_v34 }
 0x477   : > { %v2750_v21 = vrot.slane %v2749_v37, 1  ;;  %v3196_v3 = vrot.slane %v3195_v38, 1  ;;  %v2973_v16 = vrot.slane %v2972_v42, 1 }
 0x479   : > { %v2751_v60 = vadd.f32 %v2750_v21, %v2749_v37  ;;  %v3197_v18 = vadd.f32 %v3196_v3, %v3195_v38  ;;  %v2974_v45 = vadd.f32 %v2973_v16, %v2972_v42 }
 0x47b   : > { %v2894_v0 = vsel %vm1551_vm10, %v2751_v60, %v6343_v50  ;;  %v3340_v55 = vsel %vm1551_vm10, %v3197_v18, %v3339_v32  ;;  %v3117_v17 = vsel %vm1551_vm10, %v2974_v45, %v3116_v29 }
 0x47c   : > { %v2895_v22 = vsel %vm1553_vm11, %v2758_v56, %v2894_v0  ;;  %v3341_v62 = vsel %vm1553_vm11, %v3204_v9, %v3340_v55  ;;  %v3118_v28 = vsel %vm1553_vm11, %v2981_v46, %v3117_v17 }
 0x47d   : > { %v2897_v11 = vadd.f32 %v2895_v22, %v2880_v20  ;;  %v3343_v61 = vadd.f32 %v3341_v62, %v3326_v33  ;;  %v3120_v57 = vadd.f32 %v3118_v28, %v3103_v35 }
 0x47f   : > { %v2916_v54 = vadd.f32 %v2914_v30, %v2897_v11  ;;  %v3362_v50 = vadd.f32 %v3360_v8, %v3343_v61  ;;  %v3139_v13 = vadd.f32 %v3137_v24, %v3120_v57 }
 0x481   : > { %2917 = vst.msk [vmem:[#allocation5] sm:$0xff] %vm993_vm1, %v2916_v54  ;;  %3363 = vst.msk [vmem:[#allocation5 + $0x10] sm:$0xff] %vm993_vm1, %v3362_v50 }
 0x482   : > { %3140 = vst.msk [vmem:[#allocation5 + $0x8] sm:$0xff] %vm993_vm1, %v3139_v13 }
 0x488   : > { %v3548_v1 = vld [vmem:[#allocation5] sm:$0xff]  ;;  %v3557_v44 = vld [vmem:[#allocation5 + $0x10] sm:$0xff] }
 0x489   : > { %v3552_v47 = vld [vmem:[#allocation5 + $0x8] sm:$0xff] }
 0x50f   : > { %v3529_v23 = vpop.f32.mrb[24].mxu1 }
 0x510   : > { %v3530_v51 = vadd.f32 %v4041_v4, %v3529_v23  ;;  %v4240_v26 = vpop.f32.mrb[25].mxu1 }
 0x512   : > { %v3547_v27 = vmul.f32 %v3544_v2, %v3530_v51  ;;  %v3551_v49 = vmul.f32 %v3545_v7, %v3530_v51  ;;  %v3556_v12 = vmul.f32 %v3546_v53, %v3530_v51  ;;  %3539 = vrot.lane.b32.xlu0 %v3530_v51, %s4961_s2  ;;  %3535 = vrot.lane.b32.xlu1 %v3530_v51, %s4959_s0  ;;  %s3567_s0 = scalar_lea.sflag [#allocation22], %s5402_s29  ;;  %s4813_s2 = scalar_lea.vmem %s6387_s26, 384 }
 0x513   : > { %p4814_p2 = scmp.ne.s32.totalorder %s6387_s26, %s4813_s2  ;;  %p4821_p5 = scmp.lt.s32.totalorder %s4819_s14, %s4813_s2 }
 0x514   : > { %v3549_v15 = vadd.f32 %v3548_v1, %v3547_v27  ;;  %v3553_v40 = vadd.f32 %v3552_v47, %v3551_v49  ;;  %v3558_v43 = vadd.f32 %v3557_v44, %v3556_v12 }
 0x515   : > { %p4815_p6 = pnand %p4814_p2, %p6592_p13  ;;  %p4822_p12 = por %p4821_p5, %p4820_p1 }
 0x516   : > { %3550 = vst.msk [vmem:[%s944_s18] sm:$0xff] %vm993_vm1, %v3549_v15  ;;  %4043 = vst.msk [vmem:[%s944_s18 + $0x8] sm:$0xff] %vm993_vm1, %v3553_v40 }
 0x517   : > { %4044 = vst.msk [vmem:[%s944_s18 + $0x10] sm:$0xff] %vm993_vm1, %v3558_v43  ;;  %p4816_p8 = pneg %p4815_p6 }
 0x519   : > { %p4823_p3 = pnand %p4822_p12, %p4816_p8 }
 0x51b   : > { %4826 = shalt.err (!%p4823_p3)
}
 0x51c   : > { %s4827_s19 = scalar_lea.hbm %s6392_s10, 384  ;;  %s4831_s16 = scalar_lea.hbm %s6591_s30, 768 }
 0x51d   : > { %p4828_p7 = scmp.ne.s32.totalorder %s6392_s10, %s4827_s19  ;;  %p4832_p9 = scmp.lt.u32.totalorder %s6392_s10, %s6591_s30 }
 0x51e   : > { %p4833_p4 = scmp.lt.u32.totalorder %s4831_s16, %s4827_s19  ;;  %p4835_p2 = scmp.lt.u32.totalorder %s4827_s19, %s6392_s10 }
 0x51f   : > { %p4829_p10 = pnand %p4828_p7, %p6592_p13 }
 0x520   : > { %p4834_p11 = por %p4833_p4, %p4832_p9 }
 0x521   : > { %p4830_p0 = pneg %p4829_p10 }
 0x522   : > { %p4836_p6 = por %p4835_p2, %p4834_p11 }
 0x524   : > { %p4837_p8 = pnand %p4836_p6, %p4830_p0 }
 0x526   : > { %4840 = shalt.err (!%p4837_p8)
}
 0x527   : > { %s4968_s23 = smov 128   ;;  %s4969_s15 = smov 8   ;;  %v3533_v36 = vld [vmem:[%s774_s24] sm:$0xff] }
 0x528   : > { %4299 = dma.vmem_to_hbm [thread:$0]  (%p6592_p13), %s6387_s26, 384, %s6392_s10, %s3567_s0, %s4968_s23, %s4968_s23, %s4969_s15  }
 0x529   : > { %s4046_s2 = sshll.u32 %s4939_s27, 7  ;;  %s937_s5 = scalar_lea.vmem [#allocation20], %s5405_s22 }
 0x52a   : > { %s3581_s20 = sshll.u32 %s937_s5, 4  ;;  %s6593_s13 = sld [smem:[#allocation50_spill]]  ;;  %s6430_s20 = int_to_ptr.vmem [resolvable:$true] %s3581_s20 }
 0x52b   : > { %s3562_s24 = scalar_lea.sflag [#allocation8], %s5402_s29  ;;  %s4841_s26 = scalar_lea.vmem %s6430_s20, 128 }
 0x52c   : > { %p4842_p1 = scmp.ne.s32.totalorder %s6430_s20, %s4841_s26  ;;  %s4970_s27 = smov [#allocation20]  }
 0x52d   : > { %s4845_s22 = sshll.u32 %s4970_s27, 4  ;;  %s4846_s22 = int_to_ptr.vmem [resolvable:$false] %s4845_s22 }
 0x52e   : > { %p4843_p5 = pnand %p4842_p1, %p6592_p13  ;;  %s4847_s10 = scalar_lea.vmem %s4846_s22, 256 }
 0x52f   : > { %p4848_p3 = scmp.lt.s32.totalorder %s6430_s20, %s4846_s22  ;;  %p4849_p7 = scmp.lt.s32.totalorder %s4847_s10, %s4841_s26 }
 0x530   : > { %s6428_s3 = scalar_lea.hbm %s6593_s13, %s4046_s2  ;;  %p4844_p12 = pneg %p4843_p5 }
 0x531   : > { %p4850_p10 = por %p4849_p7, %p4848_p3 }
 0x533   : > { %p4851_p0 = pnand %p4850_p10, %p4844_p12 }
 0x584   : > { %v3536_v32 = vpop.permute.xlu1 %3535  ;;  %v3540_v10 = vpop.permute.xlu0 %3539 }
 0x585   : > { %v3538_v58 = vmul.f32 %v3536_v32, %v3533_v36 }
 0x587   : > { %v3542_v41 = vadd.f32 %v3540_v10, %v3538_v58 }
 0x589   : > { %3543 = vst.msk [vmem:[%s937_s5] sm:$0xff] %vm993_vm1, %v3542_v41 }
 0x58a   : > { %4854 = shalt.err (!%p4851_p0)
}
 0x58b   : > { %s4855_s29 = scalar_lea.hbm %s6428_s3, 128  ;;  %s4859_s8 = scalar_lea.hbm %s6593_s13, 256 }
 0x58c   : > { %p4856_p9 = scmp.ne.s32.totalorder %s6428_s3, %s4855_s29  ;;  %p4860_p2 = scmp.lt.u32.totalorder %s6428_s3, %s6593_s13 }
 0x58d   : > { %p4861_p6 = scmp.lt.u32.totalorder %s4859_s8, %s4855_s29  ;;  %p4863_p1 = scmp.lt.u32.totalorder %s4855_s29, %s6428_s3 }
 0x58e   : > { %p4857_p4 = pnand %p4856_p9, %p6592_p13 }
 0x58f   : > { %p4862_p8 = por %p4861_p6, %p4860_p2 }
 0x590   : > { %p4858_p11 = pneg %p4857_p4 }
 0x591   : > { %p4864_p5 = por %p4863_p1, %p4862_p8 }
 0x593   : > { %p4865_p12 = pnand %p4864_p5, %p4858_p11 }
 0x595   : > { %4868 = shalt.err (!%p4865_p12)
}
 0x596   : > { %4298 = dma.vmem_to_hbm [thread:$0]  (%p6592_p13), %s6430_s20, 128, %s6428_s3, %s3562_s24  }
 0x597 PF: > { %s6594_s15 = sld [smem:[#allocation31_spill]]  ;;  %s6595_s2 = sld [smem:[#allocation34_spill]] }
 0x598   : > { %s6596_s5 = sld [smem:[#allocation33_spill]] }
 0x59d   : > { %s3610_s14 = sand.u32 1, %s6594_s15   ;;  %p6597_p3 = scmp.ne.s32.totalorder %s6595_s2, 0 }
 0x59e   : > { %p6598_p7 = scmp.ge.s32.totalorder %s6596_s5, 2  ;;  %s3611_s19 = scalar_lea.sflag [#allocation8], %s3610_s14 }
 0x5a0   : > { %p4329_p10 = pnand %p6598_p7, %p6597_p3 }
 0x5a2   : > { %4918 = dma.done.wait (!%p4329_p10), %s3611_s19, 128  }
 0x5a3   : > { %4920 = vsyncadd (!%p4329_p10), %s3611_s19, 4294967168  ;;  %s3620_s26 = scalar_lea.sflag [#allocation22], %s3610_s14 }
 0x5a4   : > { %4922 = dma.done.wait (!%p4329_p10), %s3620_s26, 384  }
 0x5a5   : > { %4924 = vsyncadd (!%p4329_p10), %s3620_s26, 4294966912  ;;  %s47_s29 = sadd.s32 1, %s6596_s5   ;;  %s6599_s6 = sld [smem:[#allocation32_spill]] }
 0x5a6   : > { %p44_p0 = scmp.ge.s32.totalorder %s47_s29, 4   ;;  %s6600_s26 = sld [smem:[#allocation37_spill]] }
 0x5a7   : > { %s6601_s20 = sld [smem:[#allocation35_spill]]  ;;  %s6602_s24 = smov %s4931_s25 }
 0x5a8   : > { %s6604_s27 = smov %s4943_s28  ;;  %46 = sbr.rel (!%p44_p0) target bundleno = 30 (0x1e), region = 239 }
 0x5ab   : > { %s6603_s25 = smov %s6599_s6 }
 0x5ad   : > { %s6605_s28 = smov %s6601_s20 }
 0x5af   :  { %3625 = vsyncpa [#allocation7], 1 }
 0x5b0   :  { %3627 = vsyncpa [#allocation7 + $0x1], 1 }
 0x5b1   :  { %3628 = vsyncpa [#allocation10], 1 }
 0x5b2   :  { %3630 = vsyncpa [#allocation10 + $0x1], 1 }
 0x5b3   :  { %3631 = vsyncpa [#allocation13], 1 }
 0x5b4   :  { %3633 = vsyncpa [#allocation13 + $0x1], 1 }
 0x5b5   :  { %3634 = vsyncpa [#allocation16], 1 }
 0x5b6   :  { %3636 = vsyncpa [#allocation16 + $0x1], 1 }
 0x5b7   :  { %3637 = vsyncpa [#allocation19], 1 }
 0x5b8   :  { %3638 = vsyncpa [#allocation8], 1 }
 0x5b9   :  { %3640 = vsyncpa [#allocation8 + $0x1], 1 }
 0x5ba   :  { %3641 = vsyncpa [#allocation22], 1 }
 0x5bb   :  { %3643 = vsyncpa [#allocation22 + $0x1], 1 }

</bundles_post_ra>
